<compile_context>
chip_gen: v7x
topology: tpu7x:2x2x1
jax: 0.10.0
libtpu: 0.0.40
codegen_flags: <defaults>
</compile_context>

<pallas_src>
import functools

import jax
import jax.numpy as jnp
from jax.experimental import pallas as pl
from jax.experimental.pallas import tpu as pltpu


# ----------------------------- Pallas kernels --------------------------------

def _conv_stats_kernel(x_ref, w_ref, y_ref, sum_ref, sq_ref, *,
                       kh, kw, stride, Wp, Wo):
    """Direct conv for one image + per-image channel statistics.

    x_ref:   (1, L, Cin)        flattened padded NHWC image (+ tail zero rows)
    w_ref:   (kh*kw, Cin, Cout) per-tap weight matrices
    y_ref:   (1, Qw, Cout)      "wide" conv output, Qw = Ho*Wp rows; columns with
                                (row % Wp) >= Wo are wrap-around junk (discarded)
    sum_ref: (1, 1, Cout)       sum over valid rows (BN partial)
    sq_ref:  (1, 1, Cout)       sum of squares over valid rows (BN partial)
    """
    qw = y_ref.shape[1]
    cin = x_ref.shape[-1]
    cout = w_ref.shape[-1]

    acc = jnp.zeros((qw, cout), jnp.float32)
    for dy in range(kh):
        for dx in range(kw):
            off = dy * Wp + dx
            if stride == 1:
                tap = x_ref[0, off:off + qw, :]                 # (Qw, Cin)
            else:
                tap = jax.lax.slice(x_ref[0], (off, 0),
                                    (off + stride * (qw - 1) + 1, cin),
                                    (stride, 1))
            acc = acc + jnp.dot(tap, w_ref[dy * kw + dx],
                                preferred_element_type=jnp.float32)

    y_ref[0] = acc

    # Channel statistics over the valid columns only (wo < Wo).
    col = jax.lax.broadcasted_iota(jnp.int32, (qw, 1), 0) % Wp
    accv = jnp.where(col < Wo, acc, 0.0)
    sum_ref[0] = jnp.sum(accv, axis=0, keepdims=True)
    sq_ref[0] = jnp.sum(accv * accv, axis=0, keepdims=True)


def _bn_act_kernel(y_ref, scale_ref, shift_ref, o_ref, *, activation):
    """Fused BN affine + ReLU over one image's rows (lane-dense when possible)."""
    z = y_ref[0] * scale_ref[...] + shift_ref[...]
    if activation:
        z = jnp.maximum(z, 0.0)
    o_ref[0] = z


# ----------------------------- wrapper ---------------------------------------

def bn_conv2d(x_nchw, weight_oihw, gamma, beta, *, stride, padding,
              activation=True, eps=1e-5, compute_dtype=jnp.bfloat16):
    """Forward of BN_Conv2d (train-mode BatchNorm, i.e. batch statistics).

    x_nchw:      (N, Cin, H, W)    float32
    weight_oihw: (Cout, Cin, k, k) float32 (conv bias=False)
    gamma, beta: (Cout,)           float32 (BatchNorm affine)
    compute_dtype: dtype of the MXU operands (bf16 default; accumulation is f32).
    """
    N, Cin, H, W = x_nchw.shape
    Cout, _, kh, kw = weight_oihw.shape
    s, p = stride, padding
    Ho = (H + 2 * p - kh) // s + 1
    Wo = (W + 2 * p - kw) // s + 1
    Hp, Wp = H + 2 * p, W + 2 * p
    Qw = Ho * Wp                      # wide output rows per image (incl. wrap cols)
    M = N * Ho * Wo                   # valid conv outputs per channel (BN divisor)

    # ---- layout glue (XLA): NCHW -> flattened padded NHWC rows, cast for MXU ----
    x_nhwc = jnp.transpose(x_nchw, (0, 2, 3, 1))
    x_pad = jnp.pad(x_nhwc, ((0, 0), (p, p), (p, p), (0, 0)))
    L = s * (Qw - 1) + (kh - 1) * Wp + (kw - 1) + 1     # last flat row any tap touches
    x_flat = x_pad.reshape(N, Hp * Wp, Cin)
    if L > Hp * Wp:
        x_flat = jnp.pad(x_flat, ((0, 0), (0, L - Hp * Wp), (0, 0)))
    x_flat = x_flat.astype(compute_dtype)

    # (O, I, kh, kw) -> (kh*kw, Cin, Cout) per-tap matrices, MXU dtype, no padding.
    w_taps = jnp.transpose(weight_oihw, (2, 3, 1, 0)).reshape(kh * kw, Cin, Cout)
    w_taps = w_taps.astype(compute_dtype)

    # ---- kernel 1: fused im2col conv + per-image channel stats (parallel grid) ----
    kern1 = functools.partial(_conv_stats_kernel, kh=kh, kw=kw, stride=s,
                              Wp=Wp, Wo=Wo)
    conv_out, csum, csq = pl.pallas_call(
        kern1,
        out_shape=(jax.ShapeDtypeStruct((N, Qw, Cout), jnp.float32),
                   jax.ShapeDtypeStruct((N, 1, Cout), jnp.float32),
                   jax.ShapeDtypeStruct((N, 1, Cout), jnp.float32)),
        grid_spec=pltpu.PrefetchScalarGridSpec(
            num_scalar_prefetch=0,
            grid=(N,),
            in_specs=[
                pl.BlockSpec((1, L, Cin), lambda n: (n, 0, 0)),
                pl.BlockSpec((kh * kw, Cin, Cout), lambda n: (0, 0, 0)),
            ],
            out_specs=(
                pl.BlockSpec((1, Qw, Cout), lambda n: (n, 0, 0)),
                pl.BlockSpec((1, 1, Cout), lambda n: (n, 0, 0)),
                pl.BlockSpec((1, 1, Cout), lambda n: (n, 0, 0)),
            )),
        compiler_params=pltpu.CompilerParams(
            dimension_semantics=("parallel",),
            vmem_limit_bytes=64 * 1024 * 1024),
    )(x_flat, w_taps)

    # ---- fold batch stats + affine into per-channel scale/shift (tiny, XLA) ----
    total = jnp.sum(csum[:, 0, :], axis=0)
    total_sq = jnp.sum(csq[:, 0, :], axis=0)
    mean = total / M
    var = jnp.maximum(total_sq / M - mean * mean, 0.0)   # clamp f32 cancellation
    scale_c = gamma * jax.lax.rsqrt(var + eps)
    shift_c = beta - mean * scale_c

    # ---- kernel 2: fused BN affine + ReLU, in place; lane-pack rows when Cout|128 ----
    if 128 % Cout == 0 and (Qw * Cout) % 128 == 0:
        r = 128 // Cout
        y2 = conv_out.reshape(N, (Qw * Cout) // 128, 128)   # free row-major reshape
        scale = jnp.tile(scale_c[None, :], (1, r))          # lane j -> channel j % Cout
        shift = jnp.tile(shift_c[None, :], (1, r))
    else:
        y2 = conv_out
        scale = scale_c[None, :]
        shift = shift_c[None, :]

    kern2 = functools.partial(_bn_act_kernel, activation=activation)
    bn_out = pl.pallas_call(
        kern2,
        out_shape=jax.ShapeDtypeStruct(y2.shape, jnp.float32),
        grid_spec=pltpu.PrefetchScalarGridSpec(
            num_scalar_prefetch=0,
            grid=(N,),
            in_specs=[
                pl.BlockSpec((1,) + y2.shape[1:], lambda n: (n, 0, 0)),
                pl.BlockSpec((1, y2.shape[-1]), lambda n: (0, 0)),
                pl.BlockSpec((1, y2.shape[-1]), lambda n: (0, 0)),
            ],
            out_specs=pl.BlockSpec((1,) + y2.shape[1:], lambda n: (n, 0, 0))),
        compiler_params=pltpu.CompilerParams(
            dimension_semantics=("parallel",)),
        input_output_aliases={0: 0},    # forward-only: conv pre-activations are donated
    )(y2, scale, shift)

    # ---- final layout (XLA): drop wide cols + NHWC->NCHW (fuses into one copy) ----
    out_wide = bn_out.reshape(N, Ho, Wp, Cout)
    return jnp.transpose(out_wide[:, :, :Wo, :], (0, 3, 1, 2))


# ----------------------------- reference (pure JAX) ---------------------------

def reference_forward(x, w, gamma, beta, *, stride, padding, activation=True, eps=1e-5):
    y = jax.lax.conv_general_dilated(
        x, w, window_strides=(stride, stride),
        padding=((padding, padding), (padding, padding)),
        dimension_numbers=("NCHW", "OIHW", "NCHW"))
    mean = y.mean(axis=(0, 2, 3), keepdims=True)
    var = y.var(axis=(0, 2, 3), keepdims=True)     # biased, matches train-mode BN
    y = (y - mean) / jnp.sqrt(var + eps)
    y = y * gamma[None, :, None, None] + beta[None, :, None, None]
    if activation:
        y = jnp.maximum(y, 0.0)
    return y


# ----------------------------- main -------------------------------------------

if __name__ == "__main__":
    # BN_Conv2d(in_channels=4, out_channels=8, kernel_size=3, stride=1, padding=1)
    N, Cin, H, W = 2, 4, 16, 16
    Cout, k, stride, padding = 8, 3, 1, 1

    key = jax.random.PRNGKey(0)
    kx, kw_, kg, kb = jax.random.split(key, 4)
    x = jax.random.normal(kx, (N, Cin, H, W), dtype=jnp.float32)
    weight = jax.random.normal(kw_, (Cout, Cin, k, k), dtype=jnp.float32) * 0.1
    gamma = 1.0 + 0.1 * jax.random.normal(kg, (Cout,), dtype=jnp.float32)
    beta = 0.1 * jax.random.normal(kb, (Cout,), dtype=jnp.float32)

    ref = reference_forward(x, weight, gamma, beta, stride=stride,
                            padding=padding, activation=True)

    # f32 MXU-operand path: tight agreement with the XLA reference.
    fwd_f32 = jax.jit(functools.partial(bn_conv2d, stride=stride, padding=padding,
                                        activation=True, compute_dtype=jnp.float32))
    out_f32 = jax.block_until_ready(fwd_f32(x, weight, gamma, beta))
    assert out_f32.shape == (N, Cout, H, W), out_f32.shape
    err32 = float(jnp.max(jnp.abs(out_f32 - ref)))
    assert jnp.allclose(out_f32, ref, atol=1e-3, rtol=1e-3), err32

    # Default bf16 MXU-operand path (f32 accumulation & stats): bf16-rounded
    # operands bound the post-BN error at ~1e-2, so validate at a looser tolerance.
    fwd_bf16 = jax.jit(functools.partial(bn_conv2d, stride=stride, padding=padding,
                                         activation=True))
    out_bf16 = jax.block_until_ready(fwd_bf16(x, weight, gamma, beta))
    assert out_bf16.shape == (N, Cout, H, W), out_bf16.shape
    err16 = float(jnp.max(jnp.abs(out_bf16 - ref)))
    assert jnp.allclose(out_bf16, ref, atol=2e-2, rtol=2e-2), err16

    print("KERNEL_OK")
</pallas_src>

<mosaic_0001>
module attributes {stable_mosaic.version = 11 : i64} {
  func.func @_conv_stats_kernel(%arg0: i32, %arg1: memref<1x326x4xf32, #tpu.memory_space<vmem>>, %arg2: memref<9x4x8xf32, #tpu.memory_space<vmem>>, %arg3: memref<1x288x8xf32, #tpu.memory_space<vmem>>, %arg4: memref<1x1x8xf32, #tpu.memory_space<vmem>>, %arg5: memref<1x1x8xf32, #tpu.memory_space<vmem>>) attributes {dimension_semantics = [#tpu.dimension_semantics<parallel>], iteration_bounds = array<i64: 2>, scalar_prefetch = 0 : i64, scratch_operands = 0 : i64, tpu.core_type = #tpu.core_type<tc>, window_params = [{transform_indices = @transform_0, window_bounds = array<i64: 1, 326, 4>}, {pipeline_mode = #tpu.pipeline_mode<synchronous>, transform_indices = @transform_1, window_bounds = array<i64: 9, 4, 8>}, {transform_indices = @transform_2, window_bounds = array<i64: 1, 288, 8>}, {transform_indices = @transform_3, window_bounds = array<i64: 1, 1, 8>}, {transform_indices = @transform_4, window_bounds = array<i64: 1, 1, 8>}]} {
    %cst = arith.constant 0.000000e+00 : f32
    %0 = vector.broadcast %cst : f32 to vector<288x8xf32>
    %c0 = arith.constant 0 : index
    %c0_0 = arith.constant 0 : index
    %c0_1 = arith.constant 0 : index
    %1 = vector.load %arg1[%c0, %c0_0, %c0_1] : memref<1x326x4xf32, #tpu.memory_space<vmem>>, vector<1x288x4xf32>
    %2 = vector.shape_cast %1 : vector<1x288x4xf32> to vector<288x4xf32>
    %c0_2 = arith.constant 0 : index
    %c0_3 = arith.constant 0 : index
    %c0_4 = arith.constant 0 : index
    %3 = vector.load %arg2[%c0_2, %c0_3, %c0_4] : memref<9x4x8xf32, #tpu.memory_space<vmem>>, vector<1x4x8xf32>
    %4 = vector.shape_cast %3 : vector<1x4x8xf32> to vector<4x8xf32>
    %cst_5 = arith.constant dense<0.000000e+00> : vector<288x8xf32>
    %5 = tpu.matmul %2, %4, %cst_5 {dimension_numbers = #tpu.dot_dimension_numbers<[1], [0], [0], [1], [0, 0, 1, 1], [], []>} : vector<288x4xf32>, vector<4x8xf32>, vector<288x8xf32> -> vector<288x8xf32>
    %6 = arith.addf %0, %5 : vector<288x8xf32>
    %c0_6 = arith.constant 0 : index
    %c1 = arith.constant 1 : index
    %c0_7 = arith.constant 0 : index
    %7 = vector.load %arg1[%c0_6, %c1, %c0_7] : memref<1x326x4xf32, #tpu.memory_space<vmem>>, vector<1x288x4xf32>
    %8 = vector.shape_cast %7 : vector<1x288x4xf32> to vector<288x4xf32>
    %c1_8 = arith.constant 1 : index
    %c0_9 = arith.constant 0 : index
    %c0_10 = arith.constant 0 : index
    %9 = vector.load %arg2[%c1_8, %c0_9, %c0_10] : memref<9x4x8xf32, #tpu.memory_space<vmem>>, vector<1x4x8xf32>
    %10 = vector.shape_cast %9 : vector<1x4x8xf32> to vector<4x8xf32>
    %cst_11 = arith.constant dense<0.000000e+00> : vector<288x8xf32>
    %11 = tpu.matmul %8, %10, %cst_11 {dimension_numbers = #tpu.dot_dimension_numbers<[1], [0], [0], [1], [0, 0, 1, 1], [], []>} : vector<288x4xf32>, vector<4x8xf32>, vector<288x8xf32> -> vector<288x8xf32>
    %12 = arith.addf %6, %11 : vector<288x8xf32>
    %c0_12 = arith.constant 0 : index
    %c2 = arith.constant 2 : index
    %c0_13 = arith.constant 0 : index
    %13 = vector.load %arg1[%c0_12, %c2, %c0_13] : memref<1x326x4xf32, #tpu.memory_space<vmem>>, vector<1x288x4xf32>
    %14 = vector.shape_cast %13 : vector<1x288x4xf32> to vector<288x4xf32>
    %c2_14 = arith.constant 2 : index
    %c0_15 = arith.constant 0 : index
    %c0_16 = arith.constant 0 : index
    %15 = vector.load %arg2[%c2_14, %c0_15, %c0_16] : memref<9x4x8xf32, #tpu.memory_space<vmem>>, vector<1x4x8xf32>
    %16 = vector.shape_cast %15 : vector<1x4x8xf32> to vector<4x8xf32>
    %cst_17 = arith.constant dense<0.000000e+00> : vector<288x8xf32>
    %17 = tpu.matmul %14, %16, %cst_17 {dimension_numbers = #tpu.dot_dimension_numbers<[1], [0], [0], [1], [0, 0, 1, 1], [], []>} : vector<288x4xf32>, vector<4x8xf32>, vector<288x8xf32> -> vector<288x8xf32>
    %18 = arith.addf %12, %17 : vector<288x8xf32>
    %c0_18 = arith.constant 0 : index
    %c18 = arith.constant 18 : index
    %c0_19 = arith.constant 0 : index
    %19 = vector.load %arg1[%c0_18, %c18, %c0_19] : memref<1x326x4xf32, #tpu.memory_space<vmem>>, vector<1x288x4xf32>
    %20 = vector.shape_cast %19 : vector<1x288x4xf32> to vector<288x4xf32>
    %c3 = arith.constant 3 : index
    %c0_20 = arith.constant 0 : index
    %c0_21 = arith.constant 0 : index
    %21 = vector.load %arg2[%c3, %c0_20, %c0_21] : memref<9x4x8xf32, #tpu.memory_space<vmem>>, vector<1x4x8xf32>
    %22 = vector.shape_cast %21 : vector<1x4x8xf32> to vector<4x8xf32>
    %cst_22 = arith.constant dense<0.000000e+00> : vector<288x8xf32>
    %23 = tpu.matmul %20, %22, %cst_22 {dimension_numbers = #tpu.dot_dimension_numbers<[1], [0], [0], [1], [0, 0, 1, 1], [], []>} : vector<288x4xf32>, vector<4x8xf32>, vector<288x8xf32> -> vector<288x8xf32>
    %24 = arith.addf %18, %23 : vector<288x8xf32>
    %c0_23 = arith.constant 0 : index
    %c19 = arith.constant 19 : index
    %c0_24 = arith.constant 0 : index
    %25 = vector.load %arg1[%c0_23, %c19, %c0_24] : memref<1x326x4xf32, #tpu.memory_space<vmem>>, vector<1x288x4xf32>
    %26 = vector.shape_cast %25 : vector<1x288x4xf32> to vector<288x4xf32>
    %c4 = arith.constant 4 : index
    %c0_25 = arith.constant 0 : index
    %c0_26 = arith.constant 0 : index
    %27 = vector.load %arg2[%c4, %c0_25, %c0_26] : memref<9x4x8xf32, #tpu.memory_space<vmem>>, vector<1x4x8xf32>
    %28 = vector.shape_cast %27 : vector<1x4x8xf32> to vector<4x8xf32>
    %cst_27 = arith.constant dense<0.000000e+00> : vector<288x8xf32>
    %29 = tpu.matmul %26, %28, %cst_27 {dimension_numbers = #tpu.dot_dimension_numbers<[1], [0], [0], [1], [0, 0, 1, 1], [], []>} : vector<288x4xf32>, vector<4x8xf32>, vector<288x8xf32> -> vector<288x8xf32>
    %30 = arith.addf %24, %29 : vector<288x8xf32>
    %c0_28 = arith.constant 0 : index
    %c20 = arith.constant 20 : index
    %c0_29 = arith.constant 0 : index
    %31 = vector.load %arg1[%c0_28, %c20, %c0_29] : memref<1x326x4xf32, #tpu.memory_space<vmem>>, vector<1x288x4xf32>
    %32 = vector.shape_cast %31 : vector<1x288x4xf32> to vector<288x4xf32>
    %c5 = arith.constant 5 : index
    %c0_30 = arith.constant 0 : index
    %c0_31 = arith.constant 0 : index
    %33 = vector.load %arg2[%c5, %c0_30, %c0_31] : memref<9x4x8xf32, #tpu.memory_space<vmem>>, vector<1x4x8xf32>
    %34 = vector.shape_cast %33 : vector<1x4x8xf32> to vector<4x8xf32>
    %cst_32 = arith.constant dense<0.000000e+00> : vector<288x8xf32>
    %35 = tpu.matmul %32, %34, %cst_32 {dimension_numbers = #tpu.dot_dimension_numbers<[1], [0], [0], [1], [0, 0, 1, 1], [], []>} : vector<288x4xf32>, vector<4x8xf32>, vector<288x8xf32> -> vector<288x8xf32>
    %36 = arith.addf %30, %35 : vector<288x8xf32>
    %c0_33 = arith.constant 0 : index
    %c36 = arith.constant 36 : index
    %c0_34 = arith.constant 0 : index
    %37 = vector.load %arg1[%c0_33, %c36, %c0_34] : memref<1x326x4xf32, #tpu.memory_space<vmem>>, vector<1x288x4xf32>
    %38 = vector.shape_cast %37 : vector<1x288x4xf32> to vector<288x4xf32>
    %c6 = arith.constant 6 : index
    %c0_35 = arith.constant 0 : index
    %c0_36 = arith.constant 0 : index
    %39 = vector.load %arg2[%c6, %c0_35, %c0_36] : memref<9x4x8xf32, #tpu.memory_space<vmem>>, vector<1x4x8xf32>
    %40 = vector.shape_cast %39 : vector<1x4x8xf32> to vector<4x8xf32>
    %cst_37 = arith.constant dense<0.000000e+00> : vector<288x8xf32>
    %41 = tpu.matmul %38, %40, %cst_37 {dimension_numbers = #tpu.dot_dimension_numbers<[1], [0], [0], [1], [0, 0, 1, 1], [], []>} : vector<288x4xf32>, vector<4x8xf32>, vector<288x8xf32> -> vector<288x8xf32>
    %42 = arith.addf %36, %41 : vector<288x8xf32>
    %c0_38 = arith.constant 0 : index
    %c37 = arith.constant 37 : index
    %c0_39 = arith.constant 0 : index
    %43 = vector.load %arg1[%c0_38, %c37, %c0_39] : memref<1x326x4xf32, #tpu.memory_space<vmem>>, vector<1x288x4xf32>
    %44 = vector.shape_cast %43 : vector<1x288x4xf32> to vector<288x4xf32>
    %c7 = arith.constant 7 : index
    %c0_40 = arith.constant 0 : index
    %c0_41 = arith.constant 0 : index
    %45 = vector.load %arg2[%c7, %c0_40, %c0_41] : memref<9x4x8xf32, #tpu.memory_space<vmem>>, vector<1x4x8xf32>
    %46 = vector.shape_cast %45 : vector<1x4x8xf32> to vector<4x8xf32>
    %cst_42 = arith.constant dense<0.000000e+00> : vector<288x8xf32>
    %47 = tpu.matmul %44, %46, %cst_42 {dimension_numbers = #tpu.dot_dimension_numbers<[1], [0], [0], [1], [0, 0, 1, 1], [], []>} : vector<288x4xf32>, vector<4x8xf32>, vector<288x8xf32> -> vector<288x8xf32>
    %48 = arith.addf %42, %47 : vector<288x8xf32>
    %c0_43 = arith.constant 0 : index
    %c38 = arith.constant 38 : index
    %c0_44 = arith.constant 0 : index
    %49 = vector.load %arg1[%c0_43, %c38, %c0_44] : memref<1x326x4xf32, #tpu.memory_space<vmem>>, vector<1x288x4xf32>
    %50 = vector.shape_cast %49 : vector<1x288x4xf32> to vector<288x4xf32>
    %c8 = arith.constant 8 : index
    %c0_45 = arith.constant 0 : index
    %c0_46 = arith.constant 0 : index
    %51 = vector.load %arg2[%c8, %c0_45, %c0_46] : memref<9x4x8xf32, #tpu.memory_space<vmem>>, vector<1x4x8xf32>
    %52 = vector.shape_cast %51 : vector<1x4x8xf32> to vector<4x8xf32>
    %cst_47 = arith.constant dense<0.000000e+00> : vector<288x8xf32>
    %53 = tpu.matmul %50, %52, %cst_47 {dimension_numbers = #tpu.dot_dimension_numbers<[1], [0], [0], [1], [0, 0, 1, 1], [], []>} : vector<288x4xf32>, vector<4x8xf32>, vector<288x8xf32> -> vector<288x8xf32>
    %54 = arith.addf %48, %53 : vector<288x8xf32>
    %c0_48 = arith.constant 0 : index
    %c0_49 = arith.constant 0 : index
    %c0_50 = arith.constant 0 : index
    %55 = vector.load %arg3[%c0_48, %c0_49, %c0_50] : memref<1x288x8xf32, #tpu.memory_space<vmem>>, vector<1x288x8xf32>
    %56 = vector.shape_cast %55 : vector<1x288x8xf32> to vector<288x8xf32>
    %57 = vector.shape_cast %54 : vector<288x8xf32> to vector<1x288x8xf32>
    tpu.vector_store %arg3[%c0_48, %c0_49, %c0_50], %57 {strides = array<i32>} : memref<1x288x8xf32, #tpu.memory_space<vmem>>, vector<1x288x8xf32>,
    %58 = tpu.iota {dimensions = array<i32: 0>} : vector<288x1xi32>
    %c18_i32 = arith.constant 18 : i32
    %c0_i32 = arith.constant 0 : i32
    %59 = arith.cmpi eq, %c18_i32, %c0_i32 : i32
    %c1_i32 = arith.constant 1 : i32
    %60 = arith.select %59, %c1_i32, %c18_i32 : i32
    %61 = vector.broadcast %60 : i32 to vector<288x1xi32>
    %62 = arith.remsi %58, %61 : vector<288x1xi32>
    %c0_i32_51 = arith.constant 0 : i32
    %63 = vector.broadcast %c0_i32_51 : i32 to vector<288x1xi32>
    %64 = arith.cmpi ne, %62, %63 : vector<288x1xi32>
    %c0_i32_52 = arith.constant 0 : i32
    %65 = vector.broadcast %c0_i32_52 : i32 to vector<288x1xi32>
    %66 = arith.cmpi slt, %62, %65 : vector<288x1xi32>
    %c0_i32_53 = arith.constant 0 : i32
    %67 = arith.cmpi slt, %60, %c0_i32_53 : i32
    %68 = vector.broadcast %67 : i1 to vector<288x1xi1>
    %69 = vector.broadcast %68 : vector<288x1xi1> to vector<288x1xi1>
    %70 = arith.xori %66, %69 : vector<288x1xi1>
    %71 = arith.andi %70, %64 : vector<288x1xi1>
    %72 = vector.broadcast %60 : i32 to vector<288x1xi32>
    %73 = arith.addi %62, %72 : vector<288x1xi32>
    %74 = arith.select %71, %73, %62 : vector<288x1xi1>, vector<288x1xi32>
    %c16_i32 = arith.constant 16 : i32
    %75 = vector.broadcast %c16_i32 : i32 to vector<288x1xi32>
    %76 = arith.cmpi slt, %74, %75 : vector<288x1xi32>
    %cst_54 = arith.constant 0.000000e+00 : f32
    %77 = vector.shape_cast %76 : vector<288x1xi1> to vector<288x1xi1>
    %78 = vector.broadcast %77 : vector<288x1xi1> to vector<288x8xi1>
    %79 = vector.broadcast %cst_54 : f32 to vector<288x8xf32>
    %80 = arith.select %78, %54, %79 : vector<288x8xi1>, vector<288x8xf32>
    %cst_55 = arith.constant dense<0.000000e+00> : vector<8xf32>
    %81 = vector.multi_reduction <add>, %80, %cst_55 [0] : vector<288x8xf32> to vector<8xf32>
    %82 = vector.shape_cast %81 : vector<8xf32> to vector<1x8xf32>
    %c0_56 = arith.constant 0 : index
    %c0_57 = arith.constant 0 : index
    %c0_58 = arith.constant 0 : index
    %83 = vector.load %arg4[%c0_56, %c0_57, %c0_58] : memref<1x1x8xf32, #tpu.memory_space<vmem>>, vector<1x1x8xf32>
    %84 = vector.shape_cast %83 : vector<1x1x8xf32> to vector<1x8xf32>
    %85 = vector.shape_cast %82 : vector<1x8xf32> to vector<1x1x8xf32>
    tpu.vector_store %arg4[%c0_56, %c0_57, %c0_58], %85 {strides = array<i32>} : memref<1x1x8xf32, #tpu.memory_space<vmem>>, vector<1x1x8xf32>,
    %86 = arith.mulf %80, %80 : vector<288x8xf32>
    %cst_59 = arith.constant dense<0.000000e+00> : vector<8xf32>
    %87 = vector.multi_reduction <add>, %86, %cst_59 [0] : vector<288x8xf32> to vector<8xf32>
    %88 = vector.shape_cast %87 : vector<8xf32> to vector<1x8xf32>
    %c0_60 = arith.constant 0 : index
    %c0_61 = arith.constant 0 : index
    %c0_62 = arith.constant 0 : index
    %89 = vector.load %arg5[%c0_60, %c0_61, %c0_62] : memref<1x1x8xf32, #tpu.memory_space<vmem>>, vector<1x1x8xf32>
    %90 = vector.shape_cast %89 : vector<1x1x8xf32> to vector<1x8xf32>
    %91 = vector.shape_cast %88 : vector<1x8xf32> to vector<1x1x8xf32>
    tpu.vector_store %arg5[%c0_60, %c0_61, %c0_62], %91 {strides = array<i32>} : memref<1x1x8xf32, #tpu.memory_space<vmem>>, vector<1x1x8xf32>,
    return
  }
  func.func @transform_0(%arg0: i32) -> (i32, i32, i32) {
    %c0_i32 = arith.constant 0 : i32
    %c0_i32_0 = arith.constant 0 : i32
    %c0_i32_1 = arith.constant 0 : i32
    return %arg0, %c0_i32, %c0_i32_0 : i32, i32, i32
  }
  func.func @transform_1(%arg0: i32) -> (i32, i32, i32) {
    %c0_i32 = arith.constant 0 : i32
    %c0_i32_0 = arith.constant 0 : i32
    %c0_i32_1 = arith.constant 0 : i32
    %c0_i32_2 = arith.constant 0 : i32
    return %c0_i32, %c0_i32_0, %c0_i32_1 : i32, i32, i32
  }
  func.func @transform_2(%arg0: i32) -> (i32, i32, i32) {
    %c0_i32 = arith.constant 0 : i32
    %c0_i32_0 = arith.constant 0 : i32
    %c0_i32_1 = arith.constant 0 : i32
    return %arg0, %c0_i32, %c0_i32_0 : i32, i32, i32
  }
  func.func @transform_3(%arg0: i32) -> (i32, i32, i32) {
    %c0_i32 = arith.constant 0 : i32
    %c0_i32_0 = arith.constant 0 : i32
    %c0_i32_1 = arith.constant 0 : i32
    return %arg0, %c0_i32, %c0_i32_0 : i32, i32, i32
  }
  func.func @transform_4(%arg0: i32) -> (i32, i32, i32) {
    %c0_i32 = arith.constant 0 : i32
    %c0_i32_0 = arith.constant 0 : i32
    %c0_i32_1 = arith.constant 0 : i32
    return %arg0, %c0_i32, %c0_i32_0 : i32, i32, i32
  }
}

module attributes {stable_mosaic.version = 11 : i64} {
  func.func @_bn_act_kernel(%arg0: i32, %arg1: memref<1x18x128xf32, #tpu.memory_space<vmem>>, %arg2: memref<1x128xf32, #tpu.memory_space<vmem>>, %arg3: memref<1x128xf32, #tpu.memory_space<vmem>>, %arg4: memref<1x18x128xf32, #tpu.memory_space<vmem>>) attributes {dimension_semantics = [#tpu.dimension_semantics<parallel>], iteration_bounds = array<i64: 2>, scalar_prefetch = 0 : i64, scratch_operands = 0 : i64, tpu.core_type = #tpu.core_type<tc>, window_params = [{transform_indices = @transform_0, window_bounds = array<i64: 1, 18, 128>}, {pipeline_mode = #tpu.pipeline_mode<synchronous>, transform_indices = @transform_1, window_bounds = array<i64: 1, 128>}, {pipeline_mode = #tpu.pipeline_mode<synchronous>, transform_indices = @transform_2, window_bounds = array<i64: 1, 128>}, {transform_indices = @transform_3, window_bounds = array<i64: 1, 18, 128>}]} {
    %c0 = arith.constant 0 : index
    %c0_0 = arith.constant 0 : index
    %c0_1 = arith.constant 0 : index
    %0 = vector.load %arg1[%c0, %c0_0, %c0_1] : memref<1x18x128xf32, #tpu.memory_space<vmem>>, vector<1x18x128xf32>
    %1 = vector.shape_cast %0 : vector<1x18x128xf32> to vector<18x128xf32>
    %c0_2 = arith.constant 0 : index
    %c0_3 = arith.constant 0 : index
    %2 = vector.load %arg2[%c0_2, %c0_3] : memref<1x128xf32, #tpu.memory_space<vmem>>, vector<1x128xf32>
    %3 = vector.broadcast %2 : vector<1x128xf32> to vector<18x128xf32>
    %4 = arith.mulf %1, %3 : vector<18x128xf32>
    %c0_4 = arith.constant 0 : index
    %c0_5 = arith.constant 0 : index
    %5 = vector.load %arg3[%c0_4, %c0_5] : memref<1x128xf32, #tpu.memory_space<vmem>>, vector<1x128xf32>
    %6 = vector.broadcast %5 : vector<1x128xf32> to vector<18x128xf32>
    %7 = arith.addf %4, %6 : vector<18x128xf32>
    %cst = arith.constant 0.000000e+00 : f32
    %8 = vector.broadcast %cst : f32 to vector<18x128xf32>
    %9 = arith.maximumf %7, %8 : vector<18x128xf32>
    %c0_6 = arith.constant 0 : index
    %c0_7 = arith.constant 0 : index
    %c0_8 = arith.constant 0 : index
    %10 = vector.load %arg4[%c0_6, %c0_7, %c0_8] : memref<1x18x128xf32, #tpu.memory_space<vmem>>, vector<1x18x128xf32>
    %11 = vector.shape_cast %10 : vector<1x18x128xf32> to vector<18x128xf32>
    %12 = vector.shape_cast %9 : vector<18x128xf32> to vector<1x18x128xf32>
    tpu.vector_store %arg4[%c0_6, %c0_7, %c0_8], %12 {strides = array<i32>} : memref<1x18x128xf32, #tpu.memory_space<vmem>>, vector<1x18x128xf32>,
    return
  }
  func.func @transform_0(%arg0: i32) -> (i32, i32, i32) {
    %c0_i32 = arith.constant 0 : i32
    %c0_i32_0 = arith.constant 0 : i32
    %c0_i32_1 = arith.constant 0 : i32
    return %arg0, %c0_i32, %c0_i32_0 : i32, i32, i32
  }
  func.func @transform_1(%arg0: i32) -> (i32, i32) {
    %c0_i32 = arith.constant 0 : i32
    %c0_i32_0 = arith.constant 0 : i32
    %c0_i32_1 = arith.constant 0 : i32
    return %c0_i32, %c0_i32_0 : i32, i32
  }
  func.func @transform_2(%arg0: i32) -> (i32, i32) {
    %c0_i32 = arith.constant 0 : i32
    %c0_i32_0 = arith.constant 0 : i32
    %c0_i32_1 = arith.constant 0 : i32
    return %c0_i32, %c0_i32_0 : i32, i32
  }
  func.func @transform_3(%arg0: i32) -> (i32, i32, i32) {
    %c0_i32 = arith.constant 0 : i32
    %c0_i32_0 = arith.constant 0 : i32
    %c0_i32_1 = arith.constant 0 : i32
    return %arg0, %c0_i32, %c0_i32_0 : i32, i32, i32
  }
}

</mosaic_0001>

<bundles_post_ra>
// kernel: bn_conv2d.3
= control target key start
LH: loop header
LB: loop body
LE: loop exit
PB: predicated region body
PF: predicated region fallthrough
CT: control target
= control target key end

     0   :  { %s303_s12 = smov 0   ;;  %s326_s0 = inlined_call_operand.vmem [shape: f32[2,18,128], index: 0, kind: input, shape index: {}, may-alias: {0,3}]   ;;  %s327_s1 = inlined_call_operand.vmem [shape: f32[1,128], index: 1, kind: input, shape index: {}]   ;;  %s328_s2 = inlined_call_operand.vmem [shape: f32[1,128], index: 2, kind: input, shape index: {}]   ;;  %s329_s3 = inlined_call_operand.vmem [shape: f32[2,18,128], index: 3, kind: output, shape index: {}, may-alias: {0,3}]  }
   0x1 LB: > { %s255_s13 = sadd.s32 4294967295, %s281_s12   ;;  %p259_p0 = scmp.ge.s32.totalorder %s281_s12, 1  ;;  %s281_s12 = sphi %s303_s12, %s13_s12  }
   0x2   : > { %p137_p1 = scmp.lt.s32.totalorder %s281_s12, 3 }
   0x4   : > { %p138_p2 = pnand %p259_p0, %p137_p1 }
   0x5   : > { %p161_p3 = scmp.lt.s32.totalorder (!%p138_p2), %s255_s13, 1  ;;  %v262_v0 = vld [vmem:[%s327_s1] ss:$0 sm:$0xff] (!%p138_p2) }
   0x6   : > { %141 = sbr.rel (%p138_p2) target bundleno = 26 (0x1a), region = 32  ;;  %v263_v1 = vld [vmem:[%s328_s2] ss:$0 sm:$0xff] (!%p138_p2) }
   0xd   : > { %s331_s13 = smov (!%p161_p3, %s255_s13), 1 }
   0xe   : > { %s266_s14 = smul.u32 24, %s331_s13 }
  0x10   : > { %s165_s19 = scalar_lea.vmem %s326_s0, %s266_s14  ;;  %s170_s24 = scalar_lea.vmem %s329_s3, %s266_s14 }
  0x11   : > { %v171_v2 = vld [vmem:[%s165_s19] sm:$0xff]  ;;  %v172_v3 = vld [vmem:[%s165_s19 + $0x8] sm:$0xff]  ;;  %v173_v4 = vld [vmem:[%s165_s19 + $0x10] sm:$0x3] }
  0x12   : > { %v181_v5 = vmul.f32 %v262_v0, %v171_v2  ;;  %v182_v6 = vmul.f32 %v262_v0, %v172_v3  ;;  %v183_v7 = vmul.f32 %v262_v0, %v173_v4 }
  0x14   : > { %v191_v8 = vadd.f32 %v263_v1, %v181_v5  ;;  %v192_v9 = vadd.f32 %v263_v1, %v182_v6  ;;  %v193_v10 = vadd.f32 %v263_v1, %v183_v7 }
  0x16   : > { %v194_v11 = vmax.f32 %v191_v8, 0.0  ;;  %v195_v12 = vmax.f32 %v192_v9, 0.0  ;;  %v196_v13 = vmax.f32 %v193_v10, 0.0 }
  0x18   : > { %197 = vst [vmem:[%s170_s24] sm:$0xff] %v194_v11  ;;  %198 = vst [vmem:[%s170_s24 + $0x8] sm:$0xff] %v195_v12 }
  0x19   : > { %199 = vst [vmem:[%s170_s24 + $0x10] sm:$0x3] %v196_v13 }
  0x1a PF: > { %s13_s12 = sadd.s32 1, %s281_s12  }
  0x1b   : > { %p10_p4 = scmp.ge.s32.totalorder %s13_s12, 4  }
  0x1d   :  { %12 = sbr.rel (!%p10_p4) target bundleno = 1 (0x1), region = 62 }

// kernel: bn_conv2d.2
= control target key start
LH: loop header
LB: loop body
LE: loop exit
PB: predicated region body
PF: predicated region fallthrough
CT: control target
= control target key end

     0   :  { %10 = vsyncpa [#allocation3], 0  ;;  %s9793_s0 = inlined_call_operand.hbm [shape: f32[2,326,4], index: 0, kind: input, shape index: {}]   ;;  %s9794_s1 = inlined_call_operand.hbm [shape: f32[9,4,8], index: 1, kind: input, shape index: {}]   ;;  %s9795_s2 = inlined_call_operand.hbm [shape: f32[2,288,8], index: 2, kind: output, shape index: {0}]   ;;  %s9796_s3 = inlined_call_operand.hbm [shape: f32[2,1,8], index: 3, kind: output, shape index: {1}]   ;;  %s9797_s4 = inlined_call_operand.hbm [shape: f32[2,1,8], index: 4, kind: output, shape index: {2}]  }
   0x1   :  { %12 = vsyncpa [#allocation3 + $0x1], 0 }
   0x2   :  { %13 = vsyncpa [#allocation6], 0 }
   0x3   :  { %14 = vsyncpa [#allocation4], 0 }
   0x4   :  { %16 = vsyncpa [#allocation4 + $0x1], 0 }
   0x5   :  { %17 = vsyncpa [#allocation9], 0 }
   0x6   :  { %19 = vsyncpa [#allocation9 + $0x1], 0  ;;  %s7065_s15 = smov 0   ;;  %s7067_s16 = smov 0  }
   0x7   :  { %s7069_s17 = smov 0   ;;  %s7071_s18 = smov 0  }
   0x8 LB: > { %s7086_s19 = sadd.s32 4294967295, %s7027_s18   ;;  %s5217_s20 = sadd.s32 4294967294, %s7027_s18   ;;  %s7027_s18 = sphi %s7071_s18, %s10350_s18   ;;  %s7023_s17 = sphi %s7069_s17, %s10349_s17   ;;  %s7019_s16 = sphi %s7067_s16, %s10348_s16   ;;  %s7015_s15 = sphi %s7065_s15, %s10347_s15  }
   0x9   : > { %p45_p0 = scmp.ne.s32.totalorder %s7019_s16, %s7015_s15  ;;  %p9798_p1 = scmp.eq.s32.totalorder %s7086_s19, 0 }
   0xa   : > { %p96_p3 = scmp.eq.s32.totalorder %s5217_s20, 1  ;;  %p5218_p5 = scmp.ge.s32.totalorder %s7027_s18, 1 }
   0xb   : > { %p7097_p4 = por %p9798_p1, %p45_p0  ;;  %p155_p7 = scmp.lt.s32.totalorder %s7027_s18, 3 }
   0xc   : > { %p7102_p6 = por %p96_p3, %p45_p0  ;;  %s7029_s24 = smov [#allocation5]  }
   0xd   : > { %s9875_s21 = scalar_select %p7097_p4, 1, 0 }
   0xe   : > { %s9876_s22 = scalar_select %p7102_p6, 1, 0 }
   0xf   : > { %p7107_p8 = pnand %p5218_p5, %p155_p7  ;;  %s167_s25 = sshll.u32 %s7029_s24, 4  ;;  %s7111_s25 = int_to_ptr.vmem [resolvable:$true] %s167_s25 }
  0x10   : > { %s7123_s27 = sadd.s32 1, %s7027_s18   ;;  %s32_s28 = sadd.s32 1, %s7023_s17 }
  0x11   : > { %s9877_s23 = scalar_select %p7107_p8, 1, 0 }
  0x12   : > { %p6778_p9 = pneg %p7107_p8  ;;  %s29_s29 = ssub.s32 %s7027_s18, %s7123_s27 }
  0x13   : > { %s6839_s6 = scalar_lea.hbm %s9794_s1, 576 }
  0x14   : > { %p7118_p11 = pnand %p6778_p9, %p9798_p1  ;;  %p6840_p12 = scmp.ne.s32.totalorder %s9794_s1, %s6839_s6 }
  0x15   : > { %p6846_p5 = scmp.lt.u32.totalorder %s6839_s6, %s9794_s1 }
  0x16   : > { %p6841_p13 = pneg %p7118_p11 }
  0x18   : > { %p6842_p0 = pnand %p6841_p13, %p6840_p12 }
  0x1a   : > { %p6843_p3 = pneg %p6842_p0 }
  0x1c   : > { %p6848_p7 = pnand %p6846_p5, %p6843_p3 }
  0x1e   : > { %6851 = shalt.err (!%p6848_p7)
}
  0x1f   : > { %s6852_s11 = scalar_lea.vmem %s7111_s25, 576  ;;  %p6860_p2 = scmp.lt.s32.totalorder %s7111_s25, %s7111_s25 }
  0x20   : > { %p6853_p9 = scmp.ne.s32.totalorder %s7111_s25, %s6852_s11  ;;  %p6861_p6 = scmp.lt.s32.totalorder %s6852_s11, %s6852_s11 }
  0x22   : > { %p6855_p10 = pnand %p6853_p9, %p6841_p13  ;;  %p6862_p4 = por %p6861_p6, %p6860_p2 }
  0x24   : > { %p6856_p1 = pneg %p6855_p10 }
  0x26   : > { %p6863_p8 = pnand %p6862_p4, %p6856_p1 }
  0x28   : > { %6866 = shalt.err (!%p6863_p8)
}
  0x29   : > { %s7030_s12 = smov 64   ;;  %s7031_s13 = smov 4  }
  0x2a   : > { %6781 = dma.hbm_to_vmem [thread:$0]  (!%p7118_p11), %s9794_s1, 576, %s7111_s25, [#allocation6], %s7030_s12, %s7030_s12, %s7031_s13  }
  0x2b   : > { %p30_p2 = scmp.eq.s32.totalorder %s29_s29, 0  ;;  %p39_p1 = scmp.ne.s32.totalorder %s7023_s17, %s7019_s16 }
  0x2c   : > { %p40_p4 = scmp.eq.s32.totalorder %s7027_s18, 0  ;;  %p6797_p6 = scmp.lt.s32.totalorder %s7027_s18, 2 }
  0x2d   : > { %s7154_s30 = scalar_select %p30_p2, %s7023_s17, %s32_s28  }
  0x2e   : > { %p41_p8 = por %p40_p4, %p39_p1  ;;  %p9879_p10 = scmp.eq.s32.totalorder %s7086_s19, 1 }
  0x2f   : > { %s181_s6 = sand.u32 1, %s7023_s17   ;;  %s6690_s7 = smul.u32 5248, %s7027_s18 }
  0x30   : > { %p7158_p12 = por %p9879_p10, %p39_p1  ;;  %s6689_s8 = smul.u32 328, %s181_s6 }
  0x31   : > { %s7167_s10 = scalar_lea.hbm %s9793_s0, %s6690_s7  ;;  %p7169_p11 = pnand %p6797_p6, %p41_p8 }
  0x32   : > { %s185_s28 = scalar_lea.vmem [#allocation2], %s6689_s8  ;;  %s7175_s11 = scalar_lea.sflag [#allocation3], %s181_s6 }
  0x33   : > { %s192_s29 = sshll.u32 %s185_s28, 4  ;;  %s6867_s12 = scalar_lea.hbm %s7167_s10, 5248  ;;  %s7173_s29 = int_to_ptr.vmem [resolvable:$true] %s192_s29 }
  0x34   : > { %p6868_p13 = scmp.ne.s32.totalorder %s7167_s10, %s6867_s12  ;;  %p6869_p0 = pneg %p7169_p11 }
  0x35   : > { %s6872_s24 = scalar_lea.hbm %s9793_s0, 10496  ;;  %p6873_p7 = scmp.lt.u32.totalorder %s7167_s10, %s9793_s0 }
  0x36   : > { %p6870_p3 = pnand %p6869_p0, %p6868_p13  ;;  %p6874_p9 = scmp.lt.u32.totalorder %s6872_s24, %s6867_s12 }
  0x37   : > { %p6876_p1 = scmp.lt.u32.totalorder %s6867_s12, %s7167_s10 }
  0x38   : > { %p6871_p5 = pneg %p6870_p3  ;;  %p6875_p2 = por %p6874_p9, %p6873_p7 }
  0x3a   : > { %p6877_p4 = por %p6876_p1, %p6875_p2 }
  0x3c   : > { %p6878_p6 = pnand %p6877_p4, %p6871_p5 }
  0x3e   : > { %6881 = shalt.err (!%p6878_p6)
}
  0x3f   : > { %s6882_s6 = scalar_lea.vmem %s7173_s29, 5248  ;;  %s7032_s8 = smov [#allocation2]  }
  0x40   : > { %p6883_p8 = scmp.ne.s32.totalorder %s7173_s29, %s6882_s6  ;;  %s6887_s9 = sshll.u32 %s7032_s8, 4  ;;  %s6888_s9 = int_to_ptr.vmem [resolvable:$false] %s6887_s9 }
  0x41   : > { %s6889_s28 = scalar_lea.vmem %s6888_s9, 10496  ;;  %p6890_p3 = scmp.lt.s32.totalorder %s7173_s29, %s6888_s9 }
  0x42   : > { %p6885_p10 = pnand %p6883_p8, %p6869_p0  ;;  %p6891_p7 = scmp.lt.s32.totalorder %s6889_s28, %s6882_s6 }
  0x44   : > { %p6886_p13 = pneg %p6885_p10  ;;  %p6892_p9 = por %p6891_p7, %p6890_p3 }
  0x46   : > { %p6893_p2 = pnand %p6892_p9, %p6886_p13 }
  0x48   : > { %6896 = shalt.err (!%p6893_p2)
}
  0x49   : > { %s7033_s12 = smov 128   ;;  %s7034_s13 = smov 8  }
  0x4a   : > { %6785 = dma.hbm_to_vmem [thread:$0]  (!%p7169_p11), %s7167_s10, 5248, %s7173_s29, %s7175_s11, %s7033_s12, %s7033_s12, %s7034_s13  }
  0x4b   : > { %p9882_p0 = scmp.ne.s32.totalorder %s9877_s23, 0 }
  0x4d   : > { %204 = sbr.rel (%p9882_p0) target bundleno = 725 (0x2d5), region = 28 }
  0x54   : > { %s7206_s14 = sand.u32 1, %s7019_s16   ;;  %p9883_p5 = scmp.ne.s32.totalorder %s9875_s21, 0 }
  0x55   : > { %s6691_s24 = smul.u32 328, %s7206_s14  ;;  %s207_s7 = scalar_lea.sflag [#allocation3], %s7206_s14 }
  0x57   : > { %s7210_s26 = scalar_lea.vmem [#allocation2], %s6691_s24 }
  0x58   : > { %6998 = dma.done.wait (%p9883_p5), %s207_s7, 5248  }
  0x59   : > { %7000 = vsyncadd (%p9883_p5), %s207_s7, 4294962048  ;;  %p9884_p11 = scmp.eq.s32.totalorder %s7086_s19, 0 }
  0x5b   : > { %7002 = dma.done.wait (%p9884_p11), [#allocation6], 576   ;;  %p9885_p1 = pmov %p9884_p11 }
  0x5c   : > { %vm431_vm0 = vcmask 1043456   ;;  %vm322_vm1 = vcmask 31744   ;;  %v321_v0 = vld [vmem:[#allocation5 + $0x4] sm:$0xf]  ;;  %v7220_v1 = vld [vmem:[#allocation5 + $0x10] sm:$0xf] }
  0x5d   : > { %7004 = vsyncadd (%p9885_p1), [#allocation6], 4294966720  ;;  %v284_v2 = vld [vmem:[%s7210_s26 + $0x1] sm:$0xff]  ;;  %5895 = vmatprep.subr.msk.mxu1 %vm431_vm0, %v321_v0  ;;  %6119 = vmatprep.subr.msk.mxu0 %vm431_vm0, %v7220_v1  ;;  %v1896_v3 = vld [vmem:[%s7210_s26 + $0x13] sm:$0xff]  ;;  %s6692_s21 = smul.u32 288, %s7206_s14  ;;  %s5034_s8 = scalar_lea.sflag [#allocation4], %s7206_s14 }
  0x5e   : > { %v285_v4 = vld [vmem:[%s7210_s26 + $0x9] sm:$0xff]  ;;  %5896 = vmatpush3.msk.msra.mxu1 %vm431_vm0, %v321_v0  ;;  %5897 = vmatprep.mubr.msk.f32.mxu1 %vm322_vm1, %v284_v2  ;;  %v1897_v6 = vld [vmem:[%s7210_s26 + $0x1b] sm:$0xff]  ;;  %v286_v8 = vld [vmem:[%s7210_s26 + $0x11] sm:$0xff]  ;;  %s6765_s10 = smul.u32 4608, %s7086_s19  ;;  %s7035_s28 = smov [#allocation7]  }
  0x5f   : > { %v283_v5 = vld [vmem:[#allocation5] sm:$0xf]  ;;  %v2363_v7 = vld [vmem:[#allocation5 + $0x14] sm:$0xf]  ;;  %6120 = vmatpush3.msk.msra.mxu0 %vm431_vm0, %v7220_v1  ;;  %6121 = vmatprep.mubr.msk.f32.mxu0 %vm322_vm1, %v1896_v3  ;;  %v2793_v21 = vld [vmem:[#allocation5 + $0x18] sm:$0xf] }
  0x60   : > { %5898 = vmatmul.mubr.msk.f32.vlgmr.msra.gmra.mrb[0].mxu1 %vm322_vm1, %v285_v4  ;;  %5951 = vmatprep.subr.msk.mxu1 %vm431_vm0, %v283_v5  ;;  %v1898_v9 = vld [vmem:[%s7210_s26 + $0x23] sm:$0xff]  ;;  %v287_v10 = vld [vmem:[%s7210_s26 + $0x19] sm:$0xff]  ;;  %v1899_v11 = vld [vmem:[%s7210_s26 + $0x2b] sm:$0xff]  ;;  %s9043_s23 = scalar_lea.vmem [#allocation7], %s6692_s21  ;;  %s9660_s6 = scalar_lea.hbm %s9795_s2, %s6765_s10 }
  0x61   : > { %6122 = vmatmul.mubr.msk.f32.vlgmr.msra.gmra.mrb[0].mxu0 %vm322_vm1, %v1897_v6  ;;  %6175 = vmatprep.subr.msk.mxu0 %vm431_vm0, %v2363_v7  ;;  %v288_v12 = vld [vmem:[%s7210_s26 + $0x21] sm:$0xff]  ;;  %v1900_v13 = vld [vmem:[%s7210_s26 + $0x33] sm:$0xff]  ;;  %v289_v14 = vld [vmem:[%s7210_s26 + $0x29] sm:$0xff]  ;;  %s5055_s25 = sshll.u32 %s9043_s23, 4  ;;  %s6901_s12 = sshll.u32 %s7035_s28, 4  ;;  %s9662_s25 = int_to_ptr.vmem [resolvable:$true] %s5055_s25  ;;  %s6902_s12 = int_to_ptr.vmem [resolvable:$false] %s6901_s12 }
  0x62   : > { %5952 = vmatpush3.msk.msra.mxu1 %vm431_vm0, %v283_v5  ;;  %6176 = vmatpush3.msk.msra.mxu0 %vm431_vm0, %v2363_v7  ;;  %v1901_v15 = vld [vmem:[%s7210_s26 + $0x3b] sm:$0xff]  ;;  %v290_v16 = vld [vmem:[%s7210_s26 + $0x31] sm:$0xff]  ;;  %v1902_v17 = vld [vmem:[%s7210_s26 + $0x43] sm:$0xff]  ;;  %s6897_s9 = scalar_lea.vmem %s9662_s25, 4608  ;;  %s6903_s13 = scalar_lea.vmem %s6902_s12, 9216 }
  0x63   : > { %5900 = vmatprep.mubr.msk.f32.mxu1 %vm322_vm1, %v286_v8  ;;  %6124 = vmatprep.mubr.msk.f32.mxu0 %vm322_vm1, %v1898_v9  ;;  %v291_v18 = vld [vmem:[%s7210_s26 + $0x39] sm:$0xff]  ;;  %v1903_v19 = vld [vmem:[%s7210_s26 + $0x4b] sm:$0xff]  ;;  %v292_v20 = vld [vmem:[%s7210_s26 + $0x41] sm:$0xff]  ;;  %p6898_p4 = scmp.ne.s32.totalorder %s9662_s25, %s6897_s9  ;;  %p6904_p10 = scmp.lt.s32.totalorder %s9662_s25, %s6902_s12 }
  0x64   : > { %5901 = vmatmul.mubr.msk.f32.gmra.mrb[2].mxu1 %vm322_vm1, %v287_v10  ;;  %v1904_v22 = vld [vmem:[%s7210_s26 + $0x53] sm:$0xff]  ;;  %6231 = vmatprep.subr.msk.mxu0 %vm431_vm0, %v2793_v21  ;;  %v293_v23 = vld [vmem:[%s7210_s26 + $0x49] sm:$0xff]  ;;  %v1905_v24 = vld [vmem:[%s7210_s26 + $0x5b] sm:$0xff]  ;;  %p6905_p13 = scmp.lt.s32.totalorder %s6903_s13, %s6897_s9 }
  0x65   : > { %6125 = vmatmul.mubr.msk.f32.gmra.mrb[2].mxu0 %vm322_vm1, %v1899_v11  ;;  %5903 = vmatprep.mubr.msk.f32.mxu1 %vm322_vm1, %v288_v12  ;;  %v294_v25 = vld [vmem:[%s7210_s26 + $0x51] sm:$0xff]  ;;  %v1906_v26 = vld [vmem:[%s7210_s26 + $0x63] sm:$0xff]  ;;  %v295_v27 = vld [vmem:[%s7210_s26 + $0x59] sm:$0xff]  ;;  %p6899_p6 = pnand %p6898_p4, %p7158_p12 }
  0x66   : > { %6127 = vmatprep.mubr.msk.f32.mxu0 %vm322_vm1, %v1900_v13  ;;  %v1907_v28 = vld [vmem:[%s7210_s26 + $0x6b] sm:$0xff]  ;;  %v296_v29 = vld [vmem:[%s7210_s26 + $0x61] sm:$0xff]  ;;  %v1908_v30 = vld [vmem:[%s7210_s26 + $0x73] sm:$0xff]  ;;  %p6906_p3 = por %p6905_p13, %p6904_p10 }
  0x67   : > { %v297_v31 = vld [vmem:[%s7210_s26 + $0x69] sm:$0xff]  ;;  %v1909_v32 = vld [vmem:[%s7210_s26 + $0x7b] sm:$0xff]  ;;  %v298_v33 = vld [vmem:[%s7210_s26 + $0x71] sm:$0xff]  ;;  %p6900_p8 = pneg %p6899_p6 }
  0x68   : > { %5904 = vmatmul.mubr.msk.f32.gmra.mrb[4].mxu1 %vm322_vm1, %v289_v14  ;;  %v7288_v34 = vld [vmem:[#allocation5 + $0x8] sm:$0xf]  ;;  %v1910_v35 = vld [vmem:[%s7210_s26 + $0x83] sm:$0xff] }
  0x69   : > { %6128 = vmatmul.mubr.msk.f32.gmra.mrb[4].mxu0 %vm322_vm1, %v1901_v15  ;;  %5906 = vmatprep.mubr.msk.f32.mxu1 %vm322_vm1, %v290_v16  ;;  %v299_v36 = vld [vmem:[%s7210_s26 + $0x79] sm:$0xff]  ;;  %v1911_v37 = vld [vmem:[%s7210_s26 + $0x8b] sm:$0xff]  ;;  %v300_v38 = vld [vmem:[%s7210_s26 + $0x81] sm:$0xff]  ;;  %p6907_p7 = pnand %p6906_p3, %p6900_p8 }
  0x6a   : > { %6130 = vmatprep.mubr.msk.f32.mxu0 %vm322_vm1, %v1902_v17  ;;  %6007 = vmatprep.subr.msk.mxu1 %vm431_vm0, %v7288_v34  ;;  %v1912_v39 = vld [vmem:[%s7210_s26 + $0x93] sm:$0xff]  ;;  %v301_v40 = vld [vmem:[%s7210_s26 + $0x89] sm:$0xff]  ;;  %v1913_v41 = vld [vmem:[%s7210_s26 + $0x9b] sm:$0xff] }
  0x6b   : > { %v302_v42 = vld [vmem:[%s7210_s26 + $0x91] sm:$0xff]  ;;  %v303_v44 = vld [vmem:[%s7210_s26 + $0x99] sm:$0xff]  ;;  %v304_v46 = vld [vmem:[%s7210_s26 + $0xa1] sm:$0xff] }
  0x6c   : > { %5907 = vmatmul.mubr.msk.f32.gmra.mrb[6].mxu1 %vm322_vm1, %v291_v18  ;;  %v2326_v43 = vld [vmem:[%s7210_s26 + $0x14] sm:$0xff]  ;;  %v2327_v45 = vld [vmem:[%s7210_s26 + $0x1c] sm:$0xff]  ;;  %v7317_v47 = vld [vmem:[%s7210_s26 + $0x24] sm:$0xff] }
  0x6d   : > { %6131 = vmatmul.mubr.msk.f32.gmra.mrb[6].mxu0 %vm322_vm1, %v1903_v19  ;;  %5909 = vmatprep.mubr.msk.f32.mxu1 %vm322_vm1, %v292_v20  ;;  %v7320_v48 = vld [vmem:[#allocation5 + $0x1c] sm:$0xf]  ;;  %v306_v51 = vld [vmem:[%s7210_s26 + $0xb1] sm:$0xff]  ;;  %v307_v53 = vld [vmem:[%s7210_s26 + $0xb9] sm:$0xff] }
  0x6e   : > { %6133 = vmatprep.mubr.msk.f32.mxu0 %vm322_vm1, %v1904_v22  ;;  %v305_v49 = vld [vmem:[%s7210_s26 + $0xa9] sm:$0xff]  ;;  %v7333_v52 = vld [vmem:[%s7210_s26 + $0x34] sm:$0xff]  ;;  %v7345_v54 = vld [vmem:[%s7210_s26 + $0x3c] sm:$0xff] }
  0x6f   : > { %v7329_v50 = vld [vmem:[%s7210_s26 + $0x2c] sm:$0xff]  ;;  %v308_v55 = vld [vmem:[%s7210_s26 + $0xc1] sm:$0xff]  ;;  %v7363_v60 = vld [vmem:[%s7210_s26 + $0x54] sm:$0xff] }
  0x70   : > { %5910 = vmatmul.mubr.msk.f32.gmra.mrb[8].mxu1 %vm322_vm1, %v293_v23  ;;  %v7349_v56 = vld [vmem:[%s7210_s26 + $0x44] sm:$0xff]  ;;  %v7359_v58 = vld [vmem:[%s7210_s26 + $0x4c] sm:$0xff]  ;;  %v311_v61 = vld [vmem:[%s7210_s26 + $0xd9] sm:$0xff] }
  0x71   : > { %6134 = vmatmul.mubr.msk.f32.gmra.mrb[8].mxu0 %vm322_vm1, %v1905_v24  ;;  %5912 = vmatprep.mubr.msk.f32.mxu1 %vm322_vm1, %v294_v25  ;;  %v309_v57 = vld [vmem:[%s7210_s26 + $0xc9] sm:$0xff]  ;;  %v310_v59 = vld [vmem:[%s7210_s26 + $0xd1] sm:$0xff]  ;;  %v7373_v62 = vld [vmem:[%s7210_s26 + $0x5c] sm:$0xff] }
  0x72   : > { %6136 = vmatprep.mubr.msk.f32.mxu0 %vm322_vm1, %v1906_v26  ;;  %v312_v63 = vld [vmem:[%s7210_s26 + $0xe1] sm:$0xff]  ;;  %v313_v2 = vld [vmem:[%s7210_s26 + $0xe9] sm:$0xff]  ;;  %v314_v4 = vld [vmem:[%s7210_s26 + $0xf1] sm:$0xff] }
  0x73   : > { %v7377_v0 = vld [vmem:[%s7210_s26 + $0x64] sm:$0xff]  ;;  %v7387_v3 = vld [vmem:[%s7210_s26 + $0x6c] sm:$0xff]  ;;  %v7391_v5 = vld [vmem:[%s7210_s26 + $0x74] sm:$0xff] }
  0x74   : > { %5913 = vmatmul.mubr.msk.f32.gmra.mrb[10].mxu1 %vm322_vm1, %v295_v27  ;;  %v315_v6 = vld [vmem:[%s7210_s26 + $0xf9] sm:$0xff]  ;;  %v316_v8 = vld [vmem:[%s7210_s26 + $0x101] sm:$0xff]  ;;  %v317_v10 = vld [vmem:[%s7210_s26 + $0x109] sm:$0xff] }
  0x75   : > { %6137 = vmatmul.mubr.msk.f32.gmra.mrb[10].mxu0 %vm322_vm1, %v1907_v28  ;;  %5915 = vmatprep.mubr.msk.f32.mxu1 %vm322_vm1, %v296_v29  ;;  %v7401_v7 = vld [vmem:[%s7210_s26 + $0x7c] sm:$0xff]  ;;  %v7405_v9 = vld [vmem:[%s7210_s26 + $0x84] sm:$0xff]  ;;  %v7415_v11 = vld [vmem:[%s7210_s26 + $0x8c] sm:$0xff] }
  0x76   : > { %6139 = vmatprep.mubr.msk.f32.mxu0 %vm322_vm1, %v1908_v30  ;;  %v318_v12 = vld [vmem:[%s7210_s26 + $0x111] sm:$0xff]  ;;  %v319_v14 = vld [vmem:[%s7210_s26 + $0x119] sm:$0xff]  ;;  %v7433_v17 = vld [vmem:[%s7210_s26 + $0xa4] sm:$0xff] }
  0x77   : > { %v7419_v13 = vld [vmem:[%s7210_s26 + $0x94] sm:$0xff]  ;;  %v7429_v15 = vld [vmem:[%s7210_s26 + $0x9c] sm:$0xff]  ;;  %v248_v18 = vld [vmem:[%s7210_s26 + $0x8] sm:$0xff] }
  0x78   : > { %5916 = vmatmul.mubr.msk.f32.gmra.mrb[12].mxu1 %vm322_vm1, %v297_v31  ;;  %v247_v16 = vld [vmem:[%s7210_s26] sm:$0xff]  ;;  %v7443_v19 = vld [vmem:[%s7210_s26 + $0xac] sm:$0xff]  ;;  %v7450_v22 = vld [vmem:[#allocation5 + $0xc] sm:$0xf] }
  0x79   : > { %6140 = vmatmul.mubr.msk.f32.gmra.mrb[12].mxu0 %vm322_vm1, %v1909_v32  ;;  %5918 = vmatprep.mubr.msk.f32.mxu1 %vm322_vm1, %v298_v33  ;;  %v249_v20 = vld [vmem:[%s7210_s26 + $0x10] sm:$0xff]  ;;  %v250_v23 = vld [vmem:[%s7210_s26 + $0x18] sm:$0xff]  ;;  %v251_v25 = vld [vmem:[%s7210_s26 + $0x20] sm:$0xff] }
  0x7a   : > { %6142 = vmatprep.mubr.msk.f32.mxu0 %vm322_vm1, %v1910_v35  ;;  %v7461_v24 = vld [vmem:[%s7210_s26 + $0xbc] sm:$0xff]  ;;  %v7465_v26 = vld [vmem:[%s7210_s26 + $0xc4] sm:$0xff]  ;;  %v7477_v28 = vld [vmem:[%s7210_s26 + $0xcc] sm:$0xff] }
  0x7b   : > { %v252_v27 = vld [vmem:[%s7210_s26 + $0x28] sm:$0xff]  ;;  %v253_v29 = vld [vmem:[%s7210_s26 + $0x30] sm:$0xff]  ;;  %v254_v31 = vld [vmem:[%s7210_s26 + $0x38] sm:$0xff] }
  0x7c   : > { %5919 = vmatmul.mubr.msk.f32.gmra.mrb[14].mxu1 %vm322_vm1, %v299_v36  ;;  %v7481_v30 = vld [vmem:[%s7210_s26 + $0xd4] sm:$0xff]  ;;  %v7491_v32 = vld [vmem:[%s7210_s26 + $0xdc] sm:$0xff]  ;;  %v256_v35 = vld [vmem:[%s7210_s26 + $0x48] sm:$0xff] }
  0x7d   : > { %6143 = vmatmul.mubr.msk.f32.gmra.mrb[14].mxu0 %vm322_vm1, %v1911_v37  ;;  %5921 = vmatprep.mubr.msk.f32.mxu1 %vm322_vm1, %v300_v38  ;;  %v255_v33 = vld [vmem:[%s7210_s26 + $0x40] sm:$0xff]  ;;  %v7505_v36 = vld [vmem:[%s7210_s26 + $0xec] sm:$0xff]  ;;  %v7509_v38 = vld [vmem:[%s7210_s26 + $0xf4] sm:$0xff] }
  0x7e   : > { %6145 = vmatprep.mubr.msk.f32.mxu0 %vm322_vm1, %v1912_v39  ;;  %v257_v37 = vld [vmem:[%s7210_s26 + $0x50] sm:$0xff]  ;;  %v258_v39 = vld [vmem:[%s7210_s26 + $0x58] sm:$0xff] }
  0x80   : > { %5922 = vmatmul.mubr.msk.f32.gmra.mrb[16].mxu1 %vm322_vm1, %v301_v40  ;;  %v7519_v40 = vld [vmem:[%s7210_s26 + $0xfc] sm:$0xff] }
  0x81   : > { %6146 = vmatmul.mubr.msk.f32.gmra.mrb[16].mxu0 %vm322_vm1, %v1913_v41  ;;  %5924 = vmatprep.mubr.msk.f32.mxu1 %vm322_vm1, %v302_v42  ;;  %v259_v41 = vld [vmem:[%s7210_s26 + $0x60] sm:$0xff] }
  0x82   : > { %6177 = vmatprep.mubr.msk.f32.mxu0 %vm322_vm1, %v2326_v43  ;;  %v7523_v42 = vld [vmem:[%s7210_s26 + $0x104] sm:$0xff] }
  0x83   : > { %v260_v43 = vld [vmem:[%s7210_s26 + $0x68] sm:$0xff] }
  0x84   : > { %5925 = vmatmul.mubr.msk.f32.gmra.mrb[18].mxu1 %vm322_vm1, %v303_v44  ;;  %v7533_v44 = vld [vmem:[%s7210_s26 + $0x10c] sm:$0xff] }
  0x85   : > { %6178 = vmatmul.mubr.msk.f32.vlgmr.msra.gmra.mrb[0].mxu0 %vm322_vm1, %v2327_v45  ;;  %5927 = vmatprep.mubr.msk.f32.mxu1 %vm322_vm1, %v304_v46  ;;  %v261_v45 = vld [vmem:[%s7210_s26 + $0x70] sm:$0xff] }
  0x86   : > { %6232 = vmatpush3.msk.msra.mxu0 %vm431_vm0, %v2793_v21  ;;  %6180 = vmatprep.mubr.msk.f32.mxu0 %vm322_vm1, %v7317_v47  ;;  %v7447_v21 = vld [vmem:[%s7210_s26 + $0xb4] sm:$0xff] }
  0x87   : > { %6287 = vmatprep.subr.msk.mxu0 %vm431_vm0, %v7320_v48  ;;  %v7537_v46 = vld [vmem:[%s7210_s26 + $0x114] sm:$0xff] }
  0x88   : > { %5928 = vmatmul.mubr.msk.f32.gmra.mrb[20].mxu1 %vm322_vm1, %v305_v49  ;;  %v262_v49 = vld [vmem:[%s7210_s26 + $0x78] sm:$0xff] }
  0x89   : > { %6181 = vmatmul.mubr.msk.f32.gmra.mrb[2].mxu0 %vm322_vm1, %v7329_v50  ;;  %5930 = vmatprep.mubr.msk.f32.mxu1 %vm322_vm1, %v306_v51  ;;  %v7547_v51 = vld [vmem:[%s7210_s26 + $0x11c] sm:$0xff] }
  0x8a   : > { %6183 = vmatprep.mubr.msk.f32.mxu0 %vm322_vm1, %v7333_v52 }
  0x8c   : > { %5931 = vmatmul.mubr.msk.f32.gmra.mrb[22].mxu1 %vm322_vm1, %v307_v53  ;;  %v263_v53 = vld [vmem:[%s7210_s26 + $0x80] sm:$0xff] }
  0x8d   : > { %6184 = vmatmul.mubr.msk.f32.gmra.mrb[4].mxu0 %vm322_vm1, %v7345_v54  ;;  %5933 = vmatprep.mubr.msk.f32.mxu1 %vm322_vm1, %v308_v55  ;;  %v7551_v55 = vld [vmem:[%s7210_s26 + $0x124] sm:$0xff] }
  0x8e   : > { %6186 = vmatprep.mubr.msk.f32.mxu0 %vm322_vm1, %v7349_v56 }
  0x90   : > { %5934 = vmatmul.mubr.msk.f32.gmra.mrb[24].mxu1 %vm322_vm1, %v309_v57  ;;  %v264_v57 = vld [vmem:[%s7210_s26 + $0x88] sm:$0xff] }
  0x91   : > { %6187 = vmatmul.mubr.msk.f32.gmra.mrb[6].mxu0 %vm322_vm1, %v7359_v58  ;;  %5936 = vmatprep.mubr.msk.f32.mxu1 %vm322_vm1, %v310_v59  ;;  %v7561_v59 = vld [vmem:[%s7210_s26 + $0x12c] sm:$0xff] }
  0x92   : > { %6189 = vmatprep.mubr.msk.f32.mxu0 %vm322_vm1, %v7363_v60 }
  0x94   : > { %5937 = vmatmul.mubr.msk.f32.gmra.mrb[26].mxu1 %vm322_vm1, %v311_v61  ;;  %v265_v61 = vld [vmem:[%s7210_s26 + $0x90] sm:$0xff] }
  0x95   : > { %6190 = vmatmul.mubr.msk.f32.gmra.mrb[8].mxu0 %vm322_vm1, %v7373_v62  ;;  %5939 = vmatprep.mubr.msk.f32.mxu1 %vm322_vm1, %v312_v63  ;;  %v266_v63 = vld [vmem:[%s7210_s26 + $0x98] sm:$0xff] }
  0x96   : > { %6192 = vmatprep.mubr.msk.f32.mxu0 %vm322_vm1, %v7377_v0 }
  0x98   : > { %5940 = vmatmul.mubr.msk.f32.gmra.mrb[28].mxu1 %vm322_vm1, %v313_v2  ;;  %v267_v2 = vld [vmem:[%s7210_s26 + $0xa0] sm:$0xff] }
  0x99   : > { %6193 = vmatmul.mubr.msk.f32.gmra.mrb[10].mxu0 %vm322_vm1, %v7387_v3  ;;  %5942 = vmatprep.mubr.msk.f32.mxu1 %vm322_vm1, %v314_v4  ;;  %v7573_v4 = vld [vmem:[#allocation5 + $0x20] sm:$0xf] }
  0x9a   : > { %6195 = vmatprep.mubr.msk.f32.mxu0 %vm322_vm1, %v7391_v5 }
  0x9c   : > { %5943 = vmatmul.mubr.msk.f32.gmra.mrb[30].mxu1 %vm322_vm1, %v315_v6  ;;  %v268_v6 = vld [vmem:[%s7210_s26 + $0xa8] sm:$0xff] }
  0x9d   : > { %6196 = vmatmul.mubr.msk.f32.gmra.mrb[12].mxu0 %vm322_vm1, %v7401_v7  ;;  %5945 = vmatprep.mubr.msk.f32.mxu1 %vm322_vm1, %v316_v8  ;;  %v282_v8 = vld [vmem:[%s7210_s26 + $0x118] sm:$0xff] }
  0x9e   : > { %6198 = vmatprep.mubr.msk.f32.mxu0 %vm322_vm1, %v7405_v9 }
  0xa0   : > { %5946 = vmatmul.mubr.msk.f32.gmra.mrb[32].mxu1 %vm322_vm1, %v317_v10  ;;  %v1037_v10 = vld [vmem:[%s7210_s26 + $0xa] sm:$0xff] }
  0xa1   : > { %6199 = vmatmul.mubr.msk.f32.gmra.mrb[14].mxu0 %vm322_vm1, %v7415_v11  ;;  %5948 = vmatprep.mubr.msk.f32.mxu1 %vm322_vm1, %v318_v12  ;;  %v7658_v12 = vld [vmem:[%s7210_s26 + $0x1a] sm:$0xff] }
  0xa2   : > { %6201 = vmatprep.mubr.msk.f32.mxu0 %vm322_vm1, %v7419_v13 }
  0xa4   : > { %5949 = vmatmul.mubr.msk.f32.gmra.mrb[34].mxu1 %vm322_vm1, %v319_v14  ;;  %v7676_v14 = vld [vmem:[%s7210_s26 + $0x2a] sm:$0xff] }
  0xa5   : > { %6202 = vmatmul.mubr.msk.f32.gmra.mrb[16].mxu0 %vm322_vm1, %v7429_v15  ;;  %5953 = vmatprep.mubr.msk.f32.mxu1 %vm322_vm1, %v247_v16  ;;  %v7690_v16 = vld [vmem:[%s7210_s26 + $0x3a] sm:$0xff] }
  0xa6   : > { %6204 = vmatprep.mubr.msk.f32.mxu0 %vm322_vm1, %v7433_v17 }
  0xa8   : > { %5954 = vmatmul.mubr.msk.f32.vlgmr.msra.gmra.mrb[0].mxu1 %vm322_vm1, %v248_v18  ;;  %v7704_v18 = vld [vmem:[%s7210_s26 + $0x4a] sm:$0xff] }
  0xa9   : > { %6205 = vmatmul.mubr.msk.f32.gmra.mrb[18].mxu0 %vm322_vm1, %v7443_v19  ;;  %6008 = vmatpush3.msk.msra.mxu1 %vm431_vm0, %v7288_v34  ;;  %v7495_v34 = vld [vmem:[%s7210_s26 + $0xe4] sm:$0xff] }
  0xaa   : > { %5956 = vmatprep.mubr.msk.f32.mxu1 %vm322_vm1, %v249_v20  ;;  %6207 = vmatprep.mubr.msk.f32.mxu0 %vm322_vm1, %v7447_v21  ;;  %v7718_v20 = vld [vmem:[%s7210_s26 + $0x5a] sm:$0xff] }
  0xab   : > { %6063 = vmatprep.subr.msk.mxu1 %vm431_vm0, %v7450_v22 }
  0xac   : > { %5957 = vmatmul.mubr.msk.f32.gmra.mrb[2].mxu1 %vm322_vm1, %v250_v23  ;;  %v7737_v23 = vld [vmem:[%s7210_s26 + $0x72] sm:$0xff] }
  0xad   : > { %6208 = vmatmul.mubr.msk.f32.gmra.mrb[20].mxu0 %vm322_vm1, %v7461_v24  ;;  %5959 = vmatprep.mubr.msk.f32.mxu1 %vm322_vm1, %v251_v25  ;;  %v7751_v25 = vld [vmem:[%s7210_s26 + $0x82] sm:$0xff] }
  0xae   : > { %6210 = vmatprep.mubr.msk.f32.mxu0 %vm322_vm1, %v7465_v26 }
  0xb0   : > { %5960 = vmatmul.mubr.msk.f32.gmra.mrb[4].mxu1 %vm322_vm1, %v252_v27  ;;  %v7761_v27 = vld [vmem:[%s7210_s26 + $0x8a] sm:$0xff] }
  0xb1   : > { %6211 = vmatmul.mubr.msk.f32.gmra.mrb[22].mxu0 %vm322_vm1, %v7477_v28  ;;  %5962 = vmatprep.mubr.msk.f32.mxu1 %vm322_vm1, %v253_v29  ;;  %v7766_v29 = vld [vmem:[%s7210_s26 + $0x92] sm:$0xff] }
  0xb2   : > { %6213 = vmatprep.mubr.msk.f32.mxu0 %vm322_vm1, %v7481_v30 }
  0xb4   : > { %5963 = vmatmul.mubr.msk.f32.gmra.mrb[6].mxu1 %vm322_vm1, %v254_v31  ;;  %v7775_v31 = vld [vmem:[%s7210_s26 + $0x9a] sm:$0xff] }
  0xb5   : > { %6214 = vmatmul.mubr.msk.f32.gmra.mrb[24].mxu0 %vm322_vm1, %v7491_v32  ;;  %5965 = vmatprep.mubr.msk.f32.mxu1 %vm322_vm1, %v255_v33  ;;  %v7780_v33 = vld [vmem:[%s7210_s26 + $0xa2] sm:$0xff] }
  0xb6   : > { %6216 = vmatprep.mubr.msk.f32.mxu0 %vm322_vm1, %v7495_v34 }
  0xb8   : > { %5966 = vmatmul.mubr.msk.f32.gmra.mrb[8].mxu1 %vm322_vm1, %v256_v35  ;;  %v7789_v35 = vld [vmem:[%s7210_s26 + $0xaa] sm:$0xff] }
  0xb9   : > { %6217 = vmatmul.mubr.msk.f32.gmra.mrb[26].mxu0 %vm322_vm1, %v7505_v36  ;;  %5968 = vmatprep.mubr.msk.f32.mxu1 %vm322_vm1, %v257_v37  ;;  %v7796_v37 = vld [vmem:[%s7210_s26 + $0xb2] sm:$0xff] }
  0xba   : > { %6219 = vmatprep.mubr.msk.f32.mxu0 %vm322_vm1, %v7509_v38 }
  0xbc   : > { %5969 = vmatmul.mubr.msk.f32.gmra.mrb[10].mxu1 %vm322_vm1, %v258_v39  ;;  %v7805_v39 = vld [vmem:[%s7210_s26 + $0xba] sm:$0xff] }
  0xbd   : > { %6220 = vmatmul.mubr.msk.f32.gmra.mrb[28].mxu0 %vm322_vm1, %v7519_v40  ;;  %5971 = vmatprep.mubr.msk.f32.mxu1 %vm322_vm1, %v259_v41  ;;  %v7810_v41 = vld [vmem:[%s7210_s26 + $0xc2] sm:$0xff] }
  0xbe   : > { %6222 = vmatprep.mubr.msk.f32.mxu0 %vm322_vm1, %v7523_v42 }
  0xc0   : > { %5972 = vmatmul.mubr.msk.f32.gmra.mrb[12].mxu1 %vm322_vm1, %v260_v43  ;;  %v7819_v43 = vld [vmem:[%s7210_s26 + $0xca] sm:$0xff] }
  0xc1   : > { %6223 = vmatmul.mubr.msk.f32.gmra.mrb[30].mxu0 %vm322_vm1, %v7533_v44  ;;  %5974 = vmatprep.mubr.msk.f32.mxu1 %vm322_vm1, %v261_v45  ;;  %v7824_v45 = vld [vmem:[%s7210_s26 + $0xd2] sm:$0xff] }
  0xc2   : > { %6225 = vmatprep.mubr.msk.f32.mxu0 %vm322_vm1, %v7537_v46 }
  0xc4   : > { %5975 = vmatmul.mubr.msk.f32.gmra.mrb[14].mxu1 %vm322_vm1, %v262_v49  ;;  %v7833_v49 = vld [vmem:[%s7210_s26 + $0xda] sm:$0xff] }
  0xc5   : > { %6226 = vmatmul.mubr.msk.f32.gmra.mrb[32].mxu0 %vm322_vm1, %v7547_v51  ;;  %5977 = vmatprep.mubr.msk.f32.mxu1 %vm322_vm1, %v263_v53  ;;  %v7838_v53 = vld [vmem:[%s7210_s26 + $0xe2] sm:$0xff] }
  0xc6   : > { %6228 = vmatprep.mubr.msk.f32.mxu0 %vm322_vm1, %v7551_v55 }
  0xc8   : > { %5978 = vmatmul.mubr.msk.f32.gmra.mrb[16].mxu1 %vm322_vm1, %v264_v57  ;;  %v7847_v57 = vld [vmem:[%s7210_s26 + $0xea] sm:$0xff] }
  0xc9   : > { %6229 = vmatmul.mubr.msk.f32.gmra.mrb[34].mxu0 %vm322_vm1, %v7561_v59  ;;  %5980 = vmatprep.mubr.msk.f32.mxu1 %vm322_vm1, %v265_v61  ;;  %v7852_v61 = vld [vmem:[%s7210_s26 + $0xf2] sm:$0xff] }
  0xca   : > { %6233 = vmatprep.mubr.msk.f32.mxu0 %vm322_vm1, %v7317_v47  ;;  %v269_v47 = vld [vmem:[%s7210_s26 + $0xb0] sm:$0xff] }
  0xcc   : > { %5981 = vmatmul.mubr.msk.f32.gmra.mrb[18].mxu1 %vm322_vm1, %v266_v63  ;;  %v3198_v63 = vld [vmem:[%s7210_s26 + $0x85] sm:$0xff] }
  0xcd   : > { %6234 = vmatmul.mubr.msk.f32.vlgmr.msra.gmra.mrb[0].mxu0 %vm322_vm1, %v7329_v50  ;;  %5983 = vmatprep.mubr.msk.f32.mxu1 %vm322_vm1, %v267_v2  ;;  %v270_v50 = vld [vmem:[%s7210_s26 + $0xb8] sm:$0xff] }
  0xce   : > { %6288 = vmatpush3.msk.msra.mxu0 %vm431_vm0, %v7320_v48  ;;  %6236 = vmatprep.mubr.msk.f32.mxu0 %vm322_vm1, %v7333_v52  ;;  %v271_v48 = vld [vmem:[%s7210_s26 + $0xc0] sm:$0xff]  ;;  %v272_v52 = vld [vmem:[%s7210_s26 + $0xc8] sm:$0xff] }
  0xcf   : > { %6343 = vmatprep.subr.msk.mxu0 %vm431_vm0, %v7573_v4  ;;  %v7861_v2 = vld [vmem:[%s7210_s26 + $0xfa] sm:$0xff] }
  0xd0   : > { %5984 = vmatmul.mubr.msk.f32.gmra.mrb[20].mxu1 %vm322_vm1, %v268_v6  ;;  %v7866_v6 = vld [vmem:[%s7210_s26 + $0x102] sm:$0xff] }
  0xd1   : > { %6237 = vmatmul.mubr.msk.f32.gmra.mrb[2].mxu0 %vm322_vm1, %v7345_v54  ;;  %5986 = vmatprep.mubr.msk.f32.mxu1 %vm322_vm1, %v269_v47  ;;  %v273_v54 = vld [vmem:[%s7210_s26 + $0xd0] sm:$0xff] }
  0xd2   : > { %6239 = vmatprep.mubr.msk.f32.mxu0 %vm322_vm1, %v7349_v56  ;;  %v274_v56 = vld [vmem:[%s7210_s26 + $0xd8] sm:$0xff] }
  0xd3   : > { %v3200_v47 = vld [vmem:[%s7210_s26 + $0x95] sm:$0xff] }
  0xd4   : > { %5987 = vmatmul.mubr.msk.f32.gmra.mrb[22].mxu1 %vm322_vm1, %v270_v50  ;;  %v7875_v50 = vld [vmem:[%s7210_s26 + $0x10a] sm:$0xff] }
  0xd5   : > { %6240 = vmatmul.mubr.msk.f32.gmra.mrb[4].mxu0 %vm322_vm1, %v7359_v58  ;;  %5989 = vmatprep.mubr.msk.f32.mxu1 %vm322_vm1, %v271_v48  ;;  %v275_v58 = vld [vmem:[%s7210_s26 + $0xe0] sm:$0xff] }
  0xd6   : > { %6242 = vmatprep.mubr.msk.f32.mxu0 %vm322_vm1, %v7363_v60  ;;  %v276_v60 = vld [vmem:[%s7210_s26 + $0xe8] sm:$0xff]  ;;  %v3201_v48 = vld [vmem:[%s7210_s26 + $0x9d] sm:$0xff] }
  0xd8   : > { %5990 = vmatmul.mubr.msk.f32.gmra.mrb[24].mxu1 %vm322_vm1, %v272_v52  ;;  %v7880_v52 = vld [vmem:[%s7210_s26 + $0x112] sm:$0xff] }
  0xd9   : > { %6243 = vmatmul.mubr.msk.f32.gmra.mrb[6].mxu0 %vm322_vm1, %v7373_v62  ;;  %5992 = vmatprep.mubr.msk.f32.mxu1 %vm322_vm1, %v273_v54  ;;  %v277_v62 = vld [vmem:[%s7210_s26 + $0xf0] sm:$0xff]  ;;  %v3202_v54 = vld [vmem:[%s7210_s26 + $0xa5] sm:$0xff] }
  0xda   : > { %6245 = vmatprep.mubr.msk.f32.mxu0 %vm322_vm1, %v7377_v0  ;;  %v278_v0 = vld [vmem:[%s7210_s26 + $0xf8] sm:$0xff] }
  0xdc   : > { %5993 = vmatmul.mubr.msk.f32.gmra.mrb[26].mxu1 %vm322_vm1, %v274_v56  ;;  %v7889_v56 = vld [vmem:[%s7210_s26 + $0x11a] sm:$0xff] }
  0xdd   : > { %6246 = vmatmul.mubr.msk.f32.gmra.mrb[8].mxu0 %vm322_vm1, %v7387_v3  ;;  %5995 = vmatprep.mubr.msk.f32.mxu1 %vm322_vm1, %v275_v58  ;;  %v279_v3 = vld [vmem:[%s7210_s26 + $0x100] sm:$0xff]  ;;  %v3203_v58 = vld [vmem:[%s7210_s26 + $0xad] sm:$0xff] }
  0xde   : > { %6248 = vmatprep.mubr.msk.f32.mxu0 %vm322_vm1, %v7391_v5  ;;  %v280_v5 = vld [vmem:[%s7210_s26 + $0x108] sm:$0xff] }
  0xe0   : > { %5996 = vmatmul.mubr.msk.f32.gmra.mrb[28].mxu1 %vm322_vm1, %v276_v60  ;;  %v3204_v60 = vld [vmem:[%s7210_s26 + $0xb5] sm:$0xff] }
  0xe1   : > { %6249 = vmatmul.mubr.msk.f32.gmra.mrb[10].mxu0 %vm322_vm1, %v7401_v7  ;;  %5998 = vmatprep.mubr.msk.f32.mxu1 %vm322_vm1, %v277_v62  ;;  %v281_v7 = vld [vmem:[%s7210_s26 + $0x110] sm:$0xff]  ;;  %v3205_v62 = vld [vmem:[%s7210_s26 + $0xbd] sm:$0xff] }
  0xe2   : > { %6251 = vmatprep.mubr.msk.f32.mxu0 %vm322_vm1, %v7405_v9  ;;  %v1036_v9 = vld [vmem:[%s7210_s26 + $0x2] sm:$0xff] }
  0xe4   : > { %5999 = vmatmul.mubr.msk.f32.gmra.mrb[30].mxu1 %vm322_vm1, %v278_v0  ;;  %v3206_v0 = vld [vmem:[%s7210_s26 + $0xc5] sm:$0xff] }
  0xe5   : > { %6252 = vmatmul.mubr.msk.f32.gmra.mrb[12].mxu0 %vm322_vm1, %v7415_v11  ;;  %6001 = vmatprep.mubr.msk.f32.mxu1 %vm322_vm1, %v279_v3  ;;  %v7650_v11 = vld [vmem:[%s7210_s26 + $0x12] sm:$0xff] }
  0xe6   : > { %6254 = vmatprep.mubr.msk.f32.mxu0 %vm322_vm1, %v7419_v13  ;;  %v7665_v13 = vld [vmem:[%s7210_s26 + $0x22] sm:$0xff]  ;;  %v3207_v3 = vld [vmem:[%s7210_s26 + $0xcd] sm:$0xff] }
  0xe8   : > { %6002 = vmatmul.mubr.msk.f32.gmra.mrb[32].mxu1 %vm322_vm1, %v280_v5  ;;  %v3208_v5 = vld [vmem:[%s7210_s26 + $0xd5] sm:$0xff] }
  0xe9   : > { %6255 = vmatmul.mubr.msk.f32.gmra.mrb[14].mxu0 %vm322_vm1, %v7429_v15  ;;  %6004 = vmatprep.mubr.msk.f32.mxu1 %vm322_vm1, %v281_v7  ;;  %v7681_v15 = vld [vmem:[%s7210_s26 + $0x32] sm:$0xff]  ;;  %v3210_v7 = vld [vmem:[%s7210_s26 + $0xe5] sm:$0xff] }
  0xea   : > { %6257 = vmatprep.mubr.msk.f32.mxu0 %vm322_vm1, %v7433_v17  ;;  %v7695_v17 = vld [vmem:[%s7210_s26 + $0x42] sm:$0xff] }
  0xec   : > { %6005 = vmatmul.mubr.msk.f32.gmra.mrb[34].mxu1 %vm322_vm1, %v282_v8  ;;  %v3211_v8 = vld [vmem:[%s7210_s26 + $0xed] sm:$0xff] }
  0xed   : > { %6258 = vmatmul.mubr.msk.f32.gmra.mrb[16].mxu0 %vm322_vm1, %v7443_v19  ;;  %6009 = vmatprep.mubr.msk.f32.mxu1 %vm322_vm1, %v1036_v9  ;;  %v7709_v19 = vld [vmem:[%s7210_s26 + $0x52] sm:$0xff] }
  0xee   : > { %6260 = vmatprep.mubr.msk.f32.mxu0 %vm322_vm1, %v7447_v21  ;;  %v7723_v21 = vld [vmem:[%s7210_s26 + $0x62] sm:$0xff]  ;;  %v3212_v9 = vld [vmem:[%s7210_s26 + $0xf5] sm:$0xff] }
  0xf0   : > { %6010 = vmatmul.mubr.msk.f32.vlgmr.msra.gmra.mrb[0].mxu1 %vm322_vm1, %v1037_v10  ;;  %v3213_v10 = vld [vmem:[%s7210_s26 + $0xfd] sm:$0xff] }
  0xf1   : > { %6261 = vmatmul.mubr.msk.f32.gmra.mrb[18].mxu0 %vm322_vm1, %v7461_v24  ;;  %6064 = vmatpush3.msk.msra.mxu1 %vm431_vm0, %v7450_v22  ;;  %v7732_v22 = vld [vmem:[%s7210_s26 + $0x6a] sm:$0xff]  ;;  %v7746_v24 = vld [vmem:[%s7210_s26 + $0x7a] sm:$0xff] }
  0xf2   : > { %6012 = vmatprep.mubr.msk.f32.mxu1 %vm322_vm1, %v7650_v11  ;;  %6263 = vmatprep.mubr.msk.f32.mxu0 %vm322_vm1, %v7465_v26  ;;  %v2790_v26 = vld [vmem:[%s7210_s26 + $0x134] sm:$0xff] }
  0xf3   : > { %6399 = vmatprep.subr.msk.mxu1 %vm431_vm0, %v7220_v1 }
  0xf4   : > { %6013 = vmatmul.mubr.msk.f32.gmra.mrb[2].mxu1 %vm322_vm1, %v7658_v12 }
  0xf5   : > { %6264 = vmatmul.mubr.msk.f32.gmra.mrb[20].mxu0 %vm322_vm1, %v7477_v28  ;;  %6015 = vmatprep.mubr.msk.f32.mxu1 %vm322_vm1, %v7665_v13  ;;  %v2791_v28 = vld [vmem:[%s7210_s26 + $0x13c] sm:$0xff] }
  0xf6   : > { %6266 = vmatprep.mubr.msk.f32.mxu0 %vm322_vm1, %v7481_v30  ;;  %v3186_v30 = vld [vmem:[%s7210_s26 + $0x25] sm:$0xff] }
  0xf8   : > { %6016 = vmatmul.mubr.msk.f32.gmra.mrb[4].mxu1 %vm322_vm1, %v7676_v14 }
  0xf9   : > { %6267 = vmatmul.mubr.msk.f32.gmra.mrb[22].mxu0 %vm322_vm1, %v7491_v32  ;;  %6018 = vmatprep.mubr.msk.f32.mxu1 %vm322_vm1, %v7681_v15  ;;  %v3187_v32 = vld [vmem:[%s7210_s26 + $0x2d] sm:$0xff] }
  0xfa   : > { %6269 = vmatprep.mubr.msk.f32.mxu0 %vm322_vm1, %v7495_v34  ;;  %v3188_v34 = vld [vmem:[%s7210_s26 + $0x35] sm:$0xff] }
  0xfc   : > { %6019 = vmatmul.mubr.msk.f32.gmra.mrb[6].mxu1 %vm322_vm1, %v7690_v16 }
  0xfd   : > { %6270 = vmatmul.mubr.msk.f32.gmra.mrb[24].mxu0 %vm322_vm1, %v7505_v36  ;;  %6021 = vmatprep.mubr.msk.f32.mxu1 %vm322_vm1, %v7695_v17  ;;  %v3189_v36 = vld [vmem:[%s7210_s26 + $0x3d] sm:$0xff] }
  0xfe   : > { %6272 = vmatprep.mubr.msk.f32.mxu0 %vm322_vm1, %v7509_v38  ;;  %v3190_v38 = vld [vmem:[%s7210_s26 + $0x45] sm:$0xff] }
 0x100   : > { %6022 = vmatmul.mubr.msk.f32.gmra.mrb[8].mxu1 %vm322_vm1, %v7704_v18 }
 0x101   : > { %6273 = vmatmul.mubr.msk.f32.gmra.mrb[26].mxu0 %vm322_vm1, %v7519_v40  ;;  %6024 = vmatprep.mubr.msk.f32.mxu1 %vm322_vm1, %v7709_v19  ;;  %v3191_v40 = vld [vmem:[%s7210_s26 + $0x4d] sm:$0xff] }
 0x102   : > { %6275 = vmatprep.mubr.msk.f32.mxu0 %vm322_vm1, %v7523_v42  ;;  %v3192_v42 = vld [vmem:[%s7210_s26 + $0x55] sm:$0xff] }
 0x104   : > { %6025 = vmatmul.mubr.msk.f32.gmra.mrb[10].mxu1 %vm322_vm1, %v7718_v20 }
 0x105   : > { %6276 = vmatmul.mubr.msk.f32.gmra.mrb[28].mxu0 %vm322_vm1, %v7533_v44  ;;  %6027 = vmatprep.mubr.msk.f32.mxu1 %vm322_vm1, %v7723_v21  ;;  %v3193_v44 = vld [vmem:[%s7210_s26 + $0x5d] sm:$0xff] }
 0x106   : > { %6278 = vmatprep.mubr.msk.f32.mxu0 %vm322_vm1, %v7537_v46  ;;  %v3194_v46 = vld [vmem:[%s7210_s26 + $0x65] sm:$0xff] }
 0x108   : > { %6028 = vmatmul.mubr.msk.f32.gmra.mrb[12].mxu1 %vm322_vm1, %v7732_v22 }
 0x109   : > { %6279 = vmatmul.mubr.msk.f32.gmra.mrb[30].mxu0 %vm322_vm1, %v7547_v51  ;;  %6030 = vmatprep.mubr.msk.f32.mxu1 %vm322_vm1, %v7737_v23  ;;  %v3195_v51 = vld [vmem:[%s7210_s26 + $0x6d] sm:$0xff] }
 0x10a   : > { %6281 = vmatprep.mubr.msk.f32.mxu0 %vm322_vm1, %v7551_v55  ;;  %v3196_v55 = vld [vmem:[%s7210_s26 + $0x75] sm:$0xff] }
 0x10c   : > { %6031 = vmatmul.mubr.msk.f32.gmra.mrb[14].mxu1 %vm322_vm1, %v7746_v24 }
 0x10d   : > { %6282 = vmatmul.mubr.msk.f32.gmra.mrb[32].mxu0 %vm322_vm1, %v7561_v59  ;;  %6033 = vmatprep.mubr.msk.f32.mxu1 %vm322_vm1, %v7751_v25  ;;  %v3197_v59 = vld [vmem:[%s7210_s26 + $0x7d] sm:$0xff] }
 0x10e   : > { %6284 = vmatprep.mubr.msk.f32.mxu0 %vm322_vm1, %v2790_v26  ;;  %v3623_v26 = vld [vmem:[%s7210_s26 + $0x5e] sm:$0xff] }
 0x110   : > { %6034 = vmatmul.mubr.msk.f32.gmra.mrb[16].mxu1 %vm322_vm1, %v7761_v27 }
 0x111   : > { %6285 = vmatmul.mubr.msk.f32.gmra.mrb[34].mxu0 %vm322_vm1, %v2791_v28  ;;  %6036 = vmatprep.mubr.msk.f32.mxu1 %vm322_vm1, %v7766_v29  ;;  %v3625_v28 = vld [vmem:[%s7210_s26 + $0x6e] sm:$0xff] }
 0x112   : > { %6289 = vmatprep.mubr.msk.f32.mxu0 %vm322_vm1, %v3186_v30  ;;  %v3627_v30 = vld [vmem:[%s7210_s26 + $0x7e] sm:$0xff] }
 0x114   : > { %6037 = vmatmul.mubr.msk.f32.gmra.mrb[18].mxu1 %vm322_vm1, %v7775_v31 }
 0x115   : > { %6290 = vmatmul.mubr.msk.f32.vlgmr.msra.gmra.mrb[0].mxu0 %vm322_vm1, %v3187_v32  ;;  %6039 = vmatprep.mubr.msk.f32.mxu1 %vm322_vm1, %v7780_v33  ;;  %v3629_v32 = vld [vmem:[%s7210_s26 + $0x8e] sm:$0xff] }
 0x116   : > { %6344 = vmatpush3.msk.msra.mxu0 %vm431_vm0, %v7573_v4  ;;  %6292 = vmatprep.mubr.msk.f32.mxu0 %vm322_vm1, %v3188_v34  ;;  %v3199_v4 = vld [vmem:[%s7210_s26 + $0x8d] sm:$0xff]  ;;  %v3631_v34 = vld [vmem:[%s7210_s26 + $0x9e] sm:$0xff] }
 0x118   : > { %6040 = vmatmul.mubr.msk.f32.gmra.mrb[20].mxu1 %vm322_vm1, %v7789_v35 }
 0x119   : > { %6293 = vmatmul.mubr.msk.f32.gmra.mrb[2].mxu0 %vm322_vm1, %v3189_v36  ;;  %6042 = vmatprep.mubr.msk.f32.mxu1 %vm322_vm1, %v7796_v37  ;;  %v3632_v36 = vld [vmem:[%s7210_s26 + $0xa6] sm:$0xff] }
 0x11a   : > { %6295 = vmatprep.mubr.msk.f32.mxu0 %vm322_vm1, %v3190_v38  ;;  %v3633_v38 = vld [vmem:[%s7210_s26 + $0xae] sm:$0xff] }
 0x11c   : > { %6043 = vmatmul.mubr.msk.f32.gmra.mrb[22].mxu1 %vm322_vm1, %v7805_v39 }
 0x11d   : > { %6296 = vmatmul.mubr.msk.f32.gmra.mrb[4].mxu0 %vm322_vm1, %v3191_v40  ;;  %6045 = vmatprep.mubr.msk.f32.mxu1 %vm322_vm1, %v7810_v41  ;;  %v3634_v40 = vld [vmem:[%s7210_s26 + $0xb6] sm:$0xff] }
 0x11e   : > { %6298 = vmatprep.mubr.msk.f32.mxu0 %vm322_vm1, %v3192_v42  ;;  %v3635_v42 = vld [vmem:[%s7210_s26 + $0xbe] sm:$0xff] }
 0x120   : > { %6046 = vmatmul.mubr.msk.f32.gmra.mrb[24].mxu1 %vm322_vm1, %v7819_v43 }
 0x121   : > { %6299 = vmatmul.mubr.msk.f32.gmra.mrb[6].mxu0 %vm322_vm1, %v3193_v44  ;;  %6048 = vmatprep.mubr.msk.f32.mxu1 %vm322_vm1, %v7824_v45  ;;  %v3636_v44 = vld [vmem:[%s7210_s26 + $0xc6] sm:$0xff] }
 0x122   : > { %6301 = vmatprep.mubr.msk.f32.mxu0 %vm322_vm1, %v3194_v46  ;;  %v3637_v46 = vld [vmem:[%s7210_s26 + $0xce] sm:$0xff] }
 0x124   : > { %6049 = vmatmul.mubr.msk.f32.gmra.mrb[26].mxu1 %vm322_vm1, %v7833_v49 }
 0x125   : > { %6302 = vmatmul.mubr.msk.f32.gmra.mrb[8].mxu0 %vm322_vm1, %v3195_v51  ;;  %6051 = vmatprep.mubr.msk.f32.mxu1 %vm322_vm1, %v7838_v53  ;;  %v3638_v51 = vld [vmem:[%s7210_s26 + $0xd6] sm:$0xff] }
 0x126   : > { %6304 = vmatprep.mubr.msk.f32.mxu0 %vm322_vm1, %v3196_v55  ;;  %v3639_v55 = vld [vmem:[%s7210_s26 + $0xde] sm:$0xff] }
 0x128   : > { %6052 = vmatmul.mubr.msk.f32.gmra.mrb[28].mxu1 %vm322_vm1, %v7847_v57 }
 0x129   : > { %6305 = vmatmul.mubr.msk.f32.gmra.mrb[10].mxu0 %vm322_vm1, %v3197_v59  ;;  %6054 = vmatprep.mubr.msk.f32.mxu1 %vm322_vm1, %v7852_v61  ;;  %v3640_v59 = vld [vmem:[%s7210_s26 + $0xe6] sm:$0xff] }
 0x12a   : > { %6307 = vmatprep.mubr.msk.f32.mxu0 %vm322_vm1, %v3198_v63  ;;  %v3641_v63 = vld [vmem:[%s7210_s26 + $0xee] sm:$0xff] }
 0x12c   : > { %6055 = vmatmul.mubr.msk.f32.gmra.mrb[30].mxu1 %vm322_vm1, %v7861_v2 }
 0x12d   : > { %6308 = vmatmul.mubr.msk.f32.gmra.mrb[12].mxu0 %vm322_vm1, %v3199_v4  ;;  %6057 = vmatprep.mubr.msk.f32.mxu1 %vm322_vm1, %v7866_v6  ;;  %v3642_v4 = vld [vmem:[%s7210_s26 + $0xf6] sm:$0xff] }
 0x12e   : > { %6310 = vmatprep.mubr.msk.f32.mxu0 %vm322_vm1, %v3200_v47  ;;  %v3643_v47 = vld [vmem:[%s7210_s26 + $0xfe] sm:$0xff] }
 0x130   : > { %6058 = vmatmul.mubr.msk.f32.gmra.mrb[32].mxu1 %vm322_vm1, %v7875_v50 }
 0x131   : > { %6311 = vmatmul.mubr.msk.f32.gmra.mrb[14].mxu0 %vm322_vm1, %v3201_v48  ;;  %6060 = vmatprep.mubr.msk.f32.mxu1 %vm322_vm1, %v7880_v52  ;;  %v3644_v48 = vld [vmem:[%s7210_s26 + $0x106] sm:$0xff] }
 0x132   : > { %6313 = vmatprep.mubr.msk.f32.mxu0 %vm322_vm1, %v3202_v54  ;;  %v3645_v54 = vld [vmem:[%s7210_s26 + $0x10e] sm:$0xff] }
 0x134   : > { %6061 = vmatmul.mubr.msk.f32.gmra.mrb[34].mxu1 %vm322_vm1, %v7889_v56 }
 0x135   : > { %6314 = vmatmul.mubr.msk.f32.gmra.mrb[16].mxu0 %vm322_vm1, %v3203_v58  ;;  %6065 = vmatprep.mubr.msk.f32.mxu1 %vm322_vm1, %v7650_v11  ;;  %v3214_v11 = vld [vmem:[%s7210_s26 + $0x105] sm:$0xff]  ;;  %v3646_v58 = vld [vmem:[%s7210_s26 + $0x116] sm:$0xff] }
 0x136   : > { %6316 = vmatprep.mubr.msk.f32.mxu0 %vm322_vm1, %v3204_v60  ;;  %v1927_v60 = vld [vmem:[%s7210_s26 + $0x10b] sm:$0xff] }
 0x138   : > { %6066 = vmatmul.mubr.msk.f32.vlgmr.msra.gmra.mrb[0].mxu1 %vm322_vm1, %v7658_v12  ;;  %v3215_v12 = vld [vmem:[%s7210_s26 + $0x10d] sm:$0xff] }
 0x139   : > { %6317 = vmatmul.mubr.msk.f32.gmra.mrb[18].mxu0 %vm322_vm1, %v3205_v62  ;;  %6400 = vmatpush3.msk.msra.mxu1 %vm431_vm0, %v7220_v1  ;;  %v3209_v1 = vld [vmem:[%s7210_s26 + $0xdd] sm:$0xff] }
 0x13a   : > { %6068 = vmatprep.mubr.msk.f32.mxu1 %vm322_vm1, %v7665_v13  ;;  %6319 = vmatprep.mubr.msk.f32.mxu0 %vm322_vm1, %v3206_v0  ;;  %v3216_v13 = vld [vmem:[%s7210_s26 + $0x115] sm:$0xff]  ;;  %v3647_v62 = vld [vmem:[%s7210_s26 + $0x11e] sm:$0xff] }
 0x13b   : > { %v1928_v0 = vld [vmem:[%s7210_s26 + $0x113] sm:$0xff] }
 0x13c   : > { %6069 = vmatmul.mubr.msk.f32.gmra.mrb[2].mxu1 %vm322_vm1, %v7676_v14  ;;  %v3217_v14 = vld [vmem:[%s7210_s26 + $0x11d] sm:$0xff] }
 0x13d   : > { %6320 = vmatmul.mubr.msk.f32.gmra.mrb[20].mxu0 %vm322_vm1, %v3207_v3  ;;  %6071 = vmatprep.mubr.msk.f32.mxu1 %vm322_vm1, %v7681_v15  ;;  %v3218_v15 = vld [vmem:[%s7210_s26 + $0x125] sm:$0xff] }
 0x13e   : > { %6322 = vmatprep.mubr.msk.f32.mxu0 %vm322_vm1, %v3208_v5  ;;  %v3648_v3 = vld [vmem:[%s7210_s26 + $0x126] sm:$0xff]  ;;  %v1929_v5 = vld [vmem:[%s7210_s26 + $0x11b] sm:$0xff] }
 0x140   : > { %6072 = vmatmul.mubr.msk.f32.gmra.mrb[4].mxu1 %vm322_vm1, %v7690_v16  ;;  %v3219_v16 = vld [vmem:[%s7210_s26 + $0x12d] sm:$0xff] }
 0x141   : > { %6323 = vmatmul.mubr.msk.f32.gmra.mrb[22].mxu0 %vm322_vm1, %v3209_v1  ;;  %6074 = vmatprep.mubr.msk.f32.mxu1 %vm322_vm1, %v7695_v17  ;;  %v3220_v17 = vld [vmem:[%s7210_s26 + $0x135] sm:$0xff] }
 0x142   : > { %6325 = vmatprep.mubr.msk.f32.mxu0 %vm322_vm1, %v3210_v7  ;;  %v3649_v1 = vld [vmem:[%s7210_s26 + $0x12e] sm:$0xff]  ;;  %v1930_v7 = vld [vmem:[%s7210_s26 + $0x123] sm:$0xff] }
 0x144   : > { %6075 = vmatmul.mubr.msk.f32.gmra.mrb[6].mxu1 %vm322_vm1, %v7704_v18  ;;  %v3221_v18 = vld [vmem:[%s7210_s26 + $0x13d] sm:$0xff] }
 0x145   : > { %6326 = vmatmul.mubr.msk.f32.gmra.mrb[24].mxu0 %vm322_vm1, %v3211_v8  ;;  %6077 = vmatprep.mubr.msk.f32.mxu1 %vm322_vm1, %v7709_v19  ;;  %v3616_v19 = vld [vmem:[%s7210_s26 + $0x26] sm:$0xff]  ;;  %v3650_v8 = vld [vmem:[%s7210_s26 + $0x136] sm:$0xff] }
 0x146   : > { %6328 = vmatprep.mubr.msk.f32.mxu0 %vm322_vm1, %v3212_v9  ;;  %v1931_v9 = vld [vmem:[%s7210_s26 + $0x12b] sm:$0xff] }
 0x148   : > { %6078 = vmatmul.mubr.msk.f32.gmra.mrb[8].mxu1 %vm322_vm1, %v7718_v20  ;;  %v3617_v20 = vld [vmem:[%s7210_s26 + $0x2e] sm:$0xff] }
 0x149   : > { %6329 = vmatmul.mubr.msk.f32.gmra.mrb[26].mxu0 %vm322_vm1, %v3213_v10  ;;  %6080 = vmatprep.mubr.msk.f32.mxu1 %vm322_vm1, %v7723_v21  ;;  %v3618_v21 = vld [vmem:[%s7210_s26 + $0x36] sm:$0xff]  ;;  %v3651_v10 = vld [vmem:[%s7210_s26 + $0x13e] sm:$0xff] }
 0x14a   : > { %6331 = vmatprep.mubr.msk.f32.mxu0 %vm322_vm1, %v3214_v11  ;;  %v4083_v11 = vlaneseq }
 0x14c   : > { %6081 = vmatmul.mubr.msk.f32.gmra.mrb[10].mxu1 %vm322_vm1, %v7732_v22  ;;  %v3619_v22 = vld [vmem:[%s7210_s26 + $0x3e] sm:$0xff] }
 0x14d   : > { %6332 = vmatmul.mubr.msk.f32.gmra.mrb[28].mxu0 %vm322_vm1, %v3215_v12  ;;  %6083 = vmatprep.mubr.msk.f32.mxu1 %vm322_vm1, %v7737_v23  ;;  %v3620_v23 = vld [vmem:[%s7210_s26 + $0x46] sm:$0xff]  ;;  %v8114_v12 = vshrl.u32 %v4083_v11, 7 }
 0x14e   : > { %6334 = vmatprep.mubr.msk.f32.mxu0 %vm322_vm1, %v3216_v13 }
 0x14f   : > { %v4085_v13 = vadd.s32 8, %v8114_v12 }
 0x150   : > { %6084 = vmatmul.mubr.msk.f32.gmra.mrb[12].mxu1 %vm322_vm1, %v7746_v24  ;;  %v3621_v24 = vld [vmem:[%s7210_s26 + $0x4e] sm:$0xff] }
 0x151   : > { %6335 = vmatmul.mubr.msk.f32.gmra.mrb[30].mxu0 %vm322_vm1, %v3217_v14  ;;  %6086 = vmatprep.mubr.msk.f32.mxu1 %vm322_vm1, %v7751_v25  ;;  %v3622_v25 = vld [vmem:[%s7210_s26 + $0x56] sm:$0xff] }
 0x152   : > { %6337 = vmatprep.mubr.msk.f32.mxu0 %vm322_vm1, %v3218_v15  ;;  %v8117_v14 = vmul.u32.u64.low 3817748708, %v4085_v13  ;;  %v8118_v15 = vmul.u32.u64.high 3817748708, %v4085_v13, %v8117_v14 }
 0x153   : > { %v8234_v14 = vadd.s32 120, %v8114_v12 }
 0x154   : > { %6087 = vmatmul.mubr.msk.f32.gmra.mrb[14].mxu1 %vm322_vm1, %v7761_v27  ;;  %v3624_v27 = vld [vmem:[%s7210_s26 + $0x66] sm:$0xff] }
 0x155   : > { %6338 = vmatmul.mubr.msk.f32.gmra.mrb[32].mxu0 %vm322_vm1, %v3219_v16  ;;  %6089 = vmatprep.mubr.msk.f32.mxu1 %vm322_vm1, %v7766_v29  ;;  %v3626_v29 = vld [vmem:[%s7210_s26 + $0x76] sm:$0xff] }
 0x156   : > { %6340 = vmatprep.mubr.msk.f32.mxu0 %vm322_vm1, %v3220_v17  ;;  %v8121_v16 = vmul.u32.u64.low 3817748708, %v8114_v12  ;;  %v8122_v17 = vmul.u32.u64.high 3817748708, %v8114_v12, %v8121_v16 }
 0x158   : > { %6090 = vmatmul.mubr.msk.f32.gmra.mrb[16].mxu1 %vm322_vm1, %v7775_v31  ;;  %v3628_v31 = vld [vmem:[%s7210_s26 + $0x86] sm:$0xff] }
 0x159   : > { %6341 = vmatmul.mubr.msk.f32.gmra.mrb[34].mxu0 %vm322_vm1, %v3221_v18  ;;  %6092 = vmatprep.mubr.msk.f32.mxu1 %vm322_vm1, %v7780_v33  ;;  %v3630_v33 = vld [vmem:[%s7210_s26 + $0x96] sm:$0xff]  ;;  %v4087_v18 = vadd.s32 24, %v8114_v12 }
 0x15a   : > { %6345 = vmatprep.mubr.msk.f32.mxu0 %vm322_vm1, %v3616_v19  ;;  %v4137_v19 = vshrl.u32 %v8118_v15, 4 }
 0x15c   : > { %6093 = vmatmul.mubr.msk.f32.gmra.mrb[18].mxu1 %vm322_vm1, %v7789_v35  ;;  %v1500_v35 = vld [vmem:[%s7210_s26 + $0x122] sm:$0xff] }
 0x15d   : > { %6346 = vmatmul.mubr.msk.f32.vlgmr.msra.gmra.mrb[0].mxu0 %vm322_vm1, %v3617_v20  ;;  %6095 = vmatprep.mubr.msk.f32.mxu1 %vm322_vm1, %v7796_v37  ;;  %v1501_v37 = vld [vmem:[%s7210_s26 + $0x12a] sm:$0xff]  ;;  %v4126_v20 = vshrl.u32 %v8122_v17, 4 }
 0x15e   : > { %6348 = vmatprep.mubr.msk.f32.mxu0 %vm322_vm1, %v3618_v21  ;;  %v4086_v21 = vadd.s32 16, %v8114_v12 }
 0x160   : > { %6096 = vmatmul.mubr.msk.f32.gmra.mrb[20].mxu1 %vm322_vm1, %v7805_v39  ;;  %v1914_v39 = vld [vmem:[%s7210_s26 + $0xa3] sm:$0xff] }
 0x161   : > { %6349 = vmatmul.mubr.msk.f32.gmra.mrb[2].mxu0 %vm322_vm1, %v3619_v22  ;;  %6098 = vmatprep.mubr.msk.f32.mxu1 %vm322_vm1, %v7810_v41  ;;  %v1915_v41 = vld [vmem:[%s7210_s26 + $0xab] sm:$0xff] }
 0x162   : > { %6351 = vmatprep.mubr.msk.f32.mxu0 %vm322_vm1, %v3620_v23  ;;  %v8128_v22 = vmul.u32.u64.low 3817748708, %v4087_v18  ;;  %v8129_v23 = vmul.u32.u64.high 3817748708, %v4087_v18, %v8128_v22 }
 0x164   : > { %6099 = vmatmul.mubr.msk.f32.gmra.mrb[22].mxu1 %vm322_vm1, %v7819_v43  ;;  %v1916_v43 = vld [vmem:[%s7210_s26 + $0xb3] sm:$0xff] }
 0x165   : > { %6352 = vmatmul.mubr.msk.f32.gmra.mrb[4].mxu0 %vm322_vm1, %v3621_v24  ;;  %6101 = vmatprep.mubr.msk.f32.mxu1 %vm322_vm1, %v7824_v45  ;;  %v1917_v45 = vld [vmem:[%s7210_s26 + $0xbb] sm:$0xff]  ;;  %v4089_v24 = vadd.s32 40, %v8114_v12 }
 0x166   : > { %6354 = vmatprep.mubr.msk.f32.mxu0 %vm322_vm1, %v3622_v25  ;;  %v4138_v25 = vmul.u32 18, %v4137_v19 }
 0x168   : > { %6102 = vmatmul.mubr.msk.f32.gmra.mrb[24].mxu1 %vm322_vm1, %v7833_v49  ;;  %v1918_v49 = vld [vmem:[%s7210_s26 + $0xc3] sm:$0xff] }
 0x169   : > { %6355 = vmatmul.mubr.msk.f32.gmra.mrb[6].mxu0 %vm322_vm1, %v3623_v26  ;;  %6104 = vmatprep.mubr.msk.f32.mxu1 %vm322_vm1, %v7838_v53  ;;  %v1919_v53 = vld [vmem:[%s7210_s26 + $0xcb] sm:$0xff]  ;;  %v4127_v26 = vmul.u32 18, %v4126_v20 }
 0x16a   : > { %6357 = vmatprep.mubr.msk.f32.mxu0 %vm322_vm1, %v3624_v27 }
 0x16c   : > { %6105 = vmatmul.mubr.msk.f32.gmra.mrb[26].mxu1 %vm322_vm1, %v7847_v57  ;;  %v1920_v57 = vld [vmem:[%s7210_s26 + $0xd3] sm:$0xff] }
 0x16d   : > { %6358 = vmatmul.mubr.msk.f32.gmra.mrb[8].mxu0 %vm322_vm1, %v3625_v28  ;;  %6107 = vmatprep.mubr.msk.f32.mxu1 %vm322_vm1, %v7852_v61  ;;  %v1921_v61 = vld [vmem:[%s7210_s26 + $0xdb] sm:$0xff]  ;;  %v8132_v27 = vmul.u32.u64.low 3817748708, %v4086_v21  ;;  %v8133_v28 = vmul.u32.u64.high 3817748708, %v4086_v21, %v8132_v27 }
 0x16e   : > { %6360 = vmatprep.mubr.msk.f32.mxu0 %vm322_vm1, %v3626_v29  ;;  %v4088_v29 = vadd.s32 32, %v8114_v12 }
 0x170   : > { %6108 = vmatmul.mubr.msk.f32.gmra.mrb[28].mxu1 %vm322_vm1, %v7861_v2  ;;  %v1922_v2 = vld [vmem:[%s7210_s26 + $0xe3] sm:$0xff] }
 0x171   : > { %6361 = vmatmul.mubr.msk.f32.gmra.mrb[10].mxu0 %vm322_vm1, %v3627_v30  ;;  %6110 = vmatprep.mubr.msk.f32.mxu1 %vm322_vm1, %v7866_v6  ;;  %v1923_v6 = vld [vmem:[%s7210_s26 + $0xeb] sm:$0xff]  ;;  %v8137_v30 = vadd.s32 56, %v8114_v12 }
 0x172   : > { %6363 = vmatprep.mubr.msk.f32.mxu0 %vm322_vm1, %v3628_v31 }
 0x174   : > { %6111 = vmatmul.mubr.msk.f32.gmra.mrb[30].mxu1 %vm322_vm1, %v7875_v50  ;;  %v1924_v50 = vld [vmem:[%s7210_s26 + $0xf3] sm:$0xff] }
 0x175   : > { %6364 = vmatmul.mubr.msk.f32.gmra.mrb[12].mxu0 %vm322_vm1, %v3629_v32  ;;  %6113 = vmatprep.mubr.msk.f32.mxu1 %vm322_vm1, %v7880_v52  ;;  %v1925_v52 = vld [vmem:[%s7210_s26 + $0xfb] sm:$0xff]  ;;  %v8139_v31 = vmul.u32.u64.low 3817748708, %v4089_v24  ;;  %v8140_v32 = vmul.u32.u64.high 3817748708, %v4089_v24, %v8139_v31 }
 0x176   : > { %6366 = vmatprep.mubr.msk.f32.mxu0 %vm322_vm1, %v3630_v33  ;;  %v8143_v33 = vadd.s32 48, %v8114_v12  ;;  %v8269_v31 = vadd.s32 112, %v8114_v12 }
 0x178   : > { %6114 = vmatmul.mubr.msk.f32.gmra.mrb[32].mxu1 %vm322_vm1, %v7889_v56  ;;  %v1926_v56 = vld [vmem:[%s7210_s26 + $0x103] sm:$0xff] }
 0x179   : > { %6367 = vmatmul.mubr.msk.f32.gmra.mrb[14].mxu0 %vm322_vm1, %v3631_v34  ;;  %6116 = vmatprep.mubr.msk.f32.mxu1 %vm322_vm1, %v1500_v35  ;;  %v8145_v34 = vsub.s32 %v4085_v13, %v4138_v25  ;;  %v8148_v35 = vsub.s32 %v8114_v12, %v4127_v26 }
 0x17a   : > { %6369 = vmatprep.mubr.msk.f32.mxu0 %vm322_vm1, %v3632_v36  ;;  %v8151_v36 = vadd.s32 72, %v8114_v12 }
 0x17b   : > { %vm4517_vm2 = vcmp.ne.s32.totalorder %v8145_v34, 0  ;;  %vm4553_vm3 = vcmp.lt.s32.totalorder %v8145_v34, 0  ;;  %vm4516_vm4 = vcmp.ne.s32.totalorder %v8148_v35, 0  ;;  %vm4552_vm5 = vcmp.lt.s32.totalorder %v8148_v35, 0 }
 0x17c   : > { %6117 = vmatmul.mubr.msk.f32.gmra.mrb[34].mxu1 %vm322_vm1, %v1501_v37  ;;  %vm8184_vm6 = vmand %vm4553_vm3, %vm4517_vm2 }
 0x17d   : > { %6370 = vmatmul.mubr.msk.f32.gmra.mrb[16].mxu0 %vm322_vm1, %v3633_v38  ;;  %6148 = vmatprep.mubr.msk.f32.mxu1 %vm322_vm1, %v1914_v39  ;;  %v8153_v37 = vmul.u32.u64.low 3817748708, %v4088_v29  ;;  %v8154_v38 = vmul.u32.u64.high 3817748708, %v4088_v29, %v8153_v37  ;;  %vm8192_vm7 = vmand %vm4552_vm5, %vm4516_vm4 }
 0x17e   : > { %6372 = vmatprep.mubr.msk.f32.mxu0 %vm322_vm1, %v3634_v40  ;;  %v8157_v39 = vmul.u32.u64.low 3817748708, %v8137_v30  ;;  %v8158_v40 = vmul.u32.u64.high 3817748708, %v8137_v30, %v8157_v39 }
 0x180   : > { %6149 = vmatmul.mubr.msk.f32.vlgmr.msra.gmra.mrb[18].mxu1 %vm322_vm1, %v1915_v41  ;;  %v8161_v41 = vadd.s32 64, %v8114_v12 }
 0x181   : > { %6373 = vmatmul.mubr.msk.f32.gmra.mrb[18].mxu0 %vm322_vm1, %v3635_v42  ;;  %6151 = vmatprep.mubr.msk.f32.mxu1 %vm322_vm1, %v1916_v43  ;;  %v4159_v42 = vshrl.u32 %v8129_v23, 4 }
 0x182   : > { %6375 = vmatprep.mubr.msk.f32.mxu0 %vm322_vm1, %v3636_v44  ;;  %v8165_v43 = vmul.u32.u64.low 3817748708, %v8143_v33  ;;  %v8166_v44 = vmul.u32.u64.high 3817748708, %v8143_v33, %v8165_v43 }
 0x184   : > { %6152 = vmatmul.mubr.msk.f32.gmra.mrb[20].mxu1 %vm322_vm1, %v1917_v45 }
 0x185   : > { %6376 = vmatmul.mubr.msk.f32.gmra.mrb[20].mxu0 %vm322_vm1, %v3637_v46  ;;  %6154 = vmatprep.mubr.msk.f32.mxu1 %vm322_vm1, %v1918_v49  ;;  %v8171_v45 = vmul.u32.u64.low 3817748708, %v8151_v36  ;;  %v8172_v46 = vmul.u32.u64.high 3817748708, %v8151_v36, %v8171_v45  ;;  %v4148_v49 = vshrl.u32 %v8133_v28, 4 }
 0x186   : > { %6378 = vmatprep.mubr.msk.f32.mxu0 %vm322_vm1, %v3638_v51  ;;  %v8178_v51 = vadd.s32 18, %v8145_v34 }
 0x188   : > { %6155 = vmatmul.mubr.msk.f32.gmra.mrb[22].mxu1 %vm322_vm1, %v1919_v53 }
 0x189   : > { %6379 = vmatmul.mubr.msk.f32.gmra.mrb[22].mxu0 %vm322_vm1, %v3639_v55  ;;  %6157 = vmatprep.mubr.msk.f32.mxu1 %vm322_vm1, %v1920_v57  ;;  %v8181_v53 = vmul.u32.u64.low 3817748708, %v8161_v41  ;;  %v8182_v55 = vmul.u32.u64.high 3817748708, %v8161_v41, %v8181_v53  ;;  %v10013_v57 = vmov 0 }
 0x18a   : > { %6381 = vmatprep.mubr.msk.f32.mxu0 %vm322_vm1, %v3640_v59  ;;  %v8189_v59 = vadd.s32 18, %v8148_v35 }
 0x18c   : > { %6158 = vmatmul.mubr.msk.f32.gmra.mrb[24].mxu1 %vm322_vm1, %v1921_v61  ;;  %v4160_v61 = vmul.u32 18, %v4159_v42  ;;  %v8310_v42 = vmul.u32.u64.low 3817748708, %v8269_v31  ;;  %v8311_v43 = vmul.u32.u64.high 3817748708, %v8269_v31, %v8310_v42 }
 0x18d   : > { %6382 = vmatmul.mubr.msk.f32.gmra.mrb[24].mxu0 %vm322_vm1, %v3641_v63  ;;  %6160 = vmatprep.mubr.msk.f32.mxu1 %vm322_vm1, %v1922_v2  ;;  %v4181_v63 = vshrl.u32 %v8140_v32, 4 }
 0x18e   : > { %6384 = vmatprep.mubr.msk.f32.mxu0 %vm322_vm1, %v3642_v4  ;;  %v8197_v4 = vadd.s32 88, %v8114_v12 }
 0x190   : > { %6161 = vmatmul.mubr.msk.f32.gmra.mrb[26].mxu1 %vm322_vm1, %v1923_v6  ;;  %v4149_v6 = vmul.u32 18, %v4148_v49  ;;  %v9902_v49 = vmov 0 }
 0x191   : > { %6385 = vmatmul.mubr.msk.f32.gmra.mrb[26].mxu0 %vm322_vm1, %v3643_v47  ;;  %6163 = vmatprep.mubr.msk.f32.mxu1 %vm322_vm1, %v1924_v50  ;;  %v4170_v47 = vshrl.u32 %v8154_v38, 4  ;;  %v4203_v50 = vshrl.u32 %v8158_v40, 4 }
 0x192   : > { %6387 = vmatprep.mubr.msk.f32.mxu0 %vm322_vm1, %v3644_v48 }
 0x194   : > { %6164 = vmatmul.mubr.msk.f32.gmra.mrb[28].mxu1 %vm322_vm1, %v1925_v52  ;;  %v8206_v52 = vadd.s32 80, %v8114_v12 }
 0x195   : > { %6388 = vmatmul.mubr.msk.f32.gmra.mrb[28].mxu0 %vm322_vm1, %v3645_v54  ;;  %6166 = vmatprep.mubr.msk.f32.mxu1 %vm322_vm1, %v1926_v56  ;;  %v8212_v56 = vsub.s32 %v4087_v18, %v4160_v61 }
 0x196   : > { %6390 = vmatprep.mubr.msk.f32.mxu0 %vm322_vm1, %v3646_v58  ;;  %v4182_v58 = vmul.u32 18, %v4181_v63  ;;  %v8230_v11 = vmul.u32.u64.low 3817748708, %v8206_v52  ;;  %v8231_v13 = vmul.u32.u64.high 3817748708, %v8206_v52, %v8230_v11 }
 0x197   : > { %vm4519_vm8 = vcmp.ne.s32.totalorder %v8212_v56, 0  ;;  %vm4555_vm9 = vcmp.lt.s32.totalorder %v8212_v56, 0  ;;  %v8239_v15 = vadd.s32 18, %v8212_v56 }
 0x198   : > { %6167 = vmatmul.mubr.msk.f32.gmra.mrb[30].mxu1 %vm322_vm1, %v1927_v60  ;;  %v4192_v60 = vshrl.u32 %v8166_v44, 4  ;;  %v8241_v17 = vsub.s32 %v4089_v24, %v4182_v58  ;;  %v8258_v24 = vmul.u32.u64.low 3817748708, %v8234_v14  ;;  %v8259_v27 = vmul.u32.u64.high 3817748708, %v8234_v14, %v8258_v24  ;;  %vm8289_vm0 = vmand %vm4555_vm9, %vm4519_vm8 }
 0x199   : > { %6391 = vmatmul.mubr.msk.f32.gmra.mrb[30].mxu0 %vm322_vm1, %v3647_v62  ;;  %6169 = vmatprep.mubr.msk.f32.mxu1 %vm322_vm1, %v1928_v0  ;;  %v4225_v62 = vshrl.u32 %v8172_v46, 4  ;;  %v4236_v39 = vshrl.u32 %v8231_v13, 4  ;;  %v8324_v46 = vadd.s32 128, %v8114_v12  ;;  %v9910_v58 = vmov 0 }
 0x19a   : > { %6393 = vmatprep.mubr.msk.f32.mxu0 %vm322_vm1, %v3648_v3  ;;  %v8217_v0 = vmul.u32.u64.low 3817748708, %v8197_v4  ;;  %v8218_v3 = vmul.u32.u64.high 3817748708, %v8197_v4, %v8217_v0  ;;  %v4193_v16 = vmul.u32 18, %v4192_v60  ;;  %9890 = vst [vmem:[#allocation15_spill] sm:$0xff] %v8241_v17  ;;  %vm4521_vm12 = vcmp.ne.s32.totalorder %v8241_v17, 0 }
 0x19b   : > { %v4226_v18 = vmul.u32 18, %v4225_v62  ;;  %vm4557_vm13 = vcmp.lt.s32.totalorder %v8241_v17, 0  ;;  %v8278_v37 = vadd.s32 18, %v8241_v17  ;;  %v4237_v0 = vmul.u32 18, %v4236_v39 }
 0x19c   : > { %6170 = vmatmul.mubr.msk.f32.gmra.mrb[32].mxu1 %vm322_vm1, %v1929_v5  ;;  %v8221_v5 = vadd.s32 104, %v8114_v12  ;;  %v4247_v32 = vshrl.u32 %v8218_v3, 4  ;;  %vm8317_vm8 = vmand %vm4557_vm13, %vm4521_vm12  ;;  %v9915_v3 = vmov 0  ;;  %v8407_v24 = vadd.s32 144, %v8114_v12 }
 0x19d   : > { %6394 = vmatmul.mubr.msk.f32.gmra.mrb[32].mxu0 %vm322_vm1, %v3649_v1  ;;  %6172 = vmatprep.mubr.msk.f32.mxu1 %vm322_vm1, %v1930_v7  ;;  %v8223_v1 = vsub.s32 %v4086_v21, %v4149_v6  ;;  %v4171_v7 = vmul.u32 18, %v4170_v47  ;;  %v9906_v6 = vmov 0  ;;  %v4291_v47 = vshrl.u32 %v8259_v27, 4 }
 0x19e   : > { %6396 = vmatprep.mubr.msk.f32.mxu0 %vm322_vm1, %v3650_v8  ;;  %v4204_v8 = vmul.u32 18, %v4203_v50  ;;  %v8244_v19 = vmul.u32.u64.low 3817748708, %v8221_v5  ;;  %v8245_v20 = vmul.u32.u64.high 3817748708, %v8221_v5, %v8244_v19  ;;  %v4280_v39 = vshrl.u32 %v8311_v43, 4 }
 0x19f   : > { %vm4518_vm10 = vcmp.ne.s32.totalorder %v8223_v1, 0  ;;  %v8248_v21 = vsub.s32 %v4088_v29, %v4171_v7  ;;  %vm4554_vm11 = vcmp.lt.s32.totalorder %v8223_v1, 0  ;;  %v8263_v28 = vadd.s32 18, %v8223_v1 }
 0x1a0   : > { %6173 = vmatmul.mubr.msk.f32.gmra.mrb[34].mxu1 %vm322_vm1, %v1931_v9  ;;  %v8226_v9 = vadd.s32 96, %v8114_v12  ;;  %v8255_v25 = vsub.s32 %v8137_v30, %v4204_v8  ;;  %v8266_v29 = vsub.s32 %v8143_v33, %v4193_v16  ;;  %v8274_v30 = vsub.s32 %v8151_v36, %v4226_v18  ;;  %vm8303_vm3 = vmand %vm4554_vm11, %vm4518_vm10 }
 0x1a1   : > { %6397 = vmatmul.mubr.msk.f32.gmra.mrb[34].mxu0 %vm322_vm1, %v3651_v10  ;;  %v4214_v10 = vshrl.u32 %v8182_v55, 4  ;;  %9891 = vst [vmem:[#allocation16_spill] sm:$0xff] %v8248_v21  ;;  %vm4520_vm14 = vcmp.ne.s32.totalorder %v8248_v21, 0  ;;  %vm4556_vm15 = vcmp.lt.s32.totalorder %v8248_v21, 0  ;;  %v8283_v33 = vadd.s32 136, %v8114_v12 }
 0x1a2   : > { %v8251_v22 = vmul.u32.u64.low 3817748708, %v8226_v9  ;;  %v8252_v23 = vmul.u32.u64.high 3817748708, %v8226_v9, %v8251_v22  ;;  %9892 = vst [vmem:[#allocation17_spill] sm:$0xff] %v8255_v25  ;;  %9893 = vst [vmem:[#allocation18_spill] sm:$0xff] %v8266_v29  ;;  %vm4523_vm1 = vcmp.ne.s32.totalorder %v8255_v25, 0  ;;  %vm4559_vm2 = vcmp.lt.s32.totalorder %v8255_v25, 0 }
 0x1a3   : > { %v4215_v26 = vmul.u32 18, %v4214_v10  ;;  %9894 = vst [vmem:[#allocation19_spill] sm:$0xff] %v8274_v30  ;;  %vm4522_vm4 = vcmp.ne.s32.totalorder %v8266_v29, 0  ;;  %vm4558_vm5 = vcmp.lt.s32.totalorder %v8266_v29, 0  ;;  %vm4525_vm9 = vcmp.ne.s32.totalorder %v8274_v30, 0  ;;  %vm8330_vm10 = vmand %vm4556_vm15, %vm4520_vm14 }
 0x1a4   : > { %v4248_v44 = vmul.u32 18, %v4247_v32  ;;  %v4269_v45 = vshrl.u32 %v8245_v20, 4  ;;  %v9903_v49 = vsel %vm8330_vm10, 4294967295, %v9902_v49  ;;  %vm4561_vm11 = vcmp.lt.s32.totalorder %v8274_v30, 0  ;;  %vm8347_vm12 = vmand %vm4559_vm2, %vm4523_vm1 }
 0x1a5   : > { %v8296_v36 = vsub.s32 %v8161_v41, %v4215_v26  ;;  %v9900_v41 = vmov 0  ;;  %9904 = vst [vmem:[#allocation21_spill] sm:$0xff] %v9903_v49  ;;  %v4258_v53 = vshrl.u32 %v8252_v23, 4  ;;  %v8341_v63 = vadd.s32 18, %v8248_v21  ;;  %vm8361_vm15 = vmand %vm4558_vm5, %vm4522_vm4 }
 0x1a6   : > { %v9901_v41 = vsel %vm8317_vm8, 4294967295, %v9900_v41  ;;  %v8337_v55 = vmul.u32.u64.low 3817748708, %v8283_v33  ;;  %v8338_v61 = vmul.u32.u64.high 3817748708, %v8283_v33, %v8337_v55  ;;  %v9907_v6 = vsel %vm8347_vm12, 4294967295, %v9906_v6  ;;  %vm8373_vm1 = vmand %vm4561_vm11, %vm4525_vm9 }
 0x1a7   : > { %9897 = vst [vmem:[#allocation20_spill] sm:$0xff] %v8296_v36  ;;  %9905 = vst [vmem:[#allocation22_spill] sm:$0xff] %v8341_v63  ;;  %vm4524_vm13 = vcmp.ne.s32.totalorder %v8296_v36, 0  ;;  %vm4560_vm14 = vcmp.lt.s32.totalorder %v8296_v36, 0  ;;  %v8355_v50 = vadd.s32 18, %v8255_v25  ;;  %v9911_v58 = vsel %vm8361_vm15, 4294967295, %v9910_v58 }
 0x1a8   : > { %9908 = vst [vmem:[#allocation23_spill] sm:$0xff] %v9907_v6  ;;  %9912 = vst [vmem:[#allocation25_spill] sm:$0xff] %v9911_v58  ;;  %v8366_v60 = vadd.s32 18, %v8266_v29  ;;  %v8369_v62 = vadd.s32 18, %v8274_v30  ;;  %v9916_v3 = vsel %vm8373_vm1, 4294967295, %v9915_v3  ;;  %v8378_v7 = vadd.s32 18, %v8296_v36 }
 0x1a9   : > { %9909 = vst [vmem:[#allocation24_spill] sm:$0xff] %v8355_v50  ;;  %9917 = vst [vmem:[#allocation28_spill] sm:$0xff] %v9916_v3  ;;  %v4270_v8 = vmul.u32 18, %v4269_v45  ;;  %v8381_v10 = vmul.u32.u64.low 3817748708, %v8324_v46  ;;  %v8382_v11 = vmul.u32.u64.high 3817748708, %v8324_v46, %v8381_v10  ;;  %v9919_v16 = vmov 0 }
 0x1aa   : > { %9913 = vst [vmem:[#allocation26_spill] sm:$0xff] %v8366_v60  ;;  %9914 = vst [vmem:[#allocation27_spill] sm:$0xff] %v8369_v62  ;;  %v8393_v18 = vsub.s32 %v8197_v4, %v4248_v44  ;;  %v4259_v19 = vmul.u32 18, %v4258_v53  ;;  %v8396_v20 = vadd.s32 152, %v8114_v12  ;;  %v4292_v26 = vmul.u32 18, %v4291_v47 }
 0x1ab   : > { %9918 = vst [vmem:[#allocation29_spill] sm:$0xff] %v8378_v7  ;;  %vm8388_vm2 = vmand %vm4560_vm14, %vm4524_vm13  ;;  %v8418_v32 = vsub.s32 %v8206_v52, %v4237_v0  ;;  %v8434_v52 = vsub.s32 %v8221_v5, %v4270_v8  ;;  %v4313_v53 = vshrl.u32 %v8338_v61, 4  ;;  %v8459_v61 = vadd.s32 168, %v8114_v12 }
 0x1ac   : > { %v9920_v16 = vsel %vm8388_vm2, 4294967295, %v9919_v16  ;;  %9922 = vst [vmem:[#allocation31_spill] sm:$0xff] %v8393_v18  ;;  %vm4527_vm4 = vcmp.ne.s32.totalorder %v8393_v18, 0  ;;  %vm4563_vm5 = vcmp.lt.s32.totalorder %v8393_v18, 0  ;;  %v8439_v43 = vsub.s32 %v8226_v9, %v4259_v19 }
 0x1ad   : > { %9921 = vst [vmem:[#allocation30_spill] sm:$0xff] %v9920_v16  ;;  %9923 = vst [vmem:[#allocation32_spill] sm:$0xff] %v8434_v52  ;;  %v8443_v55 = vmul.u32.u64.low 3817748708, %v8396_v20  ;;  %v8444_v47 = vmul.u32.u64.high 3817748708, %v8396_v20, %v8443_v55  ;;  %v8447_v0 = vadd.s32 18, %v8393_v18  ;;  %v8450_v10 = vsub.s32 %v8234_v14, %v4292_v26 }
 0x1ae   : > { %v8453_v5 = vmul.u32.u64.low 3817748708, %v8407_v24  ;;  %v8454_v8 = vmul.u32.u64.high 3817748708, %v8407_v24, %v8453_v5  ;;  %v4281_v9 = vmul.u32 18, %v4280_v39  ;;  %v8462_v19 = vadd.s32 18, %v8418_v32  ;;  %vm8535_vm14 = vmand %vm4563_vm5, %vm4527_vm4 }
 0x1af   : > { %9924 = vst [vmem:[#allocation33_spill] sm:$0xff] %v8450_v10  ;;  %v4302_v14 = vshrl.u32 %v8382_v11, 4  ;;  %v8468_v26 = vadd.s32 18, %v8434_v52  ;;  %v4314_v55 = vmul.u32 18, %v4313_v53  ;;  %v8472_v39 = vadd.s32 160, %v8114_v12 }
 0x1b0   : > { %v8478_v45 = vadd.s32 18, %v8439_v43  ;;  %v8482_v11 = vadd.s32 184, %v8114_v12  ;;  %v8487_v42 = vsub.s32 %v8269_v31, %v4281_v9  ;;  %v8494_v4 = vadd.s32 176, %v8114_v12 }
 0x1b1   : > { %9925 = vst [vmem:[#allocation34_spill] sm:$0xff] %v8468_v26  ;;  %v8490_v53 = vmul.u32.u64.low 3817748708, %v8459_v61  ;;  %v8491_v27 = vmul.u32.u64.high 3817748708, %v8459_v61, %v8490_v53  ;;  %v8498_v23 = vadd.s32 18, %v8450_v10  ;;  %v4303_v22 = vmul.u32 18, %v4302_v14 }
 0x1b2   : > { %9928 = vst [vmem:[#allocation37_spill] sm:$0xff] %v8487_v42  ;;  %v8501_v13 = vadd.s32 200, %v8114_v12  ;;  %v8504_v54 = vsub.s32 %v8283_v33, %v4314_v55  ;;  %v4335_v31 = vshrl.u32 %v8444_v47, 4  ;;  %v4324_v36 = vshrl.u32 %v8454_v8, 4 }
 0x1b3   : > { %v8508_v9 = vmul.u32.u64.low 3817748708, %v8472_v39  ;;  %v8509_v53 = vmul.u32.u64.high 3817748708, %v8472_v39, %v8508_v9  ;;  %v8515_v7 = vmul.u32.u64.low 3817748708, %v8482_v11  ;;  %v8516_v16 = vmul.u32.u64.high 3817748708, %v8482_v11, %v8515_v7 }
 0x1b4   : > { %9929 = vst [vmem:[#allocation38_spill] sm:$0xff] %v8504_v54  ;;  %v8519_v14 = vadd.s32 192, %v8114_v12  ;;  %v8525_v33 = vmul.u32.u64.low 3817748708, %v8494_v4  ;;  %v8526_v47 = vmul.u32.u64.high 3817748708, %v8494_v4, %v8525_v33  ;;  %v8529_v55 = vadd.s32 216, %v8114_v12 }
 0x1b5   : > { %v9932_v7 = vmov 0  ;;  %v8540_v8 = vsub.s32 %v8324_v46, %v4303_v22  ;;  %v8543_v9 = vmul.u32.u64.low 3817748708, %v8501_v13  ;;  %v8544_v62 = vmul.u32.u64.high 3817748708, %v8501_v13, %v8543_v9 }
 0x1b6   : > { %v9933_v7 = vsel %vm8535_vm14, 4294967295, %v9932_v7  ;;  %v8547_v33 = vadd.s32 208, %v8114_v12  ;;  %vm9935_vm11 = vcmp.ne.s32.totalorder %v8418_v32, 0  ;;  %vm9936_vm9 = vcmp.lt.s32.totalorder %v8418_v32, 0 }
 0x1b7   : > { %9934 = vst [vmem:[#allocation41_spill] sm:$0xff] %v8540_v8  ;;  %vm8553_vm13 = vmand %vm9936_vm9, %vm9935_vm11  ;;  %v9937_v3 = vmov 0  ;;  %v8559_v46 = vadd.s32 18, %v8487_v42  ;;  %v8563_v22 = vadd.s32 232, %v8114_v12  ;;  %vm9941_vm2 = vcmp.ne.s32.totalorder %v8434_v52, 0 }
 0x1b8   : > { %v9938_v3 = vsel %vm8553_vm13, 4294967295, %v9937_v3  ;;  %vm9942_vm1 = vcmp.lt.s32.totalorder %v8434_v52, 0  ;;  %v4336_v29 = vmul.u32 18, %v4335_v31  ;;  %vm9946_vm5 = vcmp.ne.s32.totalorder %v8439_v43, 0 }
 0x1b9   : > { %9939 = vst [vmem:[#allocation42_spill] sm:$0xff] %v8559_v46  ;;  %vm8571_vm9 = vmand %vm9942_vm1, %vm9941_vm2  ;;  %v8577_v60 = vmul.u32.u64.low 3817748708, %v8519_v14  ;;  %v8578_v58 = vmul.u32.u64.high 3817748708, %v8519_v14, %v8577_v60  ;;  %vm9947_vm4 = vcmp.lt.s32.totalorder %v8439_v43, 0  ;;  %v8591_v25 = vadd.s32 18, %v8504_v54 }
 0x1ba   : > { %vm8586_vm15 = vmand %vm9947_vm4, %vm9946_vm5  ;;  %v4357_v50 = vshrl.u32 %v8491_v27, 4  ;;  %v8595_v31 = vmul.u32.u64.low 3817748708, %v8529_v55  ;;  %v8596_v6 = vmul.u32.u64.high 3817748708, %v8529_v55, %v8595_v31  ;;  %vm9951_vm1 = vcmp.ne.s32.totalorder %v8450_v10, 0 }
 0x1bb   : > { %9950 = vst [vmem:[#allocation45_spill] sm:$0xff] %v8591_v25  ;;  %vm9952_vm2 = vcmp.lt.s32.totalorder %v8450_v10, 0  ;;  %v9953_v60 = vmov 0  ;;  %vm4532_vm4 = vcmp.ne.s32.totalorder %v8540_v8, 0  ;;  %vm4568_vm5 = vcmp.lt.s32.totalorder %v8540_v8, 0 }
 0x1bc   : > { %vm8602_vm11 = vmand %vm9952_vm2, %vm9951_vm1  ;;  %vm9956_vm12 = vcmp.ne.s32.totalorder %v8487_v42, 0  ;;  %vm9957_vm10 = vcmp.lt.s32.totalorder %v8487_v42, 0  ;;  %v9958_v27 = vmov 0  ;;  %v4325_v31 = vmul.u32 18, %v4324_v36 }
 0x1bd   : > { %v9954_v60 = vsel %vm8602_vm11, 4294967295, %v9953_v60  ;;  %vm8616_vm8 = vmand %vm9957_vm10, %vm9956_vm12  ;;  %v4346_v21 = vshrl.u32 %v8509_v53, 4  ;;  %v8622_v63 = vmul.u32.u64.low 3817748708, %v8563_v22  ;;  %v8623_v49 = vmul.u32.u64.high 3817748708, %v8563_v22, %v8622_v63 }
 0x1be   : > { %9955 = vst [vmem:[#allocation46_spill] sm:$0xff] %v9954_v60  ;;  %v9959_v27 = vsel %vm8616_vm8, 4294967295, %v9958_v27  ;;  %vm9962_vm1 = vcmp.ne.s32.totalorder %v8504_v54, 0  ;;  %vm9963_vm10 = vcmp.lt.s32.totalorder %v8504_v54, 0  ;;  %v9964_v17 = vmov 0  ;;  %vm8660_vm2 = vmand %vm4568_vm5, %vm4532_vm4 }
 0x1bf   : > { %9960 = vst [vmem:[#allocation47_spill] sm:$0xff] %v9959_v27  ;;  %vm8635_vm12 = vmand %vm9963_vm10, %vm9962_vm1  ;;  %v8640_v36 = vadd.s32 18, %v8540_v8  ;;  %v8643_v63 = vsub.s32 %v8396_v20, %v4336_v29  ;;  %v4379_v53 = vshrl.u32 %v8516_v16, 4  ;;  %v9969_v29 = vmov 0 }
 0x1c0   : > { %v9965_v17 = vsel %vm8635_vm12, 4294967295, %v9964_v17  ;;  %v9970_v29 = vsel %vm8660_vm2, 4294967295, %v9969_v29  ;;  %v4358_v16 = vmul.u32 18, %v4357_v50  ;;  %v4368_v20 = vshrl.u32 %v8526_v47, 4 }
 0x1c1   : > { %9966 = vst [vmem:[#allocation49_spill] sm:$0xff] %v9965_v17  ;;  %9967 = vst [vmem:[#allocation50_spill] sm:$0xff] %v8640_v36  ;;  %v4401_v52 = vshrl.u32 %v8544_v62, 4  ;;  %v8675_v26 = vadd.s32 224, %v8114_v12  ;;  %v4347_v60 = vmul.u32 18, %v4346_v21  ;;  %v4380_v27 = vmul.u32 18, %v4379_v53 }
 0x1c2   : > { %9968 = vst [vmem:[#allocation51_spill] sm:$0xff] %v8643_v63  ;;  %9971 = vst [vmem:[#allocation52_spill] sm:$0xff] %v9970_v29  ;;  %v4390_v50 = vshrl.u32 %v8578_v58, 4  ;;  %v8699_v47 = vsub.s32 %v8459_v61, %v4358_v16  ;;  %v4423_v21 = vshrl.u32 %v8596_v6, 4  ;;  %v8712_v58 = vadd.s32 18, %v8643_v63 }
 0x1c3   : > { %v4402_v54 = vmul.u32 18, %v4401_v52  ;;  %v8707_v62 = vmul.u32.u64.low 3817748708, %v8675_v26  ;;  %v8708_v8 = vmul.u32.u64.high 3817748708, %v8675_v26, %v8707_v62  ;;  %v8715_v61 = vsub.s32 %v8472_v39, %v4347_v60 }
 0x1c4   : > { %9973 = vst [vmem:[#allocation54_spill] sm:$0xff] %v8712_v58  ;;  %v4445_v6 = vshrl.u32 %v8623_v49, 4  ;;  %v4391_v52 = vmul.u32 18, %v4390_v50  ;;  %v8725_v16 = vadd.s32 240, %v8114_v12  ;;  %v4424_v39 = vmul.u32 18, %v4423_v21 }
 0x1c5   : > { %vm9978_vm2 = vcmp.ne.s32.totalorder %v8643_v63, 0  ;;  %vm9979_vm10 = vcmp.lt.s32.totalorder %v8643_v63, 0  ;;  %vm9989_vm11 = vcmp.ne.s32.totalorder %v8699_v47, 0  ;;  %vm9994_vm1 = vcmp.ne.s32.totalorder %v8715_v61, 0  ;;  %v10098_v63 = vld [vmem:[#allocation27_spill] sm:$0xff] }
 0x1c6   : > { %v4446_v50 = vmul.u32 18, %v4445_v6  ;;  %vm8752_vm12 = vmand %vm9979_vm10, %vm9978_vm2  ;;  %vm9995_vm10 = vcmp.lt.s32.totalorder %v8715_v61, 0  ;;  %v10002_v25 = vmov 0  ;;  %v10010_v17 = vmov 0 }
 0x1c7   : > { %vm8798_vm2 = vmand %vm9995_vm10, %vm9994_vm1  ;;  %v10029_v46 = vmov 0 }
 0x20b   : > { %v8474_v5 = vpop.f32.mrb[0].mxu1 }
 0x20c   : > { %9926 = vst [vmem:[#allocation35_spill] sm:$0xff] %v8474_v5  ;;  %v8484_v44 = vpop.f32.mrb[1].mxu1 }
 0x20d   : > { %9927 = vst [vmem:[#allocation36_spill] sm:$0xff] %v8484_v44 }
 0x20f   : > { %v8511_v48 = vpop.f32.mrb[2].mxu1 }
 0x210   : > { %9930 = vst [vmem:[#allocation39_spill] sm:$0xff] %v8511_v48  ;;  %v8521_v30 = vpop.f32.mrb[3].mxu1 }
 0x211   : > { %9931 = vst [vmem:[#allocation40_spill] sm:$0xff] %v8521_v30  ;;  %v9943_v30 = vmov 0 }
 0x212   : > { %v9944_v30 = vsel %vm8571_vm9, 4294967295, %v9943_v30 }
 0x213   : > { %v8565_v9 = vpop.f32.mrb[4].mxu1 }
 0x214   : > { %9940 = vst [vmem:[#allocation43_spill] sm:$0xff] %v8565_v9  ;;  %v8580_v48 = vpop.f32.mrb[5].mxu1  ;;  %v9948_v9 = vmov 0 }
 0x215   : > { %9945 = vst [vmem:[#allocation44_spill] sm:$0xff] %v8580_v48  ;;  %v9949_v9 = vsel %vm8586_vm15, 4294967295, %v9948_v9  ;;  %v8609_v48 = vmul.u32.u64.low 3817748708, %v8547_v33  ;;  %v8610_v44 = vmul.u32.u64.high 3817748708, %v8547_v33, %v8609_v48  ;;  %vm9990_vm15 = vcmp.lt.s32.totalorder %v8699_v47, 0 }
 0x216   : > { %v8686_v48 = vsub.s32 %v8407_v24, %v4325_v31  ;;  %v4369_v24 = vmul.u32 18, %v4368_v20  ;;  %v8703_v31 = vadd.s32 248, %v8114_v12  ;;  %vm8784_vm9 = vmand %vm9990_vm15, %vm9989_vm11 }
 0x217   : > { %v8625_v5 = vpop.f32.mrb[6].mxu1  ;;  %v4412_v29 = vshrl.u32 %v8610_v44, 4  ;;  %v8722_v44 = vsub.s32 %v8482_v11, %v4380_v27  ;;  %v8739_v11 = vsub.s32 %v8501_v13, %v4402_v54  ;;  %v8758_v54 = vsub.s32 %v8519_v14, %v4391_v52 }
 0x218   : > { %9961 = vst [vmem:[#allocation48_spill] sm:$0xff] %v8625_v5  ;;  %v8646_v5 = vpop.f32.mrb[7].mxu1  ;;  %9972 = vst [vmem:[#allocation53_spill] sm:$0xff] %v8686_v48  ;;  %v8730_v62 = vsub.s32 %v8494_v4, %v4369_v24  ;;  %v8733_v60 = vmul.u32.u64.low 3817748708, %v8703_v31  ;;  %v8734_v49 = vmul.u32.u64.high 3817748708, %v8703_v31, %v8733_v60  ;;  %v8744_v4 = vadd.s32 264, %v8114_v12 }
 0x219   : > { %9976 = vst [vmem:[#allocation57_spill] sm:$0xff] %v8739_v11  ;;  %v4413_v27 = vmul.u32 18, %v4412_v29  ;;  %9982 = vst [vmem:[#allocation59_spill] sm:$0xff] %v8758_v54  ;;  %v8761_v13 = vmul.u32.u64.low 3817748708, %v8725_v16  ;;  %v8762_v29 = vmul.u32.u64.high 3817748708, %v8725_v16, %v8761_v13  ;;  %vm9984_vm4 = vcmp.ne.s32.totalorder %v8686_v48, 0 }
 0x21a   : > { %vm9985_vm5 = vcmp.lt.s32.totalorder %v8686_v48, 0  ;;  %v8778_v14 = vsub.s32 %v8529_v55, %v4424_v39  ;;  %v9996_v55 = vmov 0  ;;  %v8804_v39 = vsub.s32 %v8563_v22, %v4446_v50  ;;  %v10072_v50 = vld [vmem:[#allocation23_spill] sm:$0xff] }
 0x21b   : > { %v8688_v18 = vpop.f32.mrb[8].mxu1  ;;  %vm8770_vm8 = vmand %vm9985_vm5, %vm9984_vm4  ;;  %v8791_v13 = vsub.s32 %v8547_v33, %v4413_v27  ;;  %v9997_v55 = vsel %vm8798_vm2, 4294967295, %v9996_v55  ;;  %v8816_v27 = vadd.s32 18, %v8699_v47  ;;  %vm10000_vm11 = vcmp.ne.s32.totalorder %v8722_v44, 0 }
 0x21c   : > { %v8696_v42 = vpop.f32.mrb[9].mxu1  ;;  %9988 = vst [vmem:[#allocation61_spill] sm:$0xff] %v8778_v14  ;;  %9998 = vst [vmem:[#allocation63_spill] sm:$0xff] %v8804_v39  ;;  %vm10001_vm1 = vcmp.lt.s32.totalorder %v8722_v44, 0  ;;  %v8879_v2 = vadd.s32 18, %v8739_v11  ;;  %vm10020_vm14 = vcmp.ne.s32.totalorder %v8758_v54, 0 }
 0x21d   : > { %9993 = vst [vmem:[#allocation62_spill] sm:$0xff] %v8791_v13  ;;  %vm8822_vm10 = vmand %vm10001_vm1, %vm10000_vm11  ;;  %vm10008_vm11 = vcmp.ne.s32.totalorder %v8730_v62, 0  ;;  %vm10009_vm1 = vcmp.lt.s32.totalorder %v8730_v62, 0  ;;  %v8937_v38 = vadd.s32 18, %v8791_v13 }
 0x21e   : > { %v10003_v25 = vsel %vm8822_vm10, 4294967295, %v10002_v25  ;;  %vm8846_vm5 = vmand %vm10009_vm1, %vm10008_vm11  ;;  %vm10015_vm11 = vcmp.ne.s32.totalorder %v8739_v11, 0  ;;  %vm10016_vm1 = vcmp.lt.s32.totalorder %v8739_v11, 0  ;;  %10019 = vst [vmem:[#allocation66_spill] sm:$0xff] %v8879_v2  ;;  %v10120_v2 = vld [vmem:[#allocation31_spill] sm:$0xff] }
 0x21f   : > { %v8718_v53 = vpop.f32.mrb[10].mxu1  ;;  %v10011_v17 = vsel %vm8846_vm5, 4294967295, %v10010_v17  ;;  %vm8869_vm4 = vmand %vm10016_vm1, %vm10015_vm11  ;;  %10042 = vst [vmem:[#allocation74_spill] sm:$0xff] %v8937_v38 }
 0x220   : > { %9974 = vst [vmem:[#allocation55_spill] sm:$0xff] %v8718_v53  ;;  %v8727_v20 = vpop.f32.mrb[11].mxu1  ;;  %v8909_v53 = vadd.s32 18, %v8778_v14 }
 0x221   : > { %9975 = vst [vmem:[#allocation56_spill] sm:$0xff] %v8727_v20  ;;  %v8898_v20 = vadd.s32 18, %v8758_v54 }
 0x222   : > { %10032 = vst [vmem:[#allocation71_spill] sm:$0xff] %v8909_v53  ;;  %v10061_v53 = vld [vmem:[#allocation22_spill] sm:$0xff] }
 0x223   : > { %v8746_v24 = vpop.f32.mrb[12].mxu1  ;;  %10026 = vst [vmem:[#allocation69_spill] sm:$0xff] %v8898_v20  ;;  %v10092_v20 = vld [vmem:[#allocation40_spill] sm:$0xff] }
 0x224   : > { %9977 = vst [vmem:[#allocation58_spill] sm:$0xff] %v8746_v24  ;;  %v8764_v6 = vpop.f32.mrb[13].mxu1  ;;  %v8807_v36 = vmul.u32.u64.low 3817748708, %v8744_v4  ;;  %v8808_v24 = vmul.u32.u64.high 3817748708, %v8744_v4, %v8807_v36 }
 0x225   : > { %9983 = vst [vmem:[#allocation60_spill] sm:$0xff] %v8764_v6  ;;  %v4434_v6 = vshrl.u32 %v8708_v8, 4  ;;  %v8813_v8 = vadd.s32 18, %v8686_v48  ;;  %v10005_v36 = vsel %vm8184_vm6, %v8178_v51, %v8145_v34  ;;  %v4467_v34 = vshrl.u32 %v8734_v49, 4 }
 0x226   : > { %vm8835_vm13 = vcmp.lt.s32.totalorder %v10005_v36, 16  ;;  %v10012_v51 = vsel %vm8192_vm7, %v8189_v59, %v8148_v35  ;;  %v8863_v36 = vadd.s32 18, %v8722_v44  ;;  %v8876_v59 = vadd.s32 18, %v8730_v62 }
 0x227   : > { %v8810_v33 = vpop.f32.mrb[14].mxu1  ;;  %vm8858_vm6 = vcmp.lt.s32.totalorder %v10012_v51, 16  ;;  %v4435_v35 = vmul.u32 18, %v4434_v6  ;;  %v10022_v49 = vmov 0  ;;  %vm10027_vm7 = vcmp.ne.s32.totalorder %v8778_v14, 0 }
 0x228   : > { %9999 = vst [vmem:[#allocation64_spill] sm:$0xff] %v8810_v33  ;;  %v8828_v22 = vpop.f32.mrb[15].mxu1  ;;  %v8840_v33 = vadd.s32 18, %v8715_v61  ;;  %v10014_v57 = vsel %vm8858_vm6, 4294967295, %v10013_v57  ;;  %vm10021_vm6 = vcmp.lt.s32.totalorder %v8758_v54, 0  ;;  %v10034_v6 = vsel %vm8289_vm0, %v8239_v15, %v8212_v56 }
 0x229   : > { %10004 = vst [vmem:[#allocation65_spill] sm:$0xff] %v8828_v22  ;;  %v10017_v22 = vmov 0  ;;  %vm8885_vm11 = vmand %vm10021_vm6, %vm10020_vm14  ;;  %vm10028_vm14 = vcmp.lt.s32.totalorder %v8778_v14, 0  ;;  %vm8920_vm15 = vcmp.lt.s32.totalorder %v10034_v6, 16  ;;  %v8940_v56 = vadd.s32 18, %v8804_v39  ;;  %v10059_v14 = vld [vmem:[#allocation21_spill] sm:$0xff] }
 0x22a   : > { %v10018_v22 = vsel %vm8869_vm4, 4294967295, %v10017_v22  ;;  %v10023_v49 = vsel %vm8885_vm11, 4294967295, %v10022_v49  ;;  %vm8904_vm6 = vmand %vm10028_vm14, %vm10027_vm7  ;;  %vm10037_vm7 = vcmp.ne.s32.totalorder %v8791_v13, 0  ;;  %vm10038_vm14 = vcmp.lt.s32.totalorder %v8791_v13, 0 }
 0x22b   : > { %10024 = vst [vmem:[#allocation67_spill] sm:$0xff] %v10023_v49  ;;  %v8891_v51 = vpop.f32.mrb[16].mxu1  ;;  %v10030_v46 = vsel %vm8904_vm6, 4294967295, %v10029_v46  ;;  %vm8932_vm1 = vmand %vm10038_vm14, %vm10037_vm7  ;;  %v4468_v15 = vmul.u32 18, %v4467_v34  ;;  %v10044_v6 = vsel %vm8303_vm3, %v8263_v28, %v8223_v1  ;;  %vm10047_vm3 = vcmp.ne.s32.totalorder %v8804_v39, 0 }
 0x22c   : > { %10025 = vst [vmem:[#allocation68_spill] sm:$0xff] %v8891_v51  ;;  %10031 = vst [vmem:[#allocation70_spill] sm:$0xff] %v10030_v46  ;;  %v4456_v51 = vshrl.u32 %v8762_v29, 4  ;;  %v8912_v10 = vpop.f32.mrb[17].mxu1  ;;  %v10039_v29 = vmov 0  ;;  %vm8947_vm0 = vcmp.lt.s32.totalorder %v10044_v6, 16  ;;  %v8972_v28 = vsub.s32 %v8675_v26, %v4435_v35 }
 0x22d   : > { %10033 = vst [vmem:[#allocation72_spill] sm:$0xff] %v8912_v10  ;;  %v10040_v29 = vsel %vm8932_vm1, 4294967295, %v10039_v29  ;;  %10043 = vst [vmem:[#allocation75_spill] sm:$0xff] %v8940_v56  ;;  %vm10048_vm7 = vcmp.lt.s32.totalorder %v8804_v39, 0  ;;  %v10049_v1 = vmov 0  ;;  %v4489_v40 = vshrl.u32 %v8808_v24, 4 }
 0x22e   : > { %10041 = vst [vmem:[#allocation73_spill] sm:$0xff] %v10040_v29  ;;  %vm8967_vm14 = vmand %vm10048_vm7, %vm10047_vm3  ;;  %v8984_v48 = vadd.s32 256, %v8114_v12  ;;  %v4457_v34 = vmul.u32 18, %v4456_v51  ;;  %v8995_v10 = vadd.s32 280, %v8114_v12  ;;  %vm10053_vm3 = vnez %v9901_v41  ;;  %v10054_v24 = vld [vmem:[#allocation15_spill] sm:$0xff]  ;;  %v10062_v46 = vld [vmem:[#allocation16_spill] sm:$0xff] }
 0x22f   : > { %v10050_v1 = vsel %vm8967_vm14, 4294967295, %v10049_v1  ;;  %10052 = vst [vmem:[#allocation77_spill] sm:$0xff] %v8972_v28  ;;  %v10055_v11 = vsel %vm10053_vm3, %v8278_v37, %v10054_v24  ;;  %v9015_v26 = vsub.s32 %v8703_v31, %v4468_v15  ;;  %v9018_v41 = vadd.s32 272, %v8114_v12  ;;  %v10058_v37 = vld [vmem:[#allocation35_spill] sm:$0xff]  ;;  %v10067_v12 = vld [vmem:[#allocation36_spill] sm:$0xff]  ;;  %v10087_v56 = vld [vmem:[#allocation18_spill] sm:$0xff] }
 0x230   : > { %10051 = vst [vmem:[#allocation76_spill] sm:$0xff] %v10050_v1  ;;  %v6347_v6 = vpop.f32.mrb[0].mxu0  ;;  %vm9002_vm7 = vcmp.lt.s32.totalorder %v10055_v11, 16  ;;  %vm10060_vm3 = vnez %v10059_v14  ;;  %v9033_v31 = vadd.s32 18, %v8972_v28  ;;  %vm10071_vm11 = vnez %v10014_v57 }
 0x231   : > { %v6401_v11 = vadd.f32 %v6347_v6, %v10058_v37  ;;  %v3831_v24 = vpop.f32.mrb[1].mxu0  ;;  %v10063_v29 = vsel %vm10060_vm3, %v10061_v53, %v10062_v46  ;;  %v4490_v6 = vmul.u32 18, %v4489_v40  ;;  %vm10068_vm3 = vcmask 64512  }
 0x232   : > { %vm9026_vm1 = vcmp.lt.s32.totalorder %v10063_v29, 16  ;;  %10066 = vst [vmem:[#allocation15_spill] sm:$0xff] %v9033_v31  ;;  %v6402_v15 = vadd.f32 %v3831_v24, %v10067_v12  ;;  %v9037_v37 = vmul.u32.u64.low 3817748708, %v8984_v48  ;;  %v9038_v14 = vmul.u32.u64.high 3817748708, %v8984_v48, %v9037_v37  ;;  %vm10069_vm6 = vmmov %vm10068_vm3 }
 0x233   : > { %4048 = vst.msk [vmem:[%s9043_s23 + $0x8] sm:$0xff] %vm10068_vm3, %v6401_v11  ;;  %v4805_v46 = vsel %vm8835_vm13, %v6401_v11, 0.0  ;;  %v9050_v53 = vsub.s32 %v8725_v16, %v4457_v34  ;;  %v9053_v29 = vmul.u32.u64.low 3817748708, %v8995_v10  ;;  %v9054_v40 = vmul.u32.u64.high 3817748708, %v8995_v10, %v9053_v29  ;;  %vm10070_vm14 = vmmov %vm10068_vm3  ;;  %v10074_v11 = vld [vmem:[#allocation24_spill] sm:$0xff]  ;;  %v10075_v16 = vld [vmem:[#allocation17_spill] sm:$0xff] }
 0x234   : > { %v4841_v24 = vsel %vm10069_vm6, %v4805_v46, 0.0  ;;  %v4920_v12 = vmul.f32 %v4805_v46, %v4805_v46  ;;  %4047 = vst.msk [vmem:[%s9043_s23] sm:$0xff] %vm10070_vm14, %v6402_v15  ;;  %v4804_v37 = vsel %vm10071_vm11, %v6402_v15, 0.0  ;;  %v6350_v51 = vpop.f32.mrb[2].mxu0  ;;  %vm10073_vm13 = vnez %v10072_v50  ;;  %v10083_v29 = vld [vmem:[#allocation39_spill] sm:$0xff] }
 0x235   : > { %v10076_v34 = vsel %vm10073_vm13, %v10074_v11, %v10075_v16  ;;  %vm10079_vm4 = vcmp.ne.s32.totalorder %v8972_v28, 0  ;;  %vm10080_vm6 = vcmp.lt.s32.totalorder %v8972_v28, 0  ;;  %v10081_v46 = vmov 0  ;;  %v3841_v11 = vpop.f32.mrb[3].mxu0  ;;  %v10084_v16 = vld [vmem:[#allocation25_spill] sm:$0xff]  ;;  %v10114_v28 = vld [vmem:[#allocation44_spill] sm:$0xff] }
 0x236   : > { %vm9067_vm3 = vcmp.lt.s32.totalorder %v10076_v34, 16  ;;  %vm9075_vm5 = vmand %vm10080_vm6, %vm10079_vm4  ;;  %v4840_v57 = vsel %vm10070_vm14, %v4804_v37, 0.0  ;;  %v4919_v15 = vmul.f32 %v4804_v37, %v4804_v37  ;;  %v6403_v50 = vadd.f32 %v6350_v51, %v10083_v29  ;;  %v10086_v34 = vld [vmem:[#allocation26_spill] sm:$0xff] }
 0x237   : > { %v10082_v46 = vsel %vm9075_vm5, 4294967295, %v10081_v46  ;;  %vm10085_vm13 = vnez %v10084_v16  ;;  %vm4583_vm4 = vcmp.lt.s32.totalorder %v9015_v26, 0  ;;  %vm10091_vm6 = vmmov %vm10070_vm14  ;;  %v4842_v54 = vadd.f32 %v4841_v24, %v4840_v57  ;;  %v10096_v57 = vld [vmem:[#allocation28_spill] sm:$0xff]  ;;  %v10106_v16 = vld [vmem:[#allocation43_spill] sm:$0xff] }
 0x238   : > { %v10088_v1 = vsel %vm10085_vm13, %v10086_v34, %v10087_v56  ;;  %v4956_v38 = vsel %vm10091_vm6, %v4920_v12, 0.0  ;;  %v6404_v37 = vadd.f32 %v3841_v11, %v10092_v20  ;;  %v9095_v49 = vsub.s32 %v8744_v4, %v4490_v6  ;;  %vm10093_vm14 = vmmov %vm10091_vm6  ;;  %v6353_v6 = vpop.f32.mrb[4].mxu0 }
 0x239   : > { %vm9087_vm10 = vcmp.lt.s32.totalorder %v10088_v1, 16  ;;  %v4955_v51 = vsel %vm10093_vm14, %v4919_v15, 0.0  ;;  %vm10094_vm11 = vmmov %vm10091_vm6  ;;  %v4807_v56 = vsel %vm8920_vm15, %v6403_v50, 0.0  ;;  %v9107_v12 = vadd.s32 18, %v9015_v26  ;;  %v10099_v15 = vld [vmem:[#allocation19_spill] sm:$0xff] }
 0x23a   : > { %4050 = vst.msk [vmem:[%s9043_s23 + $0x18] sm:$0xff] %vm10094_vm11, %v6403_v50  ;;  %v4957_v24 = vadd.f32 %v4956_v38, %v4955_v51  ;;  %v4922_v20 = vmul.f32 %v4807_v56, %v4807_v56  ;;  %vm10095_vm13 = vmmov %vm10091_vm6  ;;  %v4806_v4 = vsel %vm8947_vm0, %v6404_v37, 0.0  ;;  %vm10097_vm11 = vnez %v10096_v57  ;;  %v10107_v51 = vld [vmem:[#allocation30_spill] sm:$0xff]  ;;  %v10109_v57 = vld [vmem:[#allocation29_spill] sm:$0xff] }
 0x23b   : > { %4049 = vst.msk [vmem:[%s9043_s23 + $0x10] sm:$0xff] %vm10095_vm13, %v6404_v37  ;;  %v10100_v29 = vsel %vm10097_vm11, %v10098_v63, %v10099_v15  ;;  %vm10103_vm6 = vcmp.ne.s32.totalorder %v9015_v26, 0  ;;  %v4843_v58 = vsel %vm10095_vm13, %v4806_v4, 0.0  ;;  %v4921_v11 = vmul.f32 %v4806_v4, %v4806_v4  ;;  %v3851_v37 = vpop.f32.mrb[5].mxu0  ;;  %v10110_v63 = vld [vmem:[#allocation20_spill] sm:$0xff]  ;;  %vm10115_vm0 = vmmov %vm10095_vm13 }
 0x23c   : > { %vm9118_vm15 = vcmp.lt.s32.totalorder %v10100_v29, 16  ;;  %vm9126_vm14 = vmand %vm4583_vm4, %vm10103_vm6  ;;  %v6405_v34 = vadd.f32 %v6353_v6, %v10106_v16  ;;  %vm10108_vm11 = vnez %v10107_v51  ;;  %v4844_v1 = vadd.f32 %v4843_v58, %v4842_v54 }
 0x23d   : > { %v10111_v15 = vsel %vm10108_vm11, %v10109_v57, %v10110_v63  ;;  %v6406_v31 = vadd.f32 %v3851_v37, %v10114_v28  ;;  %v9145_v4 = vadd.s32 18, %v9050_v53  ;;  %v4845_v6 = vsel %vm10095_vm13, %v4807_v56, 0.0  ;;  %vm10116_vm2 = vmmov %vm10115_vm0 }
 0x23e   : > { %vm9138_vm5 = vcmp.lt.s32.totalorder %v10111_v15, 16  ;;  %v4958_v16 = vsel %vm10115_vm0, %v4921_v11, 0.0  ;;  %4052 = vst.msk [vmem:[%s9043_s23 + $0x28] sm:$0xff] %vm10116_vm2, %v6405_v34  ;;  %v4809_v51 = vsel %vm9002_vm7, %v6405_v34, 0.0  ;;  %v4691_v54 = vsel %vm9126_vm14, %v9107_v12, %v9015_v26  ;;  %vm10117_vm11 = vmmov %vm10115_vm0  ;;  %v6356_v11 = vpop.f32.mrb[6].mxu0  ;;  %v10124_v15 = vld [vmem:[#allocation48_spill] sm:$0xff] }
 0x23f   : > { %v4960_v28 = vsel %vm10117_vm11, %v4922_v20, 0.0  ;;  %v4959_v58 = vadd.f32 %v4958_v16, %v4957_v24  ;;  %v4924_v37 = vmul.f32 %v4809_v51, %v4809_v51  ;;  %vm10118_vm4 = vmmov %vm10115_vm0  ;;  %v4808_v56 = vsel %vm9026_vm1, %v6406_v31, 0.0  ;;  %v3861_v35 = vpop.f32.mrb[7].mxu0 }
 0x240   : > { %4051 = vst.msk [vmem:[%s9043_s23 + $0x20] sm:$0xff] %vm10118_vm4, %v6406_v31  ;;  %vm10119_vm2 = vnez %v9933_v7  ;;  %v4846_v63 = vadd.f32 %v4845_v6, %v4844_v1  ;;  %v4847_v24 = vsel %vm10115_vm0, %v4808_v56, 0.0  ;;  %v4923_v20 = vmul.f32 %v4808_v56, %v4808_v56  ;;  %vm10129_vm11 = vmmov %vm10115_vm0  ;;  %v6359_v39 = vpop.f32.mrb[8].mxu0 }
 0x241   : > { %v10121_v34 = vsel %vm10119_vm2, %v8447_v0, %v10120_v2  ;;  %v6407_v16 = vadd.f32 %v6356_v11, %v10124_v15  ;;  %vm10125_vm1 = vnez %v9938_v3  ;;  %v4961_v0 = vadd.f32 %v4960_v28, %v4959_v58  ;;  %vm10130_vm2 = vmmov %vm10115_vm0  ;;  %v10138_v11 = vld [vmem:[#allocation34_spill] sm:$0xff]  ;;  %v3871_v13 = vpop.f32.mrb[9].mxu0 }
 0x242   : > { %vm9168_vm7 = vcmp.lt.s32.totalorder %v10121_v34, 16  ;;  %v10126_v7 = vsel %vm10125_vm1, %v8462_v19, %v8418_v32  ;;  %v6408_v2 = vadd.f32 %v3861_v35, %v8646_v5  ;;  %v9186_v1 = vadd.s32 18, %v9095_v49  ;;  %vm10135_vm13 = vmmov %vm10115_vm0  ;;  %v10139_v34 = vld [vmem:[#allocation32_spill] sm:$0xff] }
 0x243   : > { %vm9179_vm4 = vcmp.lt.s32.totalorder %v10126_v7, 16  ;;  %v4849_v6 = vsel %vm10129_vm11, %v4809_v51, 0.0  ;;  %v4848_v56 = vadd.f32 %v4847_v24, %v4846_v63  ;;  %v4962_v3 = vsel %vm10130_vm2, %v4923_v20, 0.0  ;;  %4054 = vst.msk [vmem:[%s9043_s23 + $0x38] sm:$0xff] %vm10115_vm0, %v6407_v16  ;;  %vm10136_vm11 = vmmov %vm10115_vm0 }
 0x244   : > { %v4811_v32 = vsel %vm9067_vm3, %v6407_v16, 0.0  ;;  %vm10131_vm1 = vcmp.ne.s32.totalorder %v9050_v53, 0  ;;  %vm10132_vm6 = vcmp.lt.s32.totalorder %v9050_v53, 0  ;;  %v4964_v5 = vsel %vm10135_vm13, %v4924_v37, 0.0  ;;  %4053 = vst.msk [vmem:[%s9043_s23 + $0x30] sm:$0xff] %vm10136_vm11, %v6408_v2  ;;  %vm10143_vm13 = vmmov %vm10115_vm0  ;;  %v6362_v50 = vpop.f32.mrb[10].mxu0 }
 0x245   : > { %vm9198_vm14 = vmand %vm10132_vm6, %vm10131_vm1  ;;  %v4963_v28 = vadd.f32 %v4962_v3, %v4961_v0  ;;  %v4926_v51 = vmul.f32 %v4811_v32, %v4811_v32  ;;  %v4810_v58 = vsel %vm9087_vm10, %v6408_v2, 0.0  ;;  %vm10137_vm3 = vnez %v9944_v30  ;;  %v3881_v29 = vpop.f32.mrb[11].mxu0 }
 0x246   : > { %v10140_v63 = vsel %vm10137_vm3, %v10138_v11, %v10139_v34  ;;  %v4850_v20 = vadd.f32 %v4849_v6, %v4848_v56  ;;  %v4851_v37 = vsel %vm10143_vm13, %v4810_v58, 0.0  ;;  %v4925_v15 = vmul.f32 %v4810_v58, %v4810_v58  ;;  %vm10148_vm1 = vmmov %vm10115_vm0 }
 0x247   : > { %vm9212_vm6 = vcmp.lt.s32.totalorder %v10140_v63, 16  ;;  %v6409_v16 = vadd.f32 %v6359_v39, %v8688_v18  ;;  %vm10144_vm10 = vnez %v9949_v9  ;;  %v4965_v7 = vadd.f32 %v4964_v5, %v4963_v28  ;;  %vm10149_vm11 = vmmov %vm10115_vm0  ;;  %v10155_v5 = vld [vmem:[#allocation46_spill] sm:$0xff]  ;;  %v10157_v28 = vld [vmem:[#allocation33_spill] sm:$0xff] }
 0x248   : > { %v10145_v30 = vsel %vm10144_vm10, %v8478_v45, %v8439_v43  ;;  %v6410_v0 = vadd.f32 %v3871_v13, %v8696_v42  ;;  %v4690_v2 = vsel %vm9198_vm14, %v9145_v4, %v9050_v53  ;;  %v4478_v18 = vshrl.u32 %v9038_v14, 4  ;;  %vm10154_vm14 = vmmov %vm10115_vm0  ;;  %v10162_v63 = vld [vmem:[#allocation55_spill] sm:$0xff] }
 0x249   : > { %vm9223_vm2 = vcmp.lt.s32.totalorder %v10145_v30, 16  ;;  %v4853_v6 = vsel %vm10115_vm0, %v4811_v32, 0.0  ;;  %v4852_v9 = vadd.f32 %v4851_v37, %v4850_v20  ;;  %v4966_v56 = vsel %vm10148_vm1, %v4925_v15, 0.0  ;;  %4056 = vst.msk [vmem:[%s9043_s23 + $0x48] sm:$0xff] %vm10149_vm11, %v6409_v16  ;;  %v10163_v37 = vld [vmem:[#allocation47_spill] sm:$0xff]  ;;  %v10165_v15 = vld [vmem:[#allocation42_spill] sm:$0xff] }
 0x24a   : > { %v4813_v45 = vsel %vm9118_vm15, %v6409_v16, 0.0  ;;  %vm10150_vm3 = vcmp.ne.s32.totalorder %v9095_v49, 0  ;;  %vm10151_vm13 = vcmp.lt.s32.totalorder %v9095_v49, 0  ;;  %v4968_v43 = vsel %vm10154_vm14, %v4926_v51, 0.0  ;;  %4055 = vst.msk [vmem:[%s9043_s23 + $0x40] sm:$0xff] %vm10115_vm0, %v6410_v0  ;;  %vm10161_vm14 = vmmov %vm10115_vm0  ;;  %v10166_v16 = vld [vmem:[#allocation37_spill] sm:$0xff] }
 0x24b   : > { %vm9243_vm10 = vmand %vm10151_vm13, %vm10150_vm3  ;;  %v4967_v14 = vadd.f32 %v4966_v56, %v4965_v7  ;;  %v4928_v3 = vmul.f32 %v4813_v45, %v4813_v45  ;;  %v4812_v32 = vsel %vm9138_vm5, %v6410_v0, 0.0  ;;  %vm10156_vm15 = vnez %v10155_v5  ;;  %v10170_v7 = vld [vmem:[#allocation56_spill] sm:$0xff] }
 0x24c   : > { %v10158_v58 = vsel %vm10156_vm15, %v8498_v23, %v10157_v28  ;;  %v4854_v11 = vadd.f32 %v4853_v6, %v4852_v9  ;;  %v4855_v51 = vsel %vm10161_vm14, %v4812_v32, 0.0  ;;  %v4927_v34 = vmul.f32 %v4812_v32, %v4812_v32  ;;  %vm10171_vm3 = vmmov %vm10115_vm0 }
 0x24d   : > { %vm9257_vm1 = vcmp.lt.s32.totalorder %v10158_v58, 16  ;;  %v6411_v20 = vadd.f32 %v6362_v50, %v10162_v63  ;;  %vm10164_vm5 = vnez %v10163_v37  ;;  %v4969_v23 = vadd.f32 %v4968_v43, %v4967_v14  ;;  %vm10172_vm13 = vmmov %vm10115_vm0 }
 0x24e   : > { %v10167_v13 = vsel %vm10164_vm5, %v10165_v15, %v10166_v16  ;;  %v6412_v0 = vadd.f32 %v3881_v29, %v10170_v7  ;;  %v4693_v6 = vsel %vm9243_vm10, %v9186_v1, %v9095_v49  ;;  %v4511_v9 = vshrl.u32 %v9054_v40, 4  ;;  %vm10173_vm15 = vmmov %vm10115_vm0  ;;  %v6365_v40 = vpop.f32.mrb[12].mxu0  ;;  %v10183_v29 = vld [vmem:[#allocation58_spill] sm:$0xff]  ;;  %v10184_v15 = vld [vmem:[#allocation52_spill] sm:$0xff] }
 0x24f   : > { %vm9268_vm11 = vcmp.lt.s32.totalorder %v10167_v13, 16  ;;  %v4857_v56 = vsel %vm10171_vm3, %v4813_v45, 0.0  ;;  %v4856_v32 = vadd.f32 %v4855_v51, %v4854_v11  ;;  %v4970_v50 = vsel %vm10172_vm13, %v4927_v34, 0.0  ;;  %4058 = vst.msk [vmem:[%s9043_s23 + $0x58] sm:$0xff] %vm10115_vm0, %v6411_v20  ;;  %vm10174_vm14 = vmmov %vm10115_vm0  ;;  %v10175_v45 = vld [vmem:[#allocation49_spill] sm:$0xff]  ;;  %v10178_v51 = vld [vmem:[#allocation38_spill] sm:$0xff] }
 0x250   : > { %v4815_v5 = vsel %vm9168_vm7, %v6411_v20, 0.0  ;;  %v4972_v43 = vsel %vm10173_vm15, %v4928_v3, 0.0  ;;  %v4971_v14 = vadd.f32 %v4970_v50, %v4969_v23  ;;  %4057 = vst.msk [vmem:[%s9043_s23 + $0x50] sm:$0xff] %vm10174_vm14, %v6412_v0  ;;  %v4814_v58 = vsel %vm9179_vm4, %v6412_v0, 0.0  ;;  %v10177_v11 = vld [vmem:[#allocation45_spill] sm:$0xff]  ;;  %vm10182_vm7 = vmmov %vm10115_vm0  ;;  %v3891_v31 = vpop.f32.mrb[13].mxu0 }
 0x251   : > { %v4930_v28 = vmul.f32 %v4815_v5, %v4815_v5  ;;  %vm10176_vm5 = vnez %v10175_v45  ;;  %v4858_v57 = vadd.f32 %v4857_v56, %v4856_v32  ;;  %v4859_v3 = vsel %vm10182_vm7, %v4814_v58, 0.0  ;;  %v10186_v16 = vld [vmem:[#allocation50_spill] sm:$0xff]  ;;  %v10187_v13 = vld [vmem:[#allocation41_spill] sm:$0xff]  ;;  %v10191_v50 = vld [vmem:[#allocation60_spill] sm:$0xff] }
 0x252   : > { %v10179_v34 = vsel %vm10176_vm5, %v10177_v11, %v10178_v51  ;;  %v4929_v20 = vmul.f32 %v4814_v58, %v4814_v58  ;;  %v6413_v37 = vadd.f32 %v6365_v40, %v10183_v29  ;;  %vm10185_vm4 = vnez %v10184_v15  ;;  %vm10192_vm15 = vmmov %vm10115_vm0 }
 0x253   : > { %vm9294_vm3 = vcmp.lt.s32.totalorder %v10179_v34, 16  ;;  %v10188_v23 = vsel %vm10185_vm4, %v10186_v16, %v10187_v13  ;;  %v4973_v0 = vadd.f32 %v4972_v43, %v4971_v14  ;;  %v6414_v45 = vadd.f32 %v3891_v31, %v10191_v50  ;;  %vm10193_vm14 = vmmov %vm10115_vm0  ;;  %v10197_v43 = vld [vmem:[#allocation51_spill] sm:$0xff]  ;;  %v10203_v31 = vld [vmem:[#allocation53_spill] sm:$0xff] }
 0x254   : > { %vm9305_vm13 = vcmp.lt.s32.totalorder %v10188_v23, 16  ;;  %v4479_v56 = vmul.u32 18, %v4478_v18  ;;  %v4512_v32 = vmul.u32 18, %v4511_v9  ;;  %v4861_v58 = vsel %vm10115_vm0, %v4815_v5, 0.0  ;;  %4060 = vst.msk [vmem:[%s9043_s23 + $0x68] sm:$0xff] %vm10193_vm14, %v6413_v37  ;;  %vm10194_vm5 = vmmov %vm10115_vm0  ;;  %v6368_v9 = vpop.f32.mrb[14].mxu0 }
 0x255   : > { %v4860_v11 = vadd.f32 %v4859_v3, %v4858_v57  ;;  %v4974_v40 = vsel %vm10192_vm15, %v4929_v20, 0.0  ;;  %v4817_v51 = vsel %vm9212_vm6, %v6413_v37, 0.0  ;;  %v4976_v34 = vsel %vm10194_vm5, %v4930_v28, 0.0  ;;  %vm10195_vm7 = vmmov %vm10115_vm0  ;;  %v10196_v5 = vld [vmem:[#allocation54_spill] sm:$0xff]  ;;  %v10202_v20 = vld [vmem:[#allocation64_spill] sm:$0xff]  ;;  %v3901_v35 = vpop.f32.mrb[15].mxu0 }
 0x256   : > { %v4975_v29 = vadd.f32 %v4974_v40, %v4973_v0  ;;  %v4932_v15 = vmul.f32 %v4817_v51, %v4817_v51  ;;  %4059 = vst.msk [vmem:[%s9043_s23 + $0x60] sm:$0xff] %vm10195_vm7, %v6414_v45  ;;  %v4816_v18 = vsel %vm9223_vm2, %v6414_v45, 0.0  ;;  %v10198_v14 = vsel %vm8752_vm12, %v10196_v5, %v10197_v43  ;;  %vm10201_vm6 = vmmov %vm10115_vm0  ;;  %v10207_v23 = vld [vmem:[#allocation65_spill] sm:$0xff] }
 0x257   : > { %vm9326_vm4 = vcmp.lt.s32.totalorder %v10198_v14, 16  ;;  %v4862_v24 = vadd.f32 %v4861_v58, %v4860_v11  ;;  %v4863_v28 = vsel %vm10201_vm6, %v4816_v18, 0.0  ;;  %v4931_v3 = vmul.f32 %v4816_v18, %v4816_v18  ;;  %vm10208_vm12 = vmmov %vm10115_vm0  ;;  %v10216_v14 = vld [vmem:[#allocation68_spill] sm:$0xff] }
 0x258   : > { %v6415_v37 = vadd.f32 %v6368_v9, %v10202_v20  ;;  %v10204_v21 = vsel %vm8770_vm8, %v8813_v8, %v10203_v31  ;;  %v4977_v13 = vadd.f32 %v4976_v34, %v4975_v29  ;;  %v6416_v0 = vadd.f32 %v3901_v35, %v10207_v23  ;;  %vm10209_vm15 = vmmov %vm10115_vm0  ;;  %v6371_v9 = vpop.f32.mrb[16].mxu0 }
 0x259   : > { %vm9337_vm2 = vcmp.lt.s32.totalorder %v10204_v21, 16  ;;  %v9343_v50 = vmul.u32.u64.low 3817748708, %v9018_v41  ;;  %v9344_v45 = vmul.u32.u64.high 3817748708, %v9018_v41, %v9343_v50  ;;  %v4865_v58 = vsel %vm10208_vm12, %v4817_v51, 0.0  ;;  %vm10210_vm8 = vmmov %vm10115_vm0  ;;  %v3911_v30 = vpop.f32.mrb[17].mxu0 }
 0x25a   : > { %v4864_v11 = vadd.f32 %v4863_v28, %v4862_v24  ;;  %v4978_v40 = vsel %vm10115_vm0, %v4931_v3, 0.0  ;;  %4062 = vst.msk [vmem:[%s9043_s23 + $0x78] sm:$0xff] %vm10209_vm15, %v6415_v37  ;;  %v4819_v60 = vsel %vm9257_vm1, %v6415_v37, 0.0  ;;  %v4980_v8 = vsel %vm10210_vm8, %v4932_v15, 0.0  ;;  %vm10211_vm14 = vmmov %vm10115_vm0  ;;  %v10265_v28 = vld [vmem:[#allocation73_spill] sm:$0xff] }
 0x25b   : > { %v4979_v18 = vadd.f32 %v4978_v40, %v4977_v13  ;;  %v4934_v34 = vmul.f32 %v4819_v60, %v4819_v60  ;;  %4061 = vst.msk [vmem:[%s9043_s23 + $0x70] sm:$0xff] %vm10211_vm14, %v6416_v0  ;;  %v4818_v29 = vsel %vm9268_vm11, %v6416_v0, 0.0  ;;  %v10212_v51 = vsel %vm8784_vm9, %v8816_v27, %v8699_v47  ;;  %vm10215_vm1 = vmmov %vm10115_vm0  ;;  %v10221_v27 = vld [vmem:[#allocation72_spill] sm:$0xff] }
 0x25c   : > { %vm9362_vm5 = vcmp.lt.s32.totalorder %v10212_v51, 16  ;;  %v4866_v39 = vadd.f32 %v4865_v58, %v4864_v11  ;;  %v4867_v15 = vsel %vm10215_vm1, %v4818_v29, 0.0  ;;  %v4933_v43 = vmul.f32 %v4818_v29, %v4818_v29  ;;  %vm10222_vm9 = vmmov %vm10115_vm0 }
 0x25d   : > { %v6417_v24 = vadd.f32 %v6371_v9, %v10216_v14  ;;  %vm10217_vm11 = vnez %v9997_v55  ;;  %v4981_v47 = vadd.f32 %v4980_v8, %v4979_v18  ;;  %v6418_v3 = vadd.f32 %v3911_v30, %v10221_v27  ;;  %vm10223_vm6 = vmmov %vm10115_vm0  ;;  %v10246_v27 = vld [vmem:[#allocation67_spill] sm:$0xff] }
 0x25e   : > { %v10218_v52 = vsel %vm10217_vm11, %v8840_v33, %v8715_v61  ;;  %v9379_v20 = vsub.s32 %v8984_v48, %v4479_v56  ;;  %v9382_v37 = vsub.s32 %v8995_v10, %v4512_v32  ;;  %v4869_v35 = vsel %vm10222_vm9, %v4819_v60, 0.0  ;;  %vm10224_vm12 = vmmov %vm10115_vm0  ;;  %v6150_v33 = vpop.f32.mrb[18].mxu1  ;;  %v6374_v48 = vpop.f32.mrb[18].mxu0 }
 0x25f   : > { %vm9373_vm7 = vcmp.lt.s32.totalorder %v10218_v52, 16  ;;  %v4868_v31 = vadd.f32 %v4867_v15, %v4866_v39  ;;  %v4982_v55 = vsel %vm10223_vm6, %v4933_v43, 0.0  ;;  %4064 = vst.msk [vmem:[%s9043_s23 + $0x88] sm:$0xff] %vm10224_vm12, %v6417_v24  ;;  %v4821_v61 = vsel %vm9294_vm3, %v6417_v24, 0.0  ;;  %vm10225_vm15 = vmmov %vm10115_vm0  ;;  %v2201_v56 = vpop.f32.mrb[19].mxu1  ;;  %v3921_v7 = vpop.f32.mrb[19].mxu0 }
 0x260   : > { %v4984_v21 = vsel %vm10115_vm0, %v4934_v34, 0.0  ;;  %v4983_v13 = vadd.f32 %v4982_v55, %v4981_v47  ;;  %v4936_v23 = vmul.f32 %v4821_v61, %v4821_v61  ;;  %4063 = vst.msk [vmem:[%s9043_s23 + $0x80] sm:$0xff] %vm10225_vm15, %v6418_v3  ;;  %v4820_v10 = vsel %vm9305_vm13, %v6418_v3, 0.0  ;;  %vm10230_vm3 = vmmov %vm10115_vm0  ;;  %v6377_v51 = vpop.f32.mrb[20].mxu0  ;;  %v10240_v15 = vld [vmem:[#allocation66_spill] sm:$0xff]  ;;  %v10241_v43 = vld [vmem:[#allocation57_spill] sm:$0xff] }
 0x261   : > { %vm10226_vm8 = vnez %v10003_v25  ;;  %v4870_v0 = vadd.f32 %v4869_v35, %v4868_v31  ;;  %v4871_v50 = vsel %vm10230_vm3, %v4820_v10, 0.0  ;;  %v4935_v58 = vmul.f32 %v4820_v10, %v4820_v10  ;;  %vm10235_vm6 = vmmov %vm10115_vm0  ;;  %v3931_v16 = vpop.f32.mrb[21].mxu0  ;;  %v10248_v3 = vld [vmem:[#allocation69_spill] sm:$0xff]  ;;  %v10249_v35 = vld [vmem:[#allocation59_spill] sm:$0xff] }
 0x262   : > { %v10227_v32 = vsel %vm10226_vm8, %v8863_v36, %v8722_v44  ;;  %v6419_v11 = vadd.f32 %v6374_v48, %v6150_v33  ;;  %vm10231_vm13 = vnez %v10011_v17  ;;  %v4985_v44 = vadd.f32 %v4984_v21, %v4983_v13  ;;  %vm10236_vm12 = vmmov %vm10115_vm0 }
 0x263   : > { %vm9400_vm14 = vcmp.lt.s32.totalorder %v10227_v32, 16  ;;  %v10232_v40 = vsel %vm10231_vm13, %v8876_v59, %v8730_v62  ;;  %v6420_v36 = vadd.f32 %v3921_v7, %v2201_v56  ;;  %vm4548_vm11 = vcmp.ne.s32.totalorder %v9379_v20, 0  ;;  %v6153_v62 = vpop.f32.mrb[20].mxu1  ;;  %vm10237_vm15 = vmmov %vm10115_vm0  ;;  %v10257_v7 = vld [vmem:[#allocation70_spill] sm:$0xff] }
 0x264   : > { %vm9410_vm1 = vcmp.lt.s32.totalorder %v10232_v40, 16  ;;  %vm4584_vm9 = vcmp.lt.s32.totalorder %v9379_v20, 0  ;;  %v4873_v60 = vsel %vm10235_vm6, %v4821_v61, 0.0  ;;  %v4872_v8 = vadd.f32 %v4871_v50, %v4870_v0  ;;  %4066 = vst.msk [vmem:[%s9043_s23 + $0x98] sm:$0xff] %vm10115_vm0, %v6419_v11  ;;  %vm10238_vm8 = vmmov %vm10115_vm0  ;;  %v2211_v39 = vpop.f32.mrb[21].mxu1  ;;  %v10259_v40 = vld [vmem:[#allocation71_spill] sm:$0xff] }
 0x265   : > { %v4986_v18 = vsel %vm10236_vm12, %v4935_v58, 0.0  ;;  %v4823_v17 = vsel %vm9326_vm4, %v6419_v11, 0.0  ;;  %v4988_v59 = vsel %vm10237_vm15, %v4936_v23, 0.0  ;;  %4065 = vst.msk [vmem:[%s9043_s23 + $0x90] sm:$0xff] %vm10238_vm8, %v6420_v36  ;;  %v4822_v9 = vsel %vm9337_vm2, %v6420_v36, 0.0  ;;  %vm10245_vm4 = vmmov %vm10115_vm0  ;;  %v6156_v56 = vpop.f32.mrb[22].mxu1 }
 0x266   : > { %v4987_v34 = vadd.f32 %v4986_v18, %v4985_v44  ;;  %v4938_v29 = vmul.f32 %v4823_v17, %v4823_v17  ;;  %vm10239_vm3 = vnez %v10018_v22  ;;  %v4874_v24 = vadd.f32 %v4873_v60, %v4872_v8  ;;  %vm10253_vm12 = vmmov %vm10115_vm0  ;;  %v6380_v58 = vpop.f32.mrb[22].mxu0  ;;  %v2221_v11 = vpop.f32.mrb[23].mxu1  ;;  %v10260_v44 = vld [vmem:[#allocation61_spill] sm:$0xff] }
 0x267   : > { %v10242_v14 = vsel %vm10239_vm3, %v10240_v15, %v10241_v43  ;;  %v4875_v30 = vsel %vm10245_vm4, %v4822_v9, 0.0  ;;  %v4937_v52 = vmul.f32 %v4822_v9, %v4822_v9  ;;  %v6421_v47 = vadd.f32 %v6377_v51, %v6153_v62  ;;  %vm10254_vm15 = vmmov %vm10115_vm0  ;;  %v3941_v62 = vpop.f32.mrb[23].mxu0 }
 0x268   : > { %vm9432_vm13 = vcmp.lt.s32.totalorder %v10242_v14, 16  ;;  %vm10247_vm2 = vnez %v10246_v27  ;;  %v4989_v55 = vadd.f32 %v4988_v59, %v4987_v34  ;;  %v6422_v61 = vadd.f32 %v3931_v16, %v2211_v39  ;;  %vm10255_vm8 = vmmov %vm10115_vm0  ;;  %v10267_v59 = vld [vmem:[#allocation74_spill] sm:$0xff] }
 0x269   : > { %v10250_v31 = vsel %vm10247_vm2, %v10248_v3, %v10249_v35  ;;  %v9447_v33 = vadd.s32 18, %v9379_v20  ;;  %v4500_v21 = vshrl.u32 %v9344_v45, 4  ;;  %v4877_v13 = vsel %vm10253_vm12, %v4823_v17, 0.0  ;;  %4068 = vst.msk [vmem:[%s9043_s23 + $0xa8] sm:$0xff] %vm10254_vm15, %v6421_v47  ;;  %vm10256_vm3 = vmmov %vm10115_vm0  ;;  %v10268_v34 = vld [vmem:[#allocation62_spill] sm:$0xff] }
 0x26a   : > { %vm9442_vm6 = vcmp.lt.s32.totalorder %v10250_v31, 16  ;;  %v4876_v23 = vadd.f32 %v4875_v30, %v4874_v24  ;;  %v4990_v10 = vsel %vm10115_vm0, %v4937_v52, 0.0  ;;  %v4825_v48 = vsel %vm9362_vm5, %v6421_v47, 0.0  ;;  %4067 = vst.msk [vmem:[%s9043_s23 + $0xa0] sm:$0xff] %vm10256_vm3, %v6422_v61  ;;  %vm10264_vm5 = vmmov %vm10115_vm0  ;;  %v6159_v47 = vpop.f32.mrb[24].mxu1  ;;  %v6383_v31 = vpop.f32.mrb[24].mxu0 }
 0x26b   : > { %v4992_v32 = vsel %vm10255_vm8, %v4938_v29, 0.0  ;;  %v4991_v0 = vadd.f32 %v4990_v10, %v4989_v55  ;;  %v4940_v50 = vmul.f32 %v4825_v48, %v4825_v48  ;;  %v4824_v45 = vsel %vm9373_vm7, %v6422_v61, 0.0  ;;  %vm10272_vm15 = vmmov %vm10115_vm0  ;;  %v2231_v55 = vpop.f32.mrb[25].mxu1  ;;  %v10277_v61 = vld [vmem:[#allocation76_spill] sm:$0xff]  ;;  %v3951_v25 = vpop.f32.mrb[25].mxu0 }
 0x26c   : > { %vm10258_vm4 = vnez %v10257_v7  ;;  %v4878_v60 = vadd.f32 %v4877_v13, %v4876_v23  ;;  %v4879_v8 = vsel %vm10264_vm5, %v4824_v45, 0.0  ;;  %v4939_v18 = vmul.f32 %v4824_v45, %v4824_v45  ;;  %vm10273_vm8 = vmmov %vm10115_vm0  ;;  %v10280_v13 = vld [vmem:[#allocation63_spill] sm:$0xff]  ;;  %v10287_v45 = vld [vmem:[#allocation77_spill] sm:$0xff] }
 0x26d   : > { %v10261_v36 = vsel %vm10258_vm4, %v10259_v40, %v10260_v44  ;;  %v6423_v17 = vadd.f32 %v6380_v58, %v6156_v56  ;;  %vm10266_vm7 = vnez %v10265_v28  ;;  %v4993_v51 = vadd.f32 %v4992_v32, %v4991_v0  ;;  %vm9493_vm3 = vmand %vm4584_vm9, %vm4548_vm11 }
 0x26e   : > { %vm9466_vm2 = vcmp.lt.s32.totalorder %v10261_v36, 16  ;;  %v10269_v29 = vsel %vm10266_vm7, %v10267_v59, %v10268_v34  ;;  %v6424_v39 = vadd.f32 %v3941_v62, %v2221_v11  ;;  %v9481_v15 = vadd.s32 18, %v9382_v37  ;;  %vm10276_vm7 = vmmov %vm10115_vm0 }
 0x26f   : > { %vm9476_vm12 = vcmp.lt.s32.totalorder %v10269_v29, 16  ;;  %v4501_v43 = vmul.u32 18, %v4500_v21  ;;  %v4881_v14 = vsel %vm10115_vm0, %v4825_v48, 0.0  ;;  %v4880_v24 = vadd.f32 %v4879_v8, %v4878_v60  ;;  %4070 = vst.msk [vmem:[%s9043_s23 + $0xb8] sm:$0xff] %vm10273_vm8, %v6423_v17  ;;  %v10279_v21 = vld [vmem:[#allocation75_spill] sm:$0xff]  ;;  %vm10284_vm9 = vmmov %vm10115_vm0 }
 0x270   : > { %v4994_v30 = vsel %vm10272_vm15, %v4939_v18, 0.0  ;;  %v4827_v52 = vsel %vm9400_vm14, %v6423_v17, 0.0  ;;  %vm4551_vm4 = vcmp.ne.s32.totalorder %v9382_v37, 0  ;;  %vm4587_vm5 = vcmp.lt.s32.totalorder %v9382_v37, 0  ;;  %4069 = vst.msk [vmem:[%s9043_s23 + $0xb0] sm:$0xff] %vm10115_vm0, %v6424_v39  ;;  %vm10291_vm8 = vmmov %vm10115_vm0  ;;  %v6162_v17 = vpop.f32.mrb[26].mxu1 }
 0x271   : > { %v4996_v27 = vsel %vm10276_vm7, %v4940_v50, 0.0  ;;  %v4995_v3 = vadd.f32 %v4994_v30, %v4993_v51  ;;  %v4942_v35 = vmul.f32 %v4827_v52, %v4827_v52  ;;  %v4826_v63 = vsel %vm9410_vm1, %v6424_v39, 0.0  ;;  %v10286_v50 = vld [vmem:[#allocation15_spill] sm:$0xff]  ;;  %vm10292_vm7 = vmmov %vm10115_vm0 }
 0x272   : > { %vm10278_vm14 = vnez %v10277_v61  ;;  %v4882_v48 = vadd.f32 %v4881_v14, %v4880_v24  ;;  %v4883_v56 = vsel %vm10284_vm9, %v4826_v63, 0.0  ;;  %v4941_v32 = vmul.f32 %v4826_v63, %v4826_v63  ;;  %vm10294_vm9 = vmmov %vm10115_vm0 }
 0x273   : > { %v10281_v23 = vsel %vm10278_vm14, %v10279_v21, %v10280_v13  ;;  %v6425_v0 = vadd.f32 %v6383_v31, %v6159_v47  ;;  %vm10285_vm1 = vnez %v10082_v46  ;;  %v4997_v7 = vadd.f32 %v4996_v27, %v4995_v3  ;;  %vm10293_vm14 = vmmov %vm10115_vm0 }
 0x274   : > { %vm9509_vm11 = vcmp.lt.s32.totalorder %v10281_v23, 16  ;;  %v10288_v58 = vsel %vm10285_vm1, %v10286_v50, %v10287_v45  ;;  %v6426_v40 = vadd.f32 %v3951_v25, %v2231_v55  ;;  %v4692_v44 = vsel %vm9493_vm3, %v9447_v33, %v9379_v20  ;;  %v6386_v20 = vpop.f32.mrb[26].mxu0  ;;  %v2241_v33 = vpop.f32.mrb[27].mxu1  ;;  %vm10303_vm3 = vmmov %vm10294_vm9 }
 0x275   : > { %vm9519_vm15 = vcmp.lt.s32.totalorder %v10288_v58, 16  ;;  %v9528_v36 = vsub.s32 %v9018_v41, %v4501_v43  ;;  %v4885_v60 = vsel %vm10291_vm8, %v4827_v52, 0.0  ;;  %v4884_v46 = vadd.f32 %v4883_v56, %v4882_v48  ;;  %4072 = vst.msk [vmem:[%s9043_s23 + $0xc8] sm:$0xff] %vm10115_vm0, %v6425_v0  ;;  %v3961_v22 = vpop.f32.mrb[27].mxu0  ;;  %v6165_v4 = vpop.f32.mrb[28].mxu1  ;;  %vm9591_vm10 = vmand %vm4587_vm5, %vm4551_vm4 }
 0x276   : > { %v4998_v8 = vsel %vm10292_vm7, %v4941_v32, 0.0  ;;  %v4829_v18 = vsel %vm9432_vm13, %v6425_v0, 0.0  ;;  %v5000_v62 = vsel %vm10293_vm14, %v4942_v35, 0.0  ;;  %4071 = vst.msk [vmem:[%s9043_s23 + $0xc0] sm:$0xff] %vm10294_vm9, %v6426_v40  ;;  %v4828_v41 = vsel %vm9442_vm6, %v6426_v40, 0.0  ;;  %vm10298_vm13 = vmmov %vm10115_vm0  ;;  %v6389_v52 = vpop.f32.mrb[28].mxu0 }
 0x277   : > { %v4999_v28 = vadd.f32 %v4998_v8, %v4997_v7  ;;  %v4944_v59 = vmul.f32 %v4829_v18, %v4829_v18  ;;  %vm9546_vm1 = vcmp.lt.s32.totalorder %v4691_v54, 16  ;;  %v4886_v34 = vadd.f32 %v4885_v60, %v4884_v46  ;;  %vm10302_vm14 = vmmov %vm10294_vm9  ;;  %v2251_v47 = vpop.f32.mrb[29].mxu1  ;;  %v3971_v63 = vpop.f32.mrb[29].mxu0 }
 0x278   : > { %v4887_v29 = vsel %vm10298_vm13, %v4828_v41, 0.0  ;;  %v4943_v51 = vmul.f32 %v4828_v41, %v4828_v41  ;;  %v6427_v39 = vadd.f32 %v6386_v20, %v6162_v17  ;;  %vm9556_vm8 = vcmp.lt.s32.totalorder %v4690_v2, 16  ;;  %vm10304_vm13 = vmmov %vm10303_vm3  ;;  %v6168_v13 = vpop.f32.mrb[30].mxu1  ;;  %v6392_v0 = vpop.f32.mrb[30].mxu0 }
 0x279   : > { %v5001_v26 = vadd.f32 %v5000_v62, %v4999_v28  ;;  %v6428_v12 = vadd.f32 %v3961_v22, %v2241_v33  ;;  %vm4550_vm7 = vcmp.ne.s32.totalorder %v9528_v36, 0  ;;  %vm4586_vm0 = vcmp.lt.s32.totalorder %v9528_v36, 0  ;;  %vm10305_vm6 = vmmov %vm10303_vm3  ;;  %v2261_v25 = vpop.f32.mrb[31].mxu1  ;;  %v3981_v40 = vpop.f32.mrb[31].mxu0 }
 0x27a   : > { %v4889_v54 = vsel %vm10302_vm14, %v4829_v18, 0.0  ;;  %v4888_v43 = vadd.f32 %v4887_v29, %v4886_v34  ;;  %v5002_v14 = vsel %vm10294_vm9, %v4943_v51, 0.0  ;;  %4074 = vst.msk [vmem:[%s9043_s23 + $0xd8] sm:$0xff] %vm10303_vm3, %v6427_v39  ;;  %v4831_v53 = vsel %vm9466_vm2, %v6427_v39, 0.0  ;;  %vm10308_vm2 = vmmov %vm10303_vm3  ;;  %v6171_v28 = vpop.f32.mrb[32].mxu1 }
 0x27b   : > { %v5004_v19 = vsel %vm10304_vm13, %v4944_v59, 0.0  ;;  %v5003_v2 = vadd.f32 %v5002_v14, %v5001_v26  ;;  %v4946_v24 = vmul.f32 %v4831_v53, %v4831_v53  ;;  %4073 = vst.msk [vmem:[%s9043_s23 + $0xd0] sm:$0xff] %vm10305_vm6, %v6428_v12  ;;  %v4830_v30 = vsel %vm9476_vm12, %v6428_v12, 0.0  ;;  %vm10313_vm9 = vmmov %vm10308_vm2  ;;  %v2271_v20 = vpop.f32.mrb[33].mxu1 }
 0x27c   : > { %vm9578_vm14 = vcmp.lt.s32.totalorder %v4693_v6, 16  ;;  %v4890_v16 = vadd.f32 %v4889_v54, %v4888_v43  ;;  %v4891_v27 = vsel %vm10308_vm2, %v4830_v30, 0.0  ;;  %v4945_v3 = vmul.f32 %v4830_v30, %v4830_v30  ;;  %vm10314_vm3 = vmmov %vm10308_vm2 }
 0x27d   : > { %v6429_v35 = vadd.f32 %v6389_v52, %v6165_v4  ;;  %v5005_v9 = vadd.f32 %v5004_v19, %v5003_v2  ;;  %v6430_v31 = vadd.f32 %v3971_v63, %v2251_v47  ;;  %vm9583_vm12 = vcmp.lt.s32.totalorder %v4692_v44, 16  ;;  %vm10315_vm13 = vmmov %vm10308_vm2 }
 0x27e   : > { %v4658_v1 = vadd.s32 18, %v9528_v36  ;;  %v4893_v42 = vsel %vm10313_vm9, %v4831_v53, 0.0  ;;  %v4892_v6 = vadd.f32 %v4891_v27, %v4890_v16  ;;  %v5006_v61 = vsel %vm10314_vm3, %v4945_v3, 0.0  ;;  %vm9606_vm4 = vmand %vm4586_vm0, %vm4550_vm7  ;;  %v6174_v53 = vpop.f32.mrb[34].mxu1 }
 0x27f   : > { %4076 = vst.msk [vmem:[%s9043_s23 + $0xe8] sm:$0xff] %vm10315_vm13, %v6429_v35  ;;  %v4833_v21 = vsel %vm9509_vm11, %v6429_v35, 0.0  ;;  %vm10318_vm5 = vmmov %vm10308_vm2  ;;  %v5007_v56 = vadd.f32 %v5006_v61, %v5005_v9  ;;  %v4832_v10 = vsel %vm9519_vm15, %v6430_v31, 0.0  ;;  %v6431_v7 = vadd.f32 %v6392_v0, %v6168_v13  ;;  %v2281_v52 = vpop.f32.mrb[35].mxu1 }
 0x280   : > { %v5008_v48 = vsel %vm10318_vm5, %v4946_v24, 0.0  ;;  %v4948_v32 = vmul.f32 %v4833_v21, %v4833_v21  ;;  %vm10319_vm6 = vmmov %vm10308_vm2  ;;  %v4894_v50 = vadd.f32 %v4893_v42, %v4892_v6  ;;  %v4947_v58 = vmul.f32 %v4832_v10, %v4832_v10 }
 0x281   : > { %4075 = vst.msk [vmem:[%s9043_s23 + $0xe0] sm:$0xff] %vm10319_vm6, %v6430_v31  ;;  %vm10320_vm11 = vmmov %vm10308_vm2  ;;  %v5009_v44 = vadd.f32 %v5008_v48, %v5007_v56  ;;  %v6432_v60 = vadd.f32 %v3981_v40, %v2261_v25  ;;  %v4695_v46 = vsel %vm9591_vm10, %v9481_v15, %v9382_v37  ;;  %v4694_v11 = vsel %vm9606_vm4, %v4658_v1, %v9528_v36  ;;  %v6395_v36 = vpop.f32.mrb[32].mxu0 }
 0x282   : > { %v4895_v45 = vsel %vm10320_vm11, %v4832_v10, 0.0  ;;  %vm10321_vm15 = vmmov %vm10308_vm2  ;;  %v4835_v62 = vsel %vm9546_vm1, %v6431_v7, 0.0  ;;  %v6433_v57 = vadd.f32 %v6395_v36, %v6171_v28  ;;  %v3991_v51 = vpop.f32.mrb[33].mxu0  ;;  %vm9636_vm1 = vcmp.lt.s32.totalorder %v4695_v46, 16 }
 0x283   : > { %v4897_v8 = vsel %vm10321_vm15, %v4833_v21, 0.0  ;;  %v4896_v18 = vadd.f32 %v4895_v45, %v4894_v50  ;;  %vm10322_vm7 = vmmov %vm10308_vm2  ;;  %v4950_v37 = vmul.f32 %v4835_v62, %v4835_v62  ;;  %v4834_v15 = vsel %vm9556_vm8, %v6432_v60, 0.0  ;;  %v6398_v30 = vpop.f32.mrb[34].mxu0 }
 0x284   : > { %v5010_v17 = vsel %vm10322_vm7, %v4947_v58, 0.0  ;;  %vm10323_vm0 = vmmov %vm10308_vm2  ;;  %v4949_v29 = vmul.f32 %v4834_v15, %v4834_v15  ;;  %v6434_v22 = vadd.f32 %v3991_v51, %v2271_v20  ;;  %vm9640_vm3 = vcmp.lt.s32.totalorder %v4694_v11, 16  ;;  %v4001_v3 = vpop.f32.mrb[35].mxu0 }
 0x285   : > { %4078 = vst.msk [vmem:[%s9043_s23 + $0xf8] sm:$0xff] %vm10323_vm0, %v6431_v7  ;;  %vm10324_vm2 = vmmov %vm10323_vm0  ;;  %v5011_v41 = vadd.f32 %v5010_v17, %v5009_v44  ;;  %v4898_v33 = vadd.f32 %v4897_v8, %v4896_v18  ;;  %v4837_v14 = vsel %vm9578_vm14, %v6433_v57, 0.0  ;;  %v6435_v27 = vadd.f32 %v6398_v30, %v6174_v53 }
 0x286   : > { %v5012_v59 = vsel %vm10324_vm2, %v4948_v32, 0.0  ;;  %vm10325_vm10 = vmmov %vm10323_vm0  ;;  %v4952_v2 = vmul.f32 %v4837_v14, %v4837_v14  ;;  %v4836_v24 = vsel %vm9583_vm12, %v6434_v22, 0.0  ;;  %v6436_v63 = vadd.f32 %v4001_v3, %v2281_v52 }
 0x287   : > { %4077 = vst.msk [vmem:[%s9043_s23 + $0xf0] sm:$0xff] %vm10325_vm10, %v6432_v60  ;;  %vm10326_vm9 = vmmov %vm10323_vm0  ;;  %v5013_v39 = vadd.f32 %v5012_v59, %v5011_v41  ;;  %v4951_v5 = vmul.f32 %v4836_v24, %v4836_v24  ;;  %v4839_v55 = vsel %vm9636_vm1, %v6435_v27, 0.0 }
 0x288   : > { %v4899_v34 = vsel %vm10326_vm9, %v4834_v15, 0.0  ;;  %vm10331_vm8 = vmmov %vm10323_vm0  ;;  %4081 = vst.msk [vmem:[%s9043_s23 + $0x110] sm:$0xff] %vm10323_vm0, %v6436_v63  ;;  %v4838_v6 = vsel %vm9640_vm3, %v6436_v63, 0.0  ;;  %v4954_v61 = vmul.f32 %v4839_v55, %v4839_v55 }
 0x289   : > { %v4901_v12 = vsel %vm10331_vm8, %v4835_v62, 0.0  ;;  %v4900_v54 = vadd.f32 %v4899_v34, %v4898_v33  ;;  %vm10332_vm13 = vmmov %vm10323_vm0  ;;  %v4953_v23 = vmul.f32 %v4838_v6, %v4838_v6 }
 0x28a   : > { %v5014_v43 = vsel %vm10332_vm13, %v4949_v29, 0.0  ;;  %vm10333_vm4 = vmmov %vm10323_vm0 }
 0x28b   : > { %4080 = vst.msk [vmem:[%s9043_s23 + $0x108] sm:$0xff] %vm10333_vm4, %v6433_v57  ;;  %vm10334_vm5 = vmmov %vm10323_vm0  ;;  %v5015_v19 = vadd.f32 %v5014_v43, %v5013_v39  ;;  %v4902_v47 = vadd.f32 %v4901_v12, %v4900_v54 }
 0x28c   : > { %v5016_v4 = vsel %vm10334_vm5, %v4950_v37, 0.0  ;;  %vm10335_vm6 = vmmov %vm10323_vm0 }
 0x28d   : > { %4079 = vst.msk [vmem:[%s9043_s23 + $0x100] sm:$0xff] %vm10335_vm6, %v6434_v22  ;;  %vm10336_vm11 = vmmov %vm10323_vm0  ;;  %v5017_v35 = vadd.f32 %v5016_v4, %v5015_v19 }
 0x28e   : > { %v4903_v16 = vsel %vm10336_vm11, %v4836_v24, 0.0  ;;  %vm10337_vm14 = vmmov %vm10323_vm0 }
 0x28f   : > { %v4904_v9 = vadd.f32 %v4903_v16, %v4902_v47  ;;  %v5018_v31 = vsel %vm10337_vm14, %v4951_v5, 0.0  ;;  %vm10338_vm12 = vmmov %vm10323_vm0 }
 0x290   : > { %4082 = vst.msk [vmem:[%s9043_s23 + $0x118] sm:$0xff] %vm10338_vm12, %v6435_v27  ;;  %vm10339_vm15 = vmmov %vm10323_vm0  ;;  %v5019_v42 = vadd.f32 %v5018_v31, %v5017_v35 }
 0x291   : > { %v4905_v49 = vsel %vm10339_vm15, %v4837_v14, 0.0  ;;  %vm10340_vm7 = vmmov %vm10323_vm0 }
 0x292   : > { %v5020_v1 = vsel %vm10340_vm7, %v4952_v2, 0.0  ;;  %v4906_v21 = vadd.f32 %v4905_v49, %v4904_v9  ;;  %vm10341_vm2 = vmmov %vm10323_vm0 }
 0x293   : > { %v4907_v13 = vsel %vm10341_vm2, %v4838_v6, 0.0 }
 0x294   : > { %6910 = shalt.err (!%p6907_p7)
}
 0x295   : > { %s6911_s24 = scalar_lea.hbm %s9660_s6, 4608  ;;  %s6915_s21 = scalar_lea.hbm %s9795_s2, 9216 }
 0x296   : > { %p6912_p9 = scmp.ne.s32.totalorder %s9660_s6, %s6911_s24  ;;  %p6916_p5 = scmp.lt.u32.totalorder %s9660_s6, %s9795_s2 }
 0x297   : > { %p6917_p11 = scmp.lt.u32.totalorder %s6915_s21, %s6911_s24  ;;  %p6919_p4 = scmp.lt.u32.totalorder %s6911_s24, %s9660_s6 }
 0x298   : > { %p6913_p2 = pnand %p6912_p9, %p7158_p12 }
 0x299   : > { %p6918_p1 = por %p6917_p11, %p6916_p5 }
 0x29a   : > { %p6914_p0 = pneg %p6913_p2 }
 0x29b   : > { %p6920_p6 = por %p6919_p4, %p6918_p1 }
 0x29d   : > { %p6921_p8 = pnand %p6920_p6, %p6914_p0 }
 0x29f   : > { %6924 = shalt.err (!%p6921_p8)
}
 0x2a0   : > { %s7036_s29 = smov 128   ;;  %s7037_s11 = smov 8   ;;  %v5021_v48 = vadd.f32 %v5020_v1, %v5019_v42  ;;  %v4908_v56 = vadd.f32 %v4907_v13, %v4906_v21  ;;  %vm10342_vm10 = vmmov %vm10323_vm0  ;;  %vm4917_vm3 = vcmask 57344  }
 0x2a1   : > { %6772 = dma.vmem_to_hbm [thread:$0]  (%p7158_p12), %s9662_s25, 4608, %s9660_s6, %s5034_s8, %s7036_s29, %s7036_s29, %s7037_s11   ;;  %v5022_v32 = vsel %vm10342_vm10, %v4953_v23, 0.0  ;;  %vm10343_vm9 = vmmov %vm10323_vm0 }
 0x2a2   : > { %v4909_v10 = vsel %vm10343_vm9, %v4839_v55, 0.0  ;;  %v5023_v0 = vadd.f32 %v5022_v32, %v5021_v48  ;;  %vm10344_vm1 = vmmov %vm10323_vm0  ;;  %s5038_s25 = sand.u32 1, %s7086_s19   ;;  %s5558_s6 = sshll.u32 %s7086_s19, 4 }
 0x2a3   : > { %v5024_v25 = vsel %vm10344_vm1, %v4954_v61, 0.0  ;;  %v4910_v50 = vadd.f32 %v4909_v10, %v4908_v56  ;;  %s240_s8 = scalar_lea.vmem [#allocation8], %s7206_s14  ;;  %s246_s28 = scalar_lea.vmem [#allocation10], %s7206_s14 }
 0x2a4   : > { %v5025_v45 = vadd.f32 %v5024_v25, %v5023_v0  ;;  %s5071_s9 = sshll.u32 %s240_s8, 4  ;;  %s5084_s12 = sshll.u32 %s246_s28, 4  ;;  %s9714_s9 = int_to_ptr.vmem [resolvable:$true] %s5071_s9  ;;  %s9721_s12 = int_to_ptr.vmem [resolvable:$true] %s5084_s12 }
 0x2a5   : > { %v4911_v58 = vrot.slane %v4910_v50, 4  ;;  %s9712_s7 = scalar_lea.hbm %s9796_s3, %s5558_s6  ;;  %s9719_s21 = scalar_lea.hbm %s9797_s4, %s5558_s6 }
 0x2a6   : > { %v5026_v7 = vrot.slane %v5025_v45, 4  ;;  %s9724_s23 = scalar_lea.sflag [#allocation9], %s5038_s25  ;;  %s6925_s10 = scalar_lea.vmem %s9714_s9, 16 }
 0x2a7   : > { %v4912_v40 = vadd.f32 %v4911_v58, %v4910_v50  ;;  %p6926_p10 = scmp.ne.s32.totalorder %s9714_s9, %s6925_s10  ;;  %s7038_s29 = smov [#allocation8]  }
 0x2a8   : > { %v5027_v44 = vadd.f32 %v5026_v7, %v5025_v45  ;;  %s6929_s11 = sshll.u32 %s7038_s29, 4  ;;  %s6930_s11 = int_to_ptr.vmem [resolvable:$false] %s6929_s11 }
 0x2a9   : > { %v4913_v60 = vrot.slane %v4912_v40, 2  ;;  %p6927_p13 = pnand %p6926_p10, %p7158_p12  ;;  %s6931_s13 = scalar_lea.vmem %s6930_s11, 32 }
 0x2aa   : > { %v5028_v46 = vrot.slane %v5027_v44, 2  ;;  %p6932_p7 = scmp.lt.s32.totalorder %s9714_s9, %s6930_s11  ;;  %p6933_p9 = scmp.lt.s32.totalorder %s6931_s13, %s6925_s10 }
 0x2ab   : > { %v4914_v11 = vadd.f32 %v4913_v60, %v4912_v40  ;;  %p6928_p3 = pneg %p6927_p13 }
 0x2ac   : > { %v5029_v8 = vadd.f32 %v5028_v46, %v5027_v44  ;;  %p6934_p2 = por %p6933_p9, %p6932_p7 }
 0x2ad   : > { %v4915_v18 = vrot.slane %v4914_v11, 1 }
 0x2ae   : > { %v5030_v17 = vrot.slane %v5029_v8, 1  ;;  %p6935_p0 = pnand %p6934_p2, %p6928_p3 }
 0x2af   : > { %v4916_v62 = vadd.f32 %v4915_v18, %v4914_v11 }
 0x2b0   : > { %v5031_v28 = vadd.f32 %v5030_v17, %v5029_v8 }
 0x2b1   : > { %4918 = vst.msk [vmem:[%s240_s8] sm:$0x1] %vm4917_vm3, %v4916_v62 }
 0x2b2   : > { %6938 = shalt.err (!%p6935_p0)
}
 0x2b3   : > { %s6939_s25 = scalar_lea.hbm %s9712_s7, 16  ;;  %s6943_s24 = scalar_lea.hbm %s9796_s3, 32 }
 0x2b4   : > { %p6940_p5 = scmp.ne.s32.totalorder %s9712_s7, %s6939_s25  ;;  %p6944_p4 = scmp.lt.u32.totalorder %s9712_s7, %s9796_s3 }
 0x2b5   : > { %p6945_p6 = scmp.lt.u32.totalorder %s6943_s24, %s6939_s25  ;;  %p6947_p10 = scmp.lt.u32.totalorder %s6939_s25, %s9712_s7 }
 0x2b6   : > { %p6941_p11 = pnand %p6940_p5, %p7158_p12 }
 0x2b7   : > { %p6946_p8 = por %p6945_p6, %p6944_p4 }
 0x2b8   : > { %p6942_p1 = pneg %p6941_p11 }
 0x2b9   : > { %p6948_p13 = por %p6947_p10, %p6946_p8 }
 0x2bb   : > { %p6949_p3 = pnand %p6948_p13, %p6942_p1 }
 0x2bd   : > { %6952 = shalt.err (!%p6949_p3)
}
 0x2be   : > { %6773 = dma.vmem_to_hbm [thread:$0]  (%p7158_p12), %s9714_s9, 16, %s9712_s7, %s9724_s23   ;;  %5032 = vst.msk [vmem:[%s246_s28] sm:$0x1] %vm4917_vm3, %v5031_v28 }
 0x2bf   : > { %s6953_s10 = scalar_lea.vmem %s9721_s12, 16  ;;  %s7039_s29 = smov [#allocation10]  }
 0x2c0   : > { %p6954_p7 = scmp.ne.s32.totalorder %s9721_s12, %s6953_s10  ;;  %s6957_s11 = sshll.u32 %s7039_s29, 4  ;;  %s6958_s11 = int_to_ptr.vmem [resolvable:$false] %s6957_s11 }
 0x2c1   : > { %s6959_s13 = scalar_lea.vmem %s6958_s11, 32  ;;  %p6960_p0 = scmp.lt.s32.totalorder %s9721_s12, %s6958_s11 }
 0x2c2   : > { %p6955_p9 = pnand %p6954_p7, %p7158_p12  ;;  %p6961_p5 = scmp.lt.s32.totalorder %s6959_s13, %s6953_s10 }
 0x2c4   : > { %p6956_p2 = pneg %p6955_p9  ;;  %p6962_p11 = por %p6961_p5, %p6960_p0 }
 0x2c6   : > { %p6963_p1 = pnand %p6962_p11, %p6956_p2 }
 0x2c8   : > { %6966 = shalt.err (!%p6963_p1)
}
 0x2c9   : > { %s6967_s14 = scalar_lea.hbm %s9719_s21, 16  ;;  %s6971_s7 = scalar_lea.hbm %s9797_s4, 32 }
 0x2ca   : > { %p6968_p4 = scmp.ne.s32.totalorder %s9719_s21, %s6967_s14  ;;  %p6972_p10 = scmp.lt.u32.totalorder %s9719_s21, %s9797_s4 }
 0x2cb   : > { %p6973_p13 = scmp.lt.u32.totalorder %s6971_s7, %s6967_s14  ;;  %p6975_p7 = scmp.lt.u32.totalorder %s6967_s14, %s9719_s21 }
 0x2cc   : > { %p6969_p6 = pnand %p6968_p4, %p7158_p12 }
 0x2cd   : > { %p6974_p3 = por %p6973_p13, %p6972_p10 }
 0x2ce   : > { %p6970_p8 = pneg %p6969_p6 }
 0x2cf   : > { %p6976_p9 = por %p6975_p7, %p6974_p3 }
 0x2d1   : > { %p6977_p2 = pnand %p6976_p9, %p6970_p8 }
 0x2d3   : > { %6980 = shalt.err (!%p6977_p2)
}
 0x2d4   : > { %6774 = dma.vmem_to_hbm [thread:$0]  (%p7158_p12), %s9721_s12, 16, %s9719_s21, %s9724_s23  }
 0x2d5 PF: > { %s5096_s8 = sand.u32 1, %s7015_s15   ;;  %p10345_p0 = scmp.ne.s32.totalorder %s9876_s22, 0 }
 0x2d6   : > { %p10346_p5 = scmp.ge.s32.totalorder %s7027_s18, 2  ;;  %s5097_s24 = scalar_lea.sflag [#allocation4], %s5096_s8 }
 0x2d8   : > { %p6787_p11 = pnand %p10346_p5, %p10345_p0 }
 0x2da   : > { %7006 = dma.done.wait (!%p6787_p11), %s5097_s24, 4608  }
 0x2db   : > { %7008 = vsyncadd (!%p6787_p11), %s5097_s24, 4294962688  ;;  %s5105_s19 = sand.u32 1, %s5217_s20  }
 0x2dc   : > { %s5106_s26 = scalar_lea.sflag [#allocation9], %s5105_s19 }
 0x2dd   : > { %7010 = dma.done.wait (!%p6787_p11), %s5106_s26, 32  }
 0x2de   : > { %7012 = vsyncadd (!%p6787_p11), %s5106_s26, 4294967264  ;;  %p22_p12 = scmp.ge.s32.totalorder %s7123_s27, 4   ;;  %s10347_s15 = smov %s7019_s16 }
 0x2df   : > { %s10348_s16 = smov %s7023_s17  ;;  %s10349_s17 = smov %s7154_s30 }
 0x2e0   : > { %s10350_s18 = smov %s7123_s27  ;;  %24 = sbr.rel (!%p22_p12) target bundleno = 8 (0x8), region = 117 }
 0x2e7   :  { %5118 = vsyncpa [#allocation3], 1 }
 0x2e8   :  { %5120 = vsyncpa [#allocation3 + $0x1], 1 }
 0x2e9   :  { %5121 = vsyncpa [#allocation6], 1 }
 0x2ea   :  { %5122 = vsyncpa [#allocation4], 1 }
 0x2eb   :  { %5124 = vsyncpa [#allocation4 + $0x1], 1 }
 0x2ec   :  { %5125 = vsyncpa [#allocation9], 1 }
 0x2ed   :  { %5127 = vsyncpa [#allocation9 + $0x1], 1 }

</bundles_post_ra>
